<compile_context>
chip_gen: v7x
topology: tpu7x:2x2x1
jax: 0.10.0
libtpu: 0.0.40
codegen_flags: <defaults>
</compile_context>

<pallas_src>
import math

import jax
import jax.numpy as jnp
from jax import lax
from jax.experimental import pallas as pl
from jax.experimental.pallas import tpu as pltpu


def _bsconvs_kernel(x_ref, top_ref, bot_ref, wf_ref, dww_ref, b_ref, o_ref,
                    xbuf_ref):
    """Fused pointwise (pw2 . pw1) + depthwise 3x3 + bias for one row block.

    x_ref:    (1, Cin, TH, W)    f32 VMEM  this block's input rows
    top_ref:  (1, 1, Cin, 1, W)  f32 VMEM  row above the block (zeros at image top)
    bot_ref:  (1, 1, Cin, 1, W)  f32 VMEM  row below the block (zeros at image bottom)
    wf_ref:   (Cout, Cin)        f32 SMEM  fused pointwise weight, wf[co, ci] = (w1 @ w2)[ci, co]
    dww_ref:  (Cout, 9)          f32 SMEM  depthwise 3x3 taps, row-major (i*3 + j)
    b_ref:    (Cout,)            f32 SMEM  depthwise bias
    o_ref:    (1, Cout, TH, W)   f32 VMEM  output block
    xbuf_ref: (Cin, TH+2, W+2)   f32 VMEM  halo / zero-padded input staging scratch
    """
    cin, th, w = x_ref.shape[1], x_ref.shape[2], x_ref.shape[3]
    cout = o_ref.shape[1]

    # Stage the halo-extended, width-zero-padded input block. Only the two pad
    # columns are zeroed; the interior and halo rows are plain slice stores.
    # pw1/pw2 have no bias, so pointwise(0) == 0 and the zero pad commutes with
    # the fused pointwise conv (padding the input == padding its 1x1-conv result).
    xbuf_ref[:, :, 0:1] = jnp.zeros((cin, th + 2, 1), jnp.float32)
    xbuf_ref[:, :, w + 1:w + 2] = jnp.zeros((cin, th + 2, 1), jnp.float32)
    xbuf_ref[:, 0:1, 1:w + 1] = top_ref[0, 0]
    xbuf_ref[:, 1:th + 1, 1:w + 1] = x_ref[0]
    xbuf_ref[:, th + 1:th + 2, 1:w + 1] = bot_ref[0, 0]

    # TODO(synk): add an MXU + channel-tiled variant (and bf16 staging on
    # v6e/v7x) for wide layers (Cin, Cout >~ 64); this scalar-broadcast VPU path
    # targets the small channel counts BSConvS is instantiated with here.
    for co in range(cout):
        # Fused pointwise over channels: t[h, w] = sum_ci x[ci, h, w] * wf[co, ci].
        t = xbuf_ref[0] * wf_ref[co, 0]
        for ci in range(1, cin):
            t = t + xbuf_ref[ci] * wf_ref[co, ci]            # (TH+2, W+2) f32

        # Depthwise 3x3, stride 1, pad 1: 9 taps accumulated in registers.
        acc = t[0:th, 0:w] * dww_ref[co, 0]
        for k in range(1, 9):
            i, j = divmod(k, 3)
            acc = acc + t[i:i + th, j:j + w] * dww_ref[co, k]

        # Bias folded into the single store of this channel plane.
        o_ref[0, co] = (acc + b_ref[co]).astype(o_ref.dtype)


def _choose_row_tile(H, W, cin, cout, budget_bytes):
    """Largest row tile TH (a multiple of 8 dividing H, or H itself) whose
    per-block working set fits `budget_bytes` and keeps the per-channel
    intermediates out of vreg-spill territory."""
    cands = sorted({H, *(t for t in range(8, H, 8) if H % t == 0)}, reverse=True)

    def vmem_ok(th):
        streams = 4 * (cin + cout) * th * W * 2              # double-buffered in/out blocks
        scratch = 4 * cin * (th + 2) * (W + 2)               # staging scratch
        return streams + scratch <= budget_bytes

    def vreg_ok(th):
        return (th + 2) * (W + 2) <= 32 * 1024               # t + acc stay ~<= 48 vregs

    for pred in ((lambda t: vmem_ok(t) and vreg_ok(t)), vmem_ok):
        fits = [t for t in cands if pred(t)]
        if fits:
            return fits[0]
    # TODO(synk): masked short last block instead of the smallest divisor when
    # nothing fits the budget.
    return cands[-1]


def bsconvs_forward(x_nchw, w1, w2, dw_w, dw_b):
    """Fused BSConvS forward.

    x_nchw: (N, Cin, H, W) f32
    w1:     (Cin, mid)   pw1 1x1 weight (transposed)
    w2:     (mid, Cout)  pw2 1x1 weight (transposed)
    dw_w:   (3, 3, Cout) depthwise 3x3 weight
    dw_b:   (1, Cout)    depthwise bias
    returns (N, Cout, H, W) f32
    """
    N, Cin, H, W = x_nchw.shape
    Cout = w2.shape[1]

    # Generation-aware VMEM limit (64 MiB physical on v7x vs 128 MiB on v5e/v6e).
    try:
        vmem_cap = int(pltpu.get_tpu_info().vmem_capacity_bytes)
        vmem_limit = min(vmem_cap * 3 // 4, 96 * 1024 * 1024)
    except Exception:
        vmem_limit = 32 * 1024 * 1024

    TH = _choose_row_tile(H, W, Cin, Cout,
                          budget_bytes=max(vmem_limit // 6, 1 << 20))
    nb = H // TH

    x = x_nchw.astype(jnp.float32)

    # Per-block halo rows (row above / below each TH-row block, zeros at the
    # image border): only 2*nb rows per image of extra HBM traffic, and every x
    # block stays a plain non-overlapping BlockSpec window (no HBM gather, no
    # padded-input copy).
    zrow = jnp.zeros((N, Cin, 1, W), jnp.float32)
    if nb > 1:
        above = jnp.concatenate([zrow, x[:, :, TH - 1:H - 1:TH, :]], axis=2)
        below = jnp.concatenate([x[:, :, TH::TH, :], zrow], axis=2)
    else:
        above, below = zrow, zrow
    above = jnp.transpose(above, (0, 2, 1, 3))[:, :, :, None, :]  # (N, nb, Cin, 1, W)
    below = jnp.transpose(below, (0, 2, 1, 3))[:, :, :, None, :]

    # Fuse the two pointwise convs: y = x @ w1 @ w2  =>  wf[co, ci] = (w1 @ w2)[ci, co].
    wf = jnp.transpose(w1.astype(jnp.float32) @ w2.astype(jnp.float32))       # (Cout, Cin)
    dww = jnp.transpose(dw_w.astype(jnp.float32), (2, 0, 1)).reshape(Cout, 9)  # (Cout, 9)
    bias = dw_b.reshape(Cout).astype(jnp.float32)                              # (Cout,)

    flops = 2 * N * H * W * Cout * (Cin + 9)
    bytes_accessed = 4 * (N * Cin * H * W + 2 * N * nb * Cin * W
                          + N * Cout * H * W + Cout * (Cin + 10))

    out = pl.pallas_call(
        _bsconvs_kernel,
        out_shape=jax.ShapeDtypeStruct((N, Cout, H, W), jnp.float32),
        grid_spec=pltpu.PrefetchScalarGridSpec(
            num_scalar_prefetch=0,
            grid=(N, nb),
            in_specs=[
                pl.BlockSpec((1, Cin, TH, W), lambda n, r: (n, 0, r, 0)),
                pl.BlockSpec((1, 1, Cin, 1, W), lambda n, r: (n, r, 0, 0, 0)),
                pl.BlockSpec((1, 1, Cin, 1, W), lambda n, r: (n, r, 0, 0, 0)),
                pl.BlockSpec(memory_space=pltpu.MemorySpace.SMEM),  # wf (Cout, Cin)
                pl.BlockSpec(memory_space=pltpu.MemorySpace.SMEM),  # dww (Cout, 9)
                pl.BlockSpec(memory_space=pltpu.MemorySpace.SMEM),  # bias (Cout,)
            ],
            out_specs=pl.BlockSpec((1, Cout, TH, W), lambda n, r: (n, 0, r, 0)),
            scratch_shapes=[pltpu.VMEM((Cin, TH + 2, W + 2), jnp.float32)],
        ),
        compiler_params=pltpu.CompilerParams(
            dimension_semantics=("parallel", "parallel"),
            vmem_limit_bytes=vmem_limit,
        ),
        cost_estimate=pl.CostEstimate(
            flops=flops, transcendentals=0, bytes_accessed=bytes_accessed),
    )(x, above, below, wf, dww, bias)
    return out


def _reference(x_nchw, w1, w2, dw_w, dw_b):
    """Pure-JAX f32 reference using lax.conv (matches PyTorch module semantics)."""
    Cout = w2.shape[1]
    dn = ("NCHW", "OIHW", "NCHW")
    hp = lax.Precision.HIGHEST
    w1_oihw = jnp.transpose(w1)[:, :, None, None]                  # (mid, Cin, 1, 1)
    w2_oihw = jnp.transpose(w2)[:, :, None, None]                  # (Cout, mid, 1, 1)
    dw_oihw = jnp.transpose(dw_w, (2, 0, 1))[:, None, :, :]        # (Cout, 1, 3, 3)

    y = lax.conv_general_dilated(x_nchw, w1_oihw, (1, 1), "VALID",
                                 dimension_numbers=dn, precision=hp)
    y = lax.conv_general_dilated(y, w2_oihw, (1, 1), "VALID",
                                 dimension_numbers=dn, precision=hp)
    y = lax.conv_general_dilated(y, dw_oihw, (1, 1), ((1, 1), (1, 1)),
                                 dimension_numbers=dn,
                                 feature_group_count=Cout, precision=hp)
    return y + dw_b.reshape(1, Cout, 1, 1)


if __name__ == "__main__":
    # Module hyperparameters (mirrors BSConvS __init__ defaults).
    in_channels, out_channels = 4, 8
    p, min_mid_channels = 0.25, 4
    mid_channels = min(in_channels,
                       max(min_mid_channels, math.ceil(p * in_channels)))  # = 4

    N, H, W = 2, 16, 16
    key = jax.random.PRNGKey(0)
    kx, k1, k2, k3, k4 = jax.random.split(key, 5)

    x = jax.random.normal(kx, (N, in_channels, H, W), jnp.float32)

    # Parameter layouts mirror the PyTorch module:
    #   pw1.weight (mid, Cin, 1, 1)  -> stored here as (Cin, mid)
    #   pw2.weight (Cout, mid, 1, 1) -> stored here as (mid, Cout)
    #   dw.weight  (Cout, 1, 3, 3)   -> stored here as (3, 3, Cout)
    #   dw.bias    (Cout,)           -> stored here as (1, Cout)
    w1 = 0.1 * jax.random.normal(k1, (in_channels, mid_channels), jnp.float32)
    w2 = 0.1 * jax.random.normal(k2, (mid_channels, out_channels), jnp.float32)
    dw_w = 0.1 * jax.random.normal(k3, (3, 3, out_channels), jnp.float32)
    dw_b = 0.1 * jax.random.normal(k4, (1, out_channels), jnp.float32)

    fwd = jax.jit(bsconvs_forward)
    out = jax.block_until_ready(fwd(x, w1, w2, dw_w, dw_b))
    ref = jax.block_until_ready(_reference(x, w1, w2, dw_w, dw_b))

    assert out.shape == (N, out_channels, H, W)
    err = float(jnp.max(jnp.abs(out - ref)))
    # All arithmetic is f32; the only deviation from the reference is the
    # reassociation from fusing w1 @ w2 (observed ~1e-6).
    assert jnp.allclose(out, ref, atol=1e-3, rtol=1e-3), f"max abs err {err}"

    print("KERNEL_OK")
</pallas_src>

<mosaic_0001>
module attributes {stable_mosaic.version = 11 : i64} {
  func.func @_bsconvs_kernel(%arg0: i32, %arg1: i32, %arg2: memref<1x4x16x16xf32, #tpu.memory_space<vmem>>, %arg3: memref<1x1x4x1x16xf32, #tpu.memory_space<vmem>>, %arg4: memref<1x1x4x1x16xf32, #tpu.memory_space<vmem>>, %arg5: memref<8x4xf32, #tpu.memory_space<smem>>, %arg6: memref<8x9xf32, #tpu.memory_space<smem>>, %arg7: memref<8xf32, #tpu.memory_space<smem>>, %arg8: memref<1x8x16x16xf32, #tpu.memory_space<vmem>>, %arg9: memref<4x18x18xf32, #tpu.memory_space<vmem>>) attributes {dimension_semantics = [#tpu.dimension_semantics<parallel>, #tpu.dimension_semantics<parallel>], iteration_bounds = array<i64: 2, 1>, scalar_prefetch = 0 : i64, scratch_operands = 1 : i64, tpu.core_type = #tpu.core_type<tc>, window_params = [{transform_indices = @transform_0, window_bounds = array<i64: 1, 4, 16, 16>}, {transform_indices = @transform_1, window_bounds = array<i64: 1, 1, 4, 1, 16>}, {transform_indices = @transform_2, window_bounds = array<i64: 1, 1, 4, 1, 16>}, {transform_indices = @transform_3, window_bounds = array<i64: 8, 4>}, {transform_indices = @transform_4, window_bounds = array<i64: 8, 9>}, {transform_indices = @transform_5, window_bounds = array<i64: 8>}, {transform_indices = @transform_6, window_bounds = array<i64: 1, 8, 16, 16>}]} {
    %cst = arith.constant 0.000000e+00 : f32
    %0 = vector.broadcast %cst : f32 to vector<4x18x1xf32>
    %c0 = arith.constant 0 : index
    %c0_0 = arith.constant 0 : index
    %c0_1 = arith.constant 0 : index
    %1 = vector.load %arg9[%c0, %c0_0, %c0_1] : memref<4x18x18xf32, #tpu.memory_space<vmem>>, vector<4x18x1xf32>
    tpu.vector_store %arg9[%c0, %c0_0, %c0_1], %0 {strides = array<i32>} : memref<4x18x18xf32, #tpu.memory_space<vmem>>, vector<4x18x1xf32>,
    %cst_2 = arith.constant 0.000000e+00 : f32
    %2 = vector.broadcast %cst_2 : f32 to vector<4x18x1xf32>
    %c0_3 = arith.constant 0 : index
    %c0_4 = arith.constant 0 : index
    %c17 = arith.constant 17 : index
    %3 = vector.load %arg9[%c0_3, %c0_4, %c17] : memref<4x18x18xf32, #tpu.memory_space<vmem>>, vector<4x18x1xf32>
    tpu.vector_store %arg9[%c0_3, %c0_4, %c17], %2 {strides = array<i32>} : memref<4x18x18xf32, #tpu.memory_space<vmem>>, vector<4x18x1xf32>,
    %c0_5 = arith.constant 0 : index
    %c0_6 = arith.constant 0 : index
    %c0_7 = arith.constant 0 : index
    %c0_8 = arith.constant 0 : index
    %c0_9 = arith.constant 0 : index
    %4 = vector.load %arg3[%c0_5, %c0_6, %c0_7, %c0_8, %c0_9] : memref<1x1x4x1x16xf32, #tpu.memory_space<vmem>>, vector<1x1x4x1x16xf32>
    %5 = vector.shape_cast %4 : vector<1x1x4x1x16xf32> to vector<4x1x16xf32>
    %c0_10 = arith.constant 0 : index
    %c0_11 = arith.constant 0 : index
    %c1 = arith.constant 1 : index
    %6 = vector.load %arg9[%c0_10, %c0_11, %c1] : memref<4x18x18xf32, #tpu.memory_space<vmem>>, vector<4x1x16xf32>
    tpu.vector_store %arg9[%c0_10, %c0_11, %c1], %5 {strides = array<i32>} : memref<4x18x18xf32, #tpu.memory_space<vmem>>, vector<4x1x16xf32>,
    %c0_12 = arith.constant 0 : index
    %c0_13 = arith.constant 0 : index
    %c0_14 = arith.constant 0 : index
    %c0_15 = arith.constant 0 : index
    %7 = vector.load %arg2[%c0_12, %c0_13, %c0_14, %c0_15] : memref<1x4x16x16xf32, #tpu.memory_space<vmem>>, vector<1x4x16x16xf32>
    %8 = vector.shape_cast %7 : vector<1x4x16x16xf32> to vector<4x16x16xf32>
    %c0_16 = arith.constant 0 : index
    %c1_17 = arith.constant 1 : index
    %c1_18 = arith.constant 1 : index
    %9 = vector.load %arg9[%c0_16, %c1_17, %c1_18] : memref<4x18x18xf32, #tpu.memory_space<vmem>>, vector<4x16x16xf32>
    tpu.vector_store %arg9[%c0_16, %c1_17, %c1_18], %8 {strides = array<i32>} : memref<4x18x18xf32, #tpu.memory_space<vmem>>, vector<4x16x16xf32>,
    %c0_19 = arith.constant 0 : index
    %c0_20 = arith.constant 0 : index
    %c0_21 = arith.constant 0 : index
    %c0_22 = arith.constant 0 : index
    %c0_23 = arith.constant 0 : index
    %10 = vector.load %arg4[%c0_19, %c0_20, %c0_21, %c0_22, %c0_23] : memref<1x1x4x1x16xf32, #tpu.memory_space<vmem>>, vector<1x1x4x1x16xf32>
    %11 = vector.shape_cast %10 : vector<1x1x4x1x16xf32> to vector<4x1x16xf32>
    %c0_24 = arith.constant 0 : index
    %c17_25 = arith.constant 17 : index
    %c1_26 = arith.constant 1 : index
    %12 = vector.load %arg9[%c0_24, %c17_25, %c1_26] : memref<4x18x18xf32, #tpu.memory_space<vmem>>, vector<4x1x16xf32>
    tpu.vector_store %arg9[%c0_24, %c17_25, %c1_26], %11 {strides = array<i32>} : memref<4x18x18xf32, #tpu.memory_space<vmem>>, vector<4x1x16xf32>,
    %c0_27 = arith.constant 0 : index
    %c0_28 = arith.constant 0 : index
    %c0_29 = arith.constant 0 : index
    %13 = vector.load %arg9[%c0_27, %c0_28, %c0_29] : memref<4x18x18xf32, #tpu.memory_space<vmem>>, vector<1x18x18xf32>
    %14 = vector.shape_cast %13 : vector<1x18x18xf32> to vector<18x18xf32>
    %c0_30 = arith.constant 0 : index
    %c0_31 = arith.constant 0 : index
    %15 = memref.load %arg5[%c0_30, %c0_31] : memref<8x4xf32, #tpu.memory_space<smem>>
    %16 = vector.broadcast %15 : f32 to vector<18x18xf32>
    %17 = arith.mulf %14, %16 : vector<18x18xf32>
    %c1_32 = arith.constant 1 : index
    %c0_33 = arith.constant 0 : index
    %c0_34 = arith.constant 0 : index
    %18 = vector.load %arg9[%c1_32, %c0_33, %c0_34] : memref<4x18x18xf32, #tpu.memory_space<vmem>>, vector<1x18x18xf32>
    %19 = vector.shape_cast %18 : vector<1x18x18xf32> to vector<18x18xf32>
    %c0_35 = arith.constant 0 : index
    %c1_36 = arith.constant 1 : index
    %20 = memref.load %arg5[%c0_35, %c1_36] : memref<8x4xf32, #tpu.memory_space<smem>>
    %21 = vector.broadcast %20 : f32 to vector<18x18xf32>
    %22 = arith.mulf %19, %21 : vector<18x18xf32>
    %23 = arith.addf %17, %22 : vector<18x18xf32>
    %c2 = arith.constant 2 : index
    %c0_37 = arith.constant 0 : index
    %c0_38 = arith.constant 0 : index
    %24 = vector.load %arg9[%c2, %c0_37, %c0_38] : memref<4x18x18xf32, #tpu.memory_space<vmem>>, vector<1x18x18xf32>
    %25 = vector.shape_cast %24 : vector<1x18x18xf32> to vector<18x18xf32>
    %c0_39 = arith.constant 0 : index
    %c2_40 = arith.constant 2 : index
    %26 = memref.load %arg5[%c0_39, %c2_40] : memref<8x4xf32, #tpu.memory_space<smem>>
    %27 = vector.broadcast %26 : f32 to vector<18x18xf32>
    %28 = arith.mulf %25, %27 : vector<18x18xf32>
    %29 = arith.addf %23, %28 : vector<18x18xf32>
    %c3 = arith.constant 3 : index
    %c0_41 = arith.constant 0 : index
    %c0_42 = arith.constant 0 : index
    %30 = vector.load %arg9[%c3, %c0_41, %c0_42] : memref<4x18x18xf32, #tpu.memory_space<vmem>>, vector<1x18x18xf32>
    %31 = vector.shape_cast %30 : vector<1x18x18xf32> to vector<18x18xf32>
    %c0_43 = arith.constant 0 : index
    %c3_44 = arith.constant 3 : index
    %32 = memref.load %arg5[%c0_43, %c3_44] : memref<8x4xf32, #tpu.memory_space<smem>>
    %33 = vector.broadcast %32 : f32 to vector<18x18xf32>
    %34 = arith.mulf %31, %33 : vector<18x18xf32>
    %35 = arith.addf %29, %34 : vector<18x18xf32>
    %36 = vector.extract_strided_slice %35 {offsets = [0, 0], sizes = [16, 16], strides = [1, 1]} : vector<18x18xf32> to vector<16x16xf32>
    %c0_45 = arith.constant 0 : index
    %c0_46 = arith.constant 0 : index
    %37 = memref.load %arg6[%c0_45, %c0_46] : memref<8x9xf32, #tpu.memory_space<smem>>
    %38 = vector.broadcast %37 : f32 to vector<16x16xf32>
    %39 = arith.mulf %36, %38 : vector<16x16xf32>
    %40 = vector.extract_strided_slice %35 {offsets = [0, 1], sizes = [16, 16], strides = [1, 1]} : vector<18x18xf32> to vector<16x16xf32>
    %c0_47 = arith.constant 0 : index
    %c1_48 = arith.constant 1 : index
    %41 = memref.load %arg6[%c0_47, %c1_48] : memref<8x9xf32, #tpu.memory_space<smem>>
    %42 = vector.broadcast %41 : f32 to vector<16x16xf32>
    %43 = arith.mulf %40, %42 : vector<16x16xf32>
    %44 = arith.addf %39, %43 : vector<16x16xf32>
    %45 = vector.extract_strided_slice %35 {offsets = [0, 2], sizes = [16, 16], strides = [1, 1]} : vector<18x18xf32> to vector<16x16xf32>
    %c0_49 = arith.constant 0 : index
    %c2_50 = arith.constant 2 : index
    %46 = memref.load %arg6[%c0_49, %c2_50] : memref<8x9xf32, #tpu.memory_space<smem>>
    %47 = vector.broadcast %46 : f32 to vector<16x16xf32>
    %48 = arith.mulf %45, %47 : vector<16x16xf32>
    %49 = arith.addf %44, %48 : vector<16x16xf32>
    %50 = vector.extract_strided_slice %35 {offsets = [1, 0], sizes = [16, 16], strides = [1, 1]} : vector<18x18xf32> to vector<16x16xf32>
    %c0_51 = arith.constant 0 : index
    %c3_52 = arith.constant 3 : index
    %51 = memref.load %arg6[%c0_51, %c3_52] : memref<8x9xf32, #tpu.memory_space<smem>>
    %52 = vector.broadcast %51 : f32 to vector<16x16xf32>
    %53 = arith.mulf %50, %52 : vector<16x16xf32>
    %54 = arith.addf %49, %53 : vector<16x16xf32>
    %55 = vector.extract_strided_slice %35 {offsets = [1, 1], sizes = [16, 16], strides = [1, 1]} : vector<18x18xf32> to vector<16x16xf32>
    %c0_53 = arith.constant 0 : index
    %c4 = arith.constant 4 : index
    %56 = memref.load %arg6[%c0_53, %c4] : memref<8x9xf32, #tpu.memory_space<smem>>
    %57 = vector.broadcast %56 : f32 to vector<16x16xf32>
    %58 = arith.mulf %55, %57 : vector<16x16xf32>
    %59 = arith.addf %54, %58 : vector<16x16xf32>
    %60 = vector.extract_strided_slice %35 {offsets = [1, 2], sizes = [16, 16], strides = [1, 1]} : vector<18x18xf32> to vector<16x16xf32>
    %c0_54 = arith.constant 0 : index
    %c5 = arith.constant 5 : index
    %61 = memref.load %arg6[%c0_54, %c5] : memref<8x9xf32, #tpu.memory_space<smem>>
    %62 = vector.broadcast %61 : f32 to vector<16x16xf32>
    %63 = arith.mulf %60, %62 : vector<16x16xf32>
    %64 = arith.addf %59, %63 : vector<16x16xf32>
    %65 = vector.extract_strided_slice %35 {offsets = [2, 0], sizes = [16, 16], strides = [1, 1]} : vector<18x18xf32> to vector<16x16xf32>
    %c0_55 = arith.constant 0 : index
    %c6 = arith.constant 6 : index
    %66 = memref.load %arg6[%c0_55, %c6] : memref<8x9xf32, #tpu.memory_space<smem>>
    %67 = vector.broadcast %66 : f32 to vector<16x16xf32>
    %68 = arith.mulf %65, %67 : vector<16x16xf32>
    %69 = arith.addf %64, %68 : vector<16x16xf32>
    %70 = vector.extract_strided_slice %35 {offsets = [2, 1], sizes = [16, 16], strides = [1, 1]} : vector<18x18xf32> to vector<16x16xf32>
    %c0_56 = arith.constant 0 : index
    %c7 = arith.constant 7 : index
    %71 = memref.load %arg6[%c0_56, %c7] : memref<8x9xf32, #tpu.memory_space<smem>>
    %72 = vector.broadcast %71 : f32 to vector<16x16xf32>
    %73 = arith.mulf %70, %72 : vector<16x16xf32>
    %74 = arith.addf %69, %73 : vector<16x16xf32>
    %75 = vector.extract_strided_slice %35 {offsets = [2, 2], sizes = [16, 16], strides = [1, 1]} : vector<18x18xf32> to vector<16x16xf32>
    %c0_57 = arith.constant 0 : index
    %c8 = arith.constant 8 : index
    %76 = memref.load %arg6[%c0_57, %c8] : memref<8x9xf32, #tpu.memory_space<smem>>
    %77 = vector.broadcast %76 : f32 to vector<16x16xf32>
    %78 = arith.mulf %75, %77 : vector<16x16xf32>
    %79 = arith.addf %74, %78 : vector<16x16xf32>
    %c0_58 = arith.constant 0 : index
    %80 = memref.load %arg7[%c0_58] : memref<8xf32, #tpu.memory_space<smem>>
    %81 = vector.broadcast %80 : f32 to vector<16x16xf32>
    %82 = arith.addf %79, %81 : vector<16x16xf32>
    %c0_59 = arith.constant 0 : index
    %c0_60 = arith.constant 0 : index
    %c0_61 = arith.constant 0 : index
    %c0_62 = arith.constant 0 : index
    %83 = vector.load %arg8[%c0_59, %c0_60, %c0_61, %c0_62] : memref<1x8x16x16xf32, #tpu.memory_space<vmem>>, vector<1x1x16x16xf32>
    %84 = vector.shape_cast %83 : vector<1x1x16x16xf32> to vector<16x16xf32>
    %85 = vector.shape_cast %82 : vector<16x16xf32> to vector<1x1x16x16xf32>
    tpu.vector_store %arg8[%c0_59, %c0_60, %c0_61, %c0_62], %85 {strides = array<i32>} : memref<1x8x16x16xf32, #tpu.memory_space<vmem>>, vector<1x1x16x16xf32>,
    %c0_63 = arith.constant 0 : index
    %c0_64 = arith.constant 0 : index
    %c0_65 = arith.constant 0 : index
    %86 = vector.load %arg9[%c0_63, %c0_64, %c0_65] : memref<4x18x18xf32, #tpu.memory_space<vmem>>, vector<1x18x18xf32>
    %87 = vector.shape_cast %86 : vector<1x18x18xf32> to vector<18x18xf32>
    %c1_66 = arith.constant 1 : index
    %c0_67 = arith.constant 0 : index
    %88 = memref.load %arg5[%c1_66, %c0_67] : memref<8x4xf32, #tpu.memory_space<smem>>
    %89 = vector.broadcast %88 : f32 to vector<18x18xf32>
    %90 = arith.mulf %87, %89 : vector<18x18xf32>
    %c1_68 = arith.constant 1 : index
    %c0_69 = arith.constant 0 : index
    %c0_70 = arith.constant 0 : index
    %91 = vector.load %arg9[%c1_68, %c0_69, %c0_70] : memref<4x18x18xf32, #tpu.memory_space<vmem>>, vector<1x18x18xf32>
    %92 = vector.shape_cast %91 : vector<1x18x18xf32> to vector<18x18xf32>
    %c1_71 = arith.constant 1 : index
    %c1_72 = arith.constant 1 : index
    %93 = memref.load %arg5[%c1_71, %c1_72] : memref<8x4xf32, #tpu.memory_space<smem>>
    %94 = vector.broadcast %93 : f32 to vector<18x18xf32>
    %95 = arith.mulf %92, %94 : vector<18x18xf32>
    %96 = arith.addf %90, %95 : vector<18x18xf32>
    %c2_73 = arith.constant 2 : index
    %c0_74 = arith.constant 0 : index
    %c0_75 = arith.constant 0 : index
    %97 = vector.load %arg9[%c2_73, %c0_74, %c0_75] : memref<4x18x18xf32, #tpu.memory_space<vmem>>, vector<1x18x18xf32>
    %98 = vector.shape_cast %97 : vector<1x18x18xf32> to vector<18x18xf32>
    %c1_76 = arith.constant 1 : index
    %c2_77 = arith.constant 2 : index
    %99 = memref.load %arg5[%c1_76, %c2_77] : memref<8x4xf32, #tpu.memory_space<smem>>
    %100 = vector.broadcast %99 : f32 to vector<18x18xf32>
    %101 = arith.mulf %98, %100 : vector<18x18xf32>
    %102 = arith.addf %96, %101 : vector<18x18xf32>
    %c3_78 = arith.constant 3 : index
    %c0_79 = arith.constant 0 : index
    %c0_80 = arith.constant 0 : index
    %103 = vector.load %arg9[%c3_78, %c0_79, %c0_80] : memref<4x18x18xf32, #tpu.memory_space<vmem>>, vector<1x18x18xf32>
    %104 = vector.shape_cast %103 : vector<1x18x18xf32> to vector<18x18xf32>
    %c1_81 = arith.constant 1 : index
    %c3_82 = arith.constant 3 : index
    %105 = memref.load %arg5[%c1_81, %c3_82] : memref<8x4xf32, #tpu.memory_space<smem>>
    %106 = vector.broadcast %105 : f32 to vector<18x18xf32>
    %107 = arith.mulf %104, %106 : vector<18x18xf32>
    %108 = arith.addf %102, %107 : vector<18x18xf32>
    %109 = vector.extract_strided_slice %108 {offsets = [0, 0], sizes = [16, 16], strides = [1, 1]} : vector<18x18xf32> to vector<16x16xf32>
    %c1_83 = arith.constant 1 : index
    %c0_84 = arith.constant 0 : index
    %110 = memref.load %arg6[%c1_83, %c0_84] : memref<8x9xf32, #tpu.memory_space<smem>>
    %111 = vector.broadcast %110 : f32 to vector<16x16xf32>
    %112 = arith.mulf %109, %111 : vector<16x16xf32>
    %113 = vector.extract_strided_slice %108 {offsets = [0, 1], sizes = [16, 16], strides = [1, 1]} : vector<18x18xf32> to vector<16x16xf32>
    %c1_85 = arith.constant 1 : index
    %c1_86 = arith.constant 1 : index
    %114 = memref.load %arg6[%c1_85, %c1_86] : memref<8x9xf32, #tpu.memory_space<smem>>
    %115 = vector.broadcast %114 : f32 to vector<16x16xf32>
    %116 = arith.mulf %113, %115 : vector<16x16xf32>
    %117 = arith.addf %112, %116 : vector<16x16xf32>
    %118 = vector.extract_strided_slice %108 {offsets = [0, 2], sizes = [16, 16], strides = [1, 1]} : vector<18x18xf32> to vector<16x16xf32>
    %c1_87 = arith.constant 1 : index
    %c2_88 = arith.constant 2 : index
    %119 = memref.load %arg6[%c1_87, %c2_88] : memref<8x9xf32, #tpu.memory_space<smem>>
    %120 = vector.broadcast %119 : f32 to vector<16x16xf32>
    %121 = arith.mulf %118, %120 : vector<16x16xf32>
    %122 = arith.addf %117, %121 : vector<16x16xf32>
    %123 = vector.extract_strided_slice %108 {offsets = [1, 0], sizes = [16, 16], strides = [1, 1]} : vector<18x18xf32> to vector<16x16xf32>
    %c1_89 = arith.constant 1 : index
    %c3_90 = arith.constant 3 : index
    %124 = memref.load %arg6[%c1_89, %c3_90] : memref<8x9xf32, #tpu.memory_space<smem>>
    %125 = vector.broadcast %124 : f32 to vector<16x16xf32>
    %126 = arith.mulf %123, %125 : vector<16x16xf32>
    %127 = arith.addf %122, %126 : vector<16x16xf32>
    %128 = vector.extract_strided_slice %108 {offsets = [1, 1], sizes = [16, 16], strides = [1, 1]} : vector<18x18xf32> to vector<16x16xf32>
    %c1_91 = arith.constant 1 : index
    %c4_92 = arith.constant 4 : index
    %129 = memref.load %arg6[%c1_91, %c4_92] : memref<8x9xf32, #tpu.memory_space<smem>>
    %130 = vector.broadcast %129 : f32 to vector<16x16xf32>
    %131 = arith.mulf %128, %130 : vector<16x16xf32>
    %132 = arith.addf %127, %131 : vector<16x16xf32>
    %133 = vector.extract_strided_slice %108 {offsets = [1, 2], sizes = [16, 16], strides = [1, 1]} : vector<18x18xf32> to vector<16x16xf32>
    %c1_93 = arith.constant 1 : index
    %c5_94 = arith.constant 5 : index
    %134 = memref.load %arg6[%c1_93, %c5_94] : memref<8x9xf32, #tpu.memory_space<smem>>
    %135 = vector.broadcast %134 : f32 to vector<16x16xf32>
    %136 = arith.mulf %133, %135 : vector<16x16xf32>
    %137 = arith.addf %132, %136 : vector<16x16xf32>
    %138 = vector.extract_strided_slice %108 {offsets = [2, 0], sizes = [16, 16], strides = [1, 1]} : vector<18x18xf32> to vector<16x16xf32>
    %c1_95 = arith.constant 1 : index
    %c6_96 = arith.constant 6 : index
    %139 = memref.load %arg6[%c1_95, %c6_96] : memref<8x9xf32, #tpu.memory_space<smem>>
    %140 = vector.broadcast %139 : f32 to vector<16x16xf32>
    %141 = arith.mulf %138, %140 : vector<16x16xf32>
    %142 = arith.addf %137, %141 : vector<16x16xf32>
    %143 = vector.extract_strided_slice %108 {offsets = [2, 1], sizes = [16, 16], strides = [1, 1]} : vector<18x18xf32> to vector<16x16xf32>
    %c1_97 = arith.constant 1 : index
    %c7_98 = arith.constant 7 : index
    %144 = memref.load %arg6[%c1_97, %c7_98] : memref<8x9xf32, #tpu.memory_space<smem>>
    %145 = vector.broadcast %144 : f32 to vector<16x16xf32>
    %146 = arith.mulf %143, %145 : vector<16x16xf32>
    %147 = arith.addf %142, %146 : vector<16x16xf32>
    %148 = vector.extract_strided_slice %108 {offsets = [2, 2], sizes = [16, 16], strides = [1, 1]} : vector<18x18xf32> to vector<16x16xf32>
    %c1_99 = arith.constant 1 : index
    %c8_100 = arith.constant 8 : index
    %149 = memref.load %arg6[%c1_99, %c8_100] : memref<8x9xf32, #tpu.memory_space<smem>>
    %150 = vector.broadcast %149 : f32 to vector<16x16xf32>
    %151 = arith.mulf %148, %150 : vector<16x16xf32>
    %152 = arith.addf %147, %151 : vector<16x16xf32>
    %c1_101 = arith.constant 1 : index
    %153 = memref.load %arg7[%c1_101] : memref<8xf32, #tpu.memory_space<smem>>
    %154 = vector.broadcast %153 : f32 to vector<16x16xf32>
    %155 = arith.addf %152, %154 : vector<16x16xf32>
    %c0_102 = arith.constant 0 : index
    %c1_103 = arith.constant 1 : index
    %c0_104 = arith.constant 0 : index
    %c0_105 = arith.constant 0 : index
    %156 = vector.load %arg8[%c0_102, %c1_103, %c0_104, %c0_105] : memref<1x8x16x16xf32, #tpu.memory_space<vmem>>, vector<1x1x16x16xf32>
    %157 = vector.shape_cast %156 : vector<1x1x16x16xf32> to vector<16x16xf32>
    %158 = vector.shape_cast %155 : vector<16x16xf32> to vector<1x1x16x16xf32>
    tpu.vector_store %arg8[%c0_102, %c1_103, %c0_104, %c0_105], %158 {strides = array<i32>} : memref<1x8x16x16xf32, #tpu.memory_space<vmem>>, vector<1x1x16x16xf32>,
    %c0_106 = arith.constant 0 : index
    %c0_107 = arith.constant 0 : index
    %c0_108 = arith.constant 0 : index
    %159 = vector.load %arg9[%c0_106, %c0_107, %c0_108] : memref<4x18x18xf32, #tpu.memory_space<vmem>>, vector<1x18x18xf32>
    %160 = vector.shape_cast %159 : vector<1x18x18xf32> to vector<18x18xf32>
    %c2_109 = arith.constant 2 : index
    %c0_110 = arith.constant 0 : index
    %161 = memref.load %arg5[%c2_109, %c0_110] : memref<8x4xf32, #tpu.memory_space<smem>>
    %162 = vector.broadcast %161 : f32 to vector<18x18xf32>
    %163 = arith.mulf %160, %162 : vector<18x18xf32>
    %c1_111 = arith.constant 1 : index
    %c0_112 = arith.constant 0 : index
    %c0_113 = arith.constant 0 : index
    %164 = vector.load %arg9[%c1_111, %c0_112, %c0_113] : memref<4x18x18xf32, #tpu.memory_space<vmem>>, vector<1x18x18xf32>
    %165 = vector.shape_cast %164 : vector<1x18x18xf32> to vector<18x18xf32>
    %c2_114 = arith.constant 2 : index
    %c1_115 = arith.constant 1 : index
    %166 = memref.load %arg5[%c2_114, %c1_115] : memref<8x4xf32, #tpu.memory_space<smem>>
    %167 = vector.broadcast %166 : f32 to vector<18x18xf32>
    %168 = arith.mulf %165, %167 : vector<18x18xf32>
    %169 = arith.addf %163, %168 : vector<18x18xf32>
    %c2_116 = arith.constant 2 : index
    %c0_117 = arith.constant 0 : index
    %c0_118 = arith.constant 0 : index
    %170 = vector.load %arg9[%c2_116, %c0_117, %c0_118] : memref<4x18x18xf32, #tpu.memory_space<vmem>>, vector<1x18x18xf32>
    %171 = vector.shape_cast %170 : vector<1x18x18xf32> to vector<18x18xf32>
    %c2_119 = arith.constant 2 : index
    %c2_120 = arith.constant 2 : index
    %172 = memref.load %arg5[%c2_119, %c2_120] : memref<8x4xf32, #tpu.memory_space<smem>>
    %173 = vector.broadcast %172 : f32 to vector<18x18xf32>
    %174 = arith.mulf %171, %173 : vector<18x18xf32>
    %175 = arith.addf %169, %174 : vector<18x18xf32>
    %c3_121 = arith.constant 3 : index
    %c0_122 = arith.constant 0 : index
    %c0_123 = arith.constant 0 : index
    %176 = vector.load %arg9[%c3_121, %c0_122, %c0_123] : memref<4x18x18xf32, #tpu.memory_space<vmem>>, vector<1x18x18xf32>
    %177 = vector.shape_cast %176 : vector<1x18x18xf32> to vector<18x18xf32>
    %c2_124 = arith.constant 2 : index
    %c3_125 = arith.constant 3 : index
    %178 = memref.load %arg5[%c2_124, %c3_125] : memref<8x4xf32, #tpu.memory_space<smem>>
    %179 = vector.broadcast %178 : f32 to vector<18x18xf32>
    %180 = arith.mulf %177, %179 : vector<18x18xf32>
    %181 = arith.addf %175, %180 : vector<18x18xf32>
    %182 = vector.extract_strided_slice %181 {offsets = [0, 0], sizes = [16, 16], strides = [1, 1]} : vector<18x18xf32> to vector<16x16xf32>
    %c2_126 = arith.constant 2 : index
    %c0_127 = arith.constant 0 : index
    %183 = memref.load %arg6[%c2_126, %c0_127] : memref<8x9xf32, #tpu.memory_space<smem>>
    %184 = vector.broadcast %183 : f32 to vector<16x16xf32>
    %185 = arith.mulf %182, %184 : vector<16x16xf32>
    %186 = vector.extract_strided_slice %181 {offsets = [0, 1], sizes = [16, 16], strides = [1, 1]} : vector<18x18xf32> to vector<16x16xf32>
    %c2_128 = arith.constant 2 : index
    %c1_129 = arith.constant 1 : index
    %187 = memref.load %arg6[%c2_128, %c1_129] : memref<8x9xf32, #tpu.memory_space<smem>>
    %188 = vector.broadcast %187 : f32 to vector<16x16xf32>
    %189 = arith.mulf %186, %188 : vector<16x16xf32>
    %190 = arith.addf %185, %189 : vector<16x16xf32>
    %191 = vector.extract_strided_slice %181 {offsets = [0, 2], sizes = [16, 16], strides = [1, 1]} : vector<18x18xf32> to vector<16x16xf32>
    %c2_130 = arith.constant 2 : index
    %c2_131 = arith.constant 2 : index
    %192 = memref.load %arg6[%c2_130, %c2_131] : memref<8x9xf32, #tpu.memory_space<smem>>
    %193 = vector.broadcast %192 : f32 to vector<16x16xf32>
    %194 = arith.mulf %191, %193 : vector<16x16xf32>
    %195 = arith.addf %190, %194 : vector<16x16xf32>
    %196 = vector.extract_strided_slice %181 {offsets = [1, 0], sizes = [16, 16], strides = [1, 1]} : vector<18x18xf32> to vector<16x16xf32>
    %c2_132 = arith.constant 2 : index
    %c3_133 = arith.constant 3 : index
    %197 = memref.load %arg6[%c2_132, %c3_133] : memref<8x9xf32, #tpu.memory_space<smem>>
    %198 = vector.broadcast %197 : f32 to vector<16x16xf32>
    %199 = arith.mulf %196, %198 : vector<16x16xf32>
    %200 = arith.addf %195, %199 : vector<16x16xf32>
    %201 = vector.extract_strided_slice %181 {offsets = [1, 1], sizes = [16, 16], strides = [1, 1]} : vector<18x18xf32> to vector<16x16xf32>
    %c2_134 = arith.constant 2 : index
    %c4_135 = arith.constant 4 : index
    %202 = memref.load %arg6[%c2_134, %c4_135] : memref<8x9xf32, #tpu.memory_space<smem>>
    %203 = vector.broadcast %202 : f32 to vector<16x16xf32>
    %204 = arith.mulf %201, %203 : vector<16x16xf32>
    %205 = arith.addf %200, %204 : vector<16x16xf32>
    %206 = vector.extract_strided_slice %181 {offsets = [1, 2], sizes = [16, 16], strides = [1, 1]} : vector<18x18xf32> to vector<16x16xf32>
    %c2_136 = arith.constant 2 : index
    %c5_137 = arith.constant 5 : index
    %207 = memref.load %arg6[%c2_136, %c5_137] : memref<8x9xf32, #tpu.memory_space<smem>>
    %208 = vector.broadcast %207 : f32 to vector<16x16xf32>
    %209 = arith.mulf %206, %208 : vector<16x16xf32>
    %210 = arith.addf %205, %209 : vector<16x16xf32>
    %211 = vector.extract_strided_slice %181 {offsets = [2, 0], sizes = [16, 16], strides = [1, 1]} : vector<18x18xf32> to vector<16x16xf32>
    %c2_138 = arith.constant 2 : index
    %c6_139 = arith.constant 6 : index
    %212 = memref.load %arg6[%c2_138, %c6_139] : memref<8x9xf32, #tpu.memory_space<smem>>
    %213 = vector.broadcast %212 : f32 to vector<16x16xf32>
    %214 = arith.mulf %211, %213 : vector<16x16xf32>
    %215 = arith.addf %210, %214 : vector<16x16xf32>
    %216 = vector.extract_strided_slice %181 {offsets = [2, 1], sizes = [16, 16], strides = [1, 1]} : vector<18x18xf32> to vector<16x16xf32>
    %c2_140 = arith.constant 2 : index
    %c7_141 = arith.constant 7 : index
    %217 = memref.load %arg6[%c2_140, %c7_141] : memref<8x9xf32, #tpu.memory_space<smem>>
    %218 = vector.broadcast %217 : f32 to vector<16x16xf32>
    %219 = arith.mulf %216, %218 : vector<16x16xf32>
    %220 = arith.addf %215, %219 : vector<16x16xf32>
    %221 = vector.extract_strided_slice %181 {offsets = [2, 2], sizes = [16, 16], strides = [1, 1]} : vector<18x18xf32> to vector<16x16xf32>
    %c2_142 = arith.constant 2 : index
    %c8_143 = arith.constant 8 : index
    %222 = memref.load %arg6[%c2_142, %c8_143] : memref<8x9xf32, #tpu.memory_space<smem>>
    %223 = vector.broadcast %222 : f32 to vector<16x16xf32>
    %224 = arith.mulf %221, %223 : vector<16x16xf32>
    %225 = arith.addf %220, %224 : vector<16x16xf32>
    %c2_144 = arith.constant 2 : index
    %226 = memref.load %arg7[%c2_144] : memref<8xf32, #tpu.memory_space<smem>>
    %227 = vector.broadcast %226 : f32 to vector<16x16xf32>
    %228 = arith.addf %225, %227 : vector<16x16xf32>
    %c0_145 = arith.constant 0 : index
    %c2_146 = arith.constant 2 : index
    %c0_147 = arith.constant 0 : index
    %c0_148 = arith.constant 0 : index
    %229 = vector.load %arg8[%c0_145, %c2_146, %c0_147, %c0_148] : memref<1x8x16x16xf32, #tpu.memory_space<vmem>>, vector<1x1x16x16xf32>
    %230 = vector.shape_cast %229 : vector<1x1x16x16xf32> to vector<16x16xf32>
    %231 = vector.shape_cast %228 : vector<16x16xf32> to vector<1x1x16x16xf32>
    tpu.vector_store %arg8[%c0_145, %c2_146, %c0_147, %c0_148], %231 {strides = array<i32>} : memref<1x8x16x16xf32, #tpu.memory_space<vmem>>, vector<1x1x16x16xf32>,
    %c0_149 = arith.constant 0 : index
    %c0_150 = arith.constant 0 : index
    %c0_151 = arith.constant 0 : index
    %232 = vector.load %arg9[%c0_149, %c0_150, %c0_151] : memref<4x18x18xf32, #tpu.memory_space<vmem>>, vector<1x18x18xf32>
    %233 = vector.shape_cast %232 : vector<1x18x18xf32> to vector<18x18xf32>
    %c3_152 = arith.constant 3 : index
    %c0_153 = arith.constant 0 : index
    %234 = memref.load %arg5[%c3_152, %c0_153] : memref<8x4xf32, #tpu.memory_space<smem>>
    %235 = vector.broadcast %234 : f32 to vector<18x18xf32>
    %236 = arith.mulf %233, %235 : vector<18x18xf32>
    %c1_154 = arith.constant 1 : index
    %c0_155 = arith.constant 0 : index
    %c0_156 = arith.constant 0 : index
    %237 = vector.load %arg9[%c1_154, %c0_155, %c0_156] : memref<4x18x18xf32, #tpu.memory_space<vmem>>, vector<1x18x18xf32>
    %238 = vector.shape_cast %237 : vector<1x18x18xf32> to vector<18x18xf32>
    %c3_157 = arith.constant 3 : index
    %c1_158 = arith.constant 1 : index
    %239 = memref.load %arg5[%c3_157, %c1_158] : memref<8x4xf32, #tpu.memory_space<smem>>
    %240 = vector.broadcast %239 : f32 to vector<18x18xf32>
    %241 = arith.mulf %238, %240 : vector<18x18xf32>
    %242 = arith.addf %236, %241 : vector<18x18xf32>
    %c2_159 = arith.constant 2 : index
    %c0_160 = arith.constant 0 : index
    %c0_161 = arith.constant 0 : index
    %243 = vector.load %arg9[%c2_159, %c0_160, %c0_161] : memref<4x18x18xf32, #tpu.memory_space<vmem>>, vector<1x18x18xf32>
    %244 = vector.shape_cast %243 : vector<1x18x18xf32> to vector<18x18xf32>
    %c3_162 = arith.constant 3 : index
    %c2_163 = arith.constant 2 : index
    %245 = memref.load %arg5[%c3_162, %c2_163] : memref<8x4xf32, #tpu.memory_space<smem>>
    %246 = vector.broadcast %245 : f32 to vector<18x18xf32>
    %247 = arith.mulf %244, %246 : vector<18x18xf32>
    %248 = arith.addf %242, %247 : vector<18x18xf32>
    %c3_164 = arith.constant 3 : index
    %c0_165 = arith.constant 0 : index
    %c0_166 = arith.constant 0 : index
    %249 = vector.load %arg9[%c3_164, %c0_165, %c0_166] : memref<4x18x18xf32, #tpu.memory_space<vmem>>, vector<1x18x18xf32>
    %250 = vector.shape_cast %249 : vector<1x18x18xf32> to vector<18x18xf32>
    %c3_167 = arith.constant 3 : index
    %c3_168 = arith.constant 3 : index
    %251 = memref.load %arg5[%c3_167, %c3_168] : memref<8x4xf32, #tpu.memory_space<smem>>
    %252 = vector.broadcast %251 : f32 to vector<18x18xf32>
    %253 = arith.mulf %250, %252 : vector<18x18xf32>
    %254 = arith.addf %248, %253 : vector<18x18xf32>
    %255 = vector.extract_strided_slice %254 {offsets = [0, 0], sizes = [16, 16], strides = [1, 1]} : vector<18x18xf32> to vector<16x16xf32>
    %c3_169 = arith.constant 3 : index
    %c0_170 = arith.constant 0 : index
    %256 = memref.load %arg6[%c3_169, %c0_170] : memref<8x9xf32, #tpu.memory_space<smem>>
    %257 = vector.broadcast %256 : f32 to vector<16x16xf32>
    %258 = arith.mulf %255, %257 : vector<16x16xf32>
    %259 = vector.extract_strided_slice %254 {offsets = [0, 1], sizes = [16, 16], strides = [1, 1]} : vector<18x18xf32> to vector<16x16xf32>
    %c3_171 = arith.constant 3 : index
    %c1_172 = arith.constant 1 : index
    %260 = memref.load %arg6[%c3_171, %c1_172] : memref<8x9xf32, #tpu.memory_space<smem>>
    %261 = vector.broadcast %260 : f32 to vector<16x16xf32>
    %262 = arith.mulf %259, %261 : vector<16x16xf32>
    %263 = arith.addf %258, %262 : vector<16x16xf32>
    %264 = vector.extract_strided_slice %254 {offsets = [0, 2], sizes = [16, 16], strides = [1, 1]} : vector<18x18xf32> to vector<16x16xf32>
    %c3_173 = arith.constant 3 : index
    %c2_174 = arith.constant 2 : index
    %265 = memref.load %arg6[%c3_173, %c2_174] : memref<8x9xf32, #tpu.memory_space<smem>>
    %266 = vector.broadcast %265 : f32 to vector<16x16xf32>
    %267 = arith.mulf %264, %266 : vector<16x16xf32>
    %268 = arith.addf %263, %267 : vector<16x16xf32>
    %269 = vector.extract_strided_slice %254 {offsets = [1, 0], sizes = [16, 16], strides = [1, 1]} : vector<18x18xf32> to vector<16x16xf32>
    %c3_175 = arith.constant 3 : index
    %c3_176 = arith.constant 3 : index
    %270 = memref.load %arg6[%c3_175, %c3_176] : memref<8x9xf32, #tpu.memory_space<smem>>
    %271 = vector.broadcast %270 : f32 to vector<16x16xf32>
    %272 = arith.mulf %269, %271 : vector<16x16xf32>
    %273 = arith.addf %268, %272 : vector<16x16xf32>
    %274 = vector.extract_strided_slice %254 {offsets = [1, 1], sizes = [16, 16], strides = [1, 1]} : vector<18x18xf32> to vector<16x16xf32>
    %c3_177 = arith.constant 3 : index
    %c4_178 = arith.constant 4 : index
    %275 = memref.load %arg6[%c3_177, %c4_178] : memref<8x9xf32, #tpu.memory_space<smem>>
    %276 = vector.broadcast %275 : f32 to vector<16x16xf32>
    %277 = arith.mulf %274, %276 : vector<16x16xf32>
    %278 = arith.addf %273, %277 : vector<16x16xf32>
    %279 = vector.extract_strided_slice %254 {offsets = [1, 2], sizes = [16, 16], strides = [1, 1]} : vector<18x18xf32> to vector<16x16xf32>
    %c3_179 = arith.constant 3 : index
    %c5_180 = arith.constant 5 : index
    %280 = memref.load %arg6[%c3_179, %c5_180] : memref<8x9xf32, #tpu.memory_space<smem>>
    %281 = vector.broadcast %280 : f32 to vector<16x16xf32>
    %282 = arith.mulf %279, %281 : vector<16x16xf32>
    %283 = arith.addf %278, %282 : vector<16x16xf32>
    %284 = vector.extract_strided_slice %254 {offsets = [2, 0], sizes = [16, 16], strides = [1, 1]} : vector<18x18xf32> to vector<16x16xf32>
    %c3_181 = arith.constant 3 : index
    %c6_182 = arith.constant 6 : index
    %285 = memref.load %arg6[%c3_181, %c6_182] : memref<8x9xf32, #tpu.memory_space<smem>>
    %286 = vector.broadcast %285 : f32 to vector<16x16xf32>
    %287 = arith.mulf %284, %286 : vector<16x16xf32>
    %288 = arith.addf %283, %287 : vector<16x16xf32>
    %289 = vector.extract_strided_slice %254 {offsets = [2, 1], sizes = [16, 16], strides = [1, 1]} : vector<18x18xf32> to vector<16x16xf32>
    %c3_183 = arith.constant 3 : index
    %c7_184 = arith.constant 7 : index
    %290 = memref.load %arg6[%c3_183, %c7_184] : memref<8x9xf32, #tpu.memory_space<smem>>
    %291 = vector.broadcast %290 : f32 to vector<16x16xf32>
    %292 = arith.mulf %289, %291 : vector<16x16xf32>
    %293 = arith.addf %288, %292 : vector<16x16xf32>
    %294 = vector.extract_strided_slice %254 {offsets = [2, 2], sizes = [16, 16], strides = [1, 1]} : vector<18x18xf32> to vector<16x16xf32>
    %c3_185 = arith.constant 3 : index
    %c8_186 = arith.constant 8 : index
    %295 = memref.load %arg6[%c3_185, %c8_186] : memref<8x9xf32, #tpu.memory_space<smem>>
    %296 = vector.broadcast %295 : f32 to vector<16x16xf32>
    %297 = arith.mulf %294, %296 : vector<16x16xf32>
    %298 = arith.addf %293, %297 : vector<16x16xf32>
    %c3_187 = arith.constant 3 : index
    %299 = memref.load %arg7[%c3_187] : memref<8xf32, #tpu.memory_space<smem>>
    %300 = vector.broadcast %299 : f32 to vector<16x16xf32>
    %301 = arith.addf %298, %300 : vector<16x16xf32>
    %c0_188 = arith.constant 0 : index
    %c3_189 = arith.constant 3 : index
    %c0_190 = arith.constant 0 : index
    %c0_191 = arith.constant 0 : index
    %302 = vector.load %arg8[%c0_188, %c3_189, %c0_190, %c0_191] : memref<1x8x16x16xf32, #tpu.memory_space<vmem>>, vector<1x1x16x16xf32>
    %303 = vector.shape_cast %302 : vector<1x1x16x16xf32> to vector<16x16xf32>
    %304 = vector.shape_cast %301 : vector<16x16xf32> to vector<1x1x16x16xf32>
    tpu.vector_store %arg8[%c0_188, %c3_189, %c0_190, %c0_191], %304 {strides = array<i32>} : memref<1x8x16x16xf32, #tpu.memory_space<vmem>>, vector<1x1x16x16xf32>,
    %c0_192 = arith.constant 0 : index
    %c0_193 = arith.constant 0 : index
    %c0_194 = arith.constant 0 : index
    %305 = vector.load %arg9[%c0_192, %c0_193, %c0_194] : memref<4x18x18xf32, #tpu.memory_space<vmem>>, vector<1x18x18xf32>
    %306 = vector.shape_cast %305 : vector<1x18x18xf32> to vector<18x18xf32>
    %c4_195 = arith.constant 4 : index
    %c0_196 = arith.constant 0 : index
    %307 = memref.load %arg5[%c4_195, %c0_196] : memref<8x4xf32, #tpu.memory_space<smem>>
    %308 = vector.broadcast %307 : f32 to vector<18x18xf32>
    %309 = arith.mulf %306, %308 : vector<18x18xf32>
    %c1_197 = arith.constant 1 : index
    %c0_198 = arith.constant 0 : index
    %c0_199 = arith.constant 0 : index
    %310 = vector.load %arg9[%c1_197, %c0_198, %c0_199] : memref<4x18x18xf32, #tpu.memory_space<vmem>>, vector<1x18x18xf32>
    %311 = vector.shape_cast %310 : vector<1x18x18xf32> to vector<18x18xf32>
    %c4_200 = arith.constant 4 : index
    %c1_201 = arith.constant 1 : index
    %312 = memref.load %arg5[%c4_200, %c1_201] : memref<8x4xf32, #tpu.memory_space<smem>>
    %313 = vector.broadcast %312 : f32 to vector<18x18xf32>
    %314 = arith.mulf %311, %313 : vector<18x18xf32>
    %315 = arith.addf %309, %314 : vector<18x18xf32>
    %c2_202 = arith.constant 2 : index
    %c0_203 = arith.constant 0 : index
    %c0_204 = arith.constant 0 : index
    %316 = vector.load %arg9[%c2_202, %c0_203, %c0_204] : memref<4x18x18xf32, #tpu.memory_space<vmem>>, vector<1x18x18xf32>
    %317 = vector.shape_cast %316 : vector<1x18x18xf32> to vector<18x18xf32>
    %c4_205 = arith.constant 4 : index
    %c2_206 = arith.constant 2 : index
    %318 = memref.load %arg5[%c4_205, %c2_206] : memref<8x4xf32, #tpu.memory_space<smem>>
    %319 = vector.broadcast %318 : f32 to vector<18x18xf32>
    %320 = arith.mulf %317, %319 : vector<18x18xf32>
    %321 = arith.addf %315, %320 : vector<18x18xf32>
    %c3_207 = arith.constant 3 : index
    %c0_208 = arith.constant 0 : index
    %c0_209 = arith.constant 0 : index
    %322 = vector.load %arg9[%c3_207, %c0_208, %c0_209] : memref<4x18x18xf32, #tpu.memory_space<vmem>>, vector<1x18x18xf32>
    %323 = vector.shape_cast %322 : vector<1x18x18xf32> to vector<18x18xf32>
    %c4_210 = arith.constant 4 : index
    %c3_211 = arith.constant 3 : index
    %324 = memref.load %arg5[%c4_210, %c3_211] : memref<8x4xf32, #tpu.memory_space<smem>>
    %325 = vector.broadcast %324 : f32 to vector<18x18xf32>
    %326 = arith.mulf %323, %325 : vector<18x18xf32>
    %327 = arith.addf %321, %326 : vector<18x18xf32>
    %328 = vector.extract_strided_slice %327 {offsets = [0, 0], sizes = [16, 16], strides = [1, 1]} : vector<18x18xf32> to vector<16x16xf32>
    %c4_212 = arith.constant 4 : index
    %c0_213 = arith.constant 0 : index
    %329 = memref.load %arg6[%c4_212, %c0_213] : memref<8x9xf32, #tpu.memory_space<smem>>
    %330 = vector.broadcast %329 : f32 to vector<16x16xf32>
    %331 = arith.mulf %328, %330 : vector<16x16xf32>
    %332 = vector.extract_strided_slice %327 {offsets = [0, 1], sizes = [16, 16], strides = [1, 1]} : vector<18x18xf32> to vector<16x16xf32>
    %c4_214 = arith.constant 4 : index
    %c1_215 = arith.constant 1 : index
    %333 = memref.load %arg6[%c4_214, %c1_215] : memref<8x9xf32, #tpu.memory_space<smem>>
    %334 = vector.broadcast %333 : f32 to vector<16x16xf32>
    %335 = arith.mulf %332, %334 : vector<16x16xf32>
    %336 = arith.addf %331, %335 : vector<16x16xf32>
    %337 = vector.extract_strided_slice %327 {offsets = [0, 2], sizes = [16, 16], strides = [1, 1]} : vector<18x18xf32> to vector<16x16xf32>
    %c4_216 = arith.constant 4 : index
    %c2_217 = arith.constant 2 : index
    %338 = memref.load %arg6[%c4_216, %c2_217] : memref<8x9xf32, #tpu.memory_space<smem>>
    %339 = vector.broadcast %338 : f32 to vector<16x16xf32>
    %340 = arith.mulf %337, %339 : vector<16x16xf32>
    %341 = arith.addf %336, %340 : vector<16x16xf32>
    %342 = vector.extract_strided_slice %327 {offsets = [1, 0], sizes = [16, 16], strides = [1, 1]} : vector<18x18xf32> to vector<16x16xf32>
    %c4_218 = arith.constant 4 : index
    %c3_219 = arith.constant 3 : index
    %343 = memref.load %arg6[%c4_218, %c3_219] : memref<8x9xf32, #tpu.memory_space<smem>>
    %344 = vector.broadcast %343 : f32 to vector<16x16xf32>
    %345 = arith.mulf %342, %344 : vector<16x16xf32>
    %346 = arith.addf %341, %345 : vector<16x16xf32>
    %347 = vector.extract_strided_slice %327 {offsets = [1, 1], sizes = [16, 16], strides = [1, 1]} : vector<18x18xf32> to vector<16x16xf32>
    %c4_220 = arith.constant 4 : index
    %c4_221 = arith.constant 4 : index
    %348 = memref.load %arg6[%c4_220, %c4_221] : memref<8x9xf32, #tpu.memory_space<smem>>
    %349 = vector.broadcast %348 : f32 to vector<16x16xf32>
    %350 = arith.mulf %347, %349 : vector<16x16xf32>
    %351 = arith.addf %346, %350 : vector<16x16xf32>
    %352 = vector.extract_strided_slice %327 {offsets = [1, 2], sizes = [16, 16], strides = [1, 1]} : vector<18x18xf32> to vector<16x16xf32>
    %c4_222 = arith.constant 4 : index
    %c5_223 = arith.constant 5 : index
    %353 = memref.load %arg6[%c4_222, %c5_223] : memref<8x9xf32, #tpu.memory_space<smem>>
    %354 = vector.broadcast %353 : f32 to vector<16x16xf32>
    %355 = arith.mulf %352, %354 : vector<16x16xf32>
    %356 = arith.addf %351, %355 : vector<16x16xf32>
    %357 = vector.extract_strided_slice %327 {offsets = [2, 0], sizes = [16, 16], strides = [1, 1]} : vector<18x18xf32> to vector<16x16xf32>
    %c4_224 = arith.constant 4 : index
    %c6_225 = arith.constant 6 : index
    %358 = memref.load %arg6[%c4_224, %c6_225] : memref<8x9xf32, #tpu.memory_space<smem>>
    %359 = vector.broadcast %358 : f32 to vector<16x16xf32>
    %360 = arith.mulf %357, %359 : vector<16x16xf32>
    %361 = arith.addf %356, %360 : vector<16x16xf32>
    %362 = vector.extract_strided_slice %327 {offsets = [2, 1], sizes = [16, 16], strides = [1, 1]} : vector<18x18xf32> to vector<16x16xf32>
    %c4_226 = arith.constant 4 : index
    %c7_227 = arith.constant 7 : index
    %363 = memref.load %arg6[%c4_226, %c7_227] : memref<8x9xf32, #tpu.memory_space<smem>>
    %364 = vector.broadcast %363 : f32 to vector<16x16xf32>
    %365 = arith.mulf %362, %364 : vector<16x16xf32>
    %366 = arith.addf %361, %365 : vector<16x16xf32>
    %367 = vector.extract_strided_slice %327 {offsets = [2, 2], sizes = [16, 16], strides = [1, 1]} : vector<18x18xf32> to vector<16x16xf32>
    %c4_228 = arith.constant 4 : index
    %c8_229 = arith.constant 8 : index
    %368 = memref.load %arg6[%c4_228, %c8_229] : memref<8x9xf32, #tpu.memory_space<smem>>
    %369 = vector.broadcast %368 : f32 to vector<16x16xf32>
    %370 = arith.mulf %367, %369 : vector<16x16xf32>
    %371 = arith.addf %366, %370 : vector<16x16xf32>
    %c4_230 = arith.constant 4 : index
    %372 = memref.load %arg7[%c4_230] : memref<8xf32, #tpu.memory_space<smem>>
    %373 = vector.broadcast %372 : f32 to vector<16x16xf32>
    %374 = arith.addf %371, %373 : vector<16x16xf32>
    %c0_231 = arith.constant 0 : index
    %c4_232 = arith.constant 4 : index
    %c0_233 = arith.constant 0 : index
    %c0_234 = arith.constant 0 : index
    %375 = vector.load %arg8[%c0_231, %c4_232, %c0_233, %c0_234] : memref<1x8x16x16xf32, #tpu.memory_space<vmem>>, vector<1x1x16x16xf32>
    %376 = vector.shape_cast %375 : vector<1x1x16x16xf32> to vector<16x16xf32>
    %377 = vector.shape_cast %374 : vector<16x16xf32> to vector<1x1x16x16xf32>
    tpu.vector_store %arg8[%c0_231, %c4_232, %c0_233, %c0_234], %377 {strides = array<i32>} : memref<1x8x16x16xf32, #tpu.memory_space<vmem>>, vector<1x1x16x16xf32>,
    %c0_235 = arith.constant 0 : index
    %c0_236 = arith.constant 0 : index
    %c0_237 = arith.constant 0 : index
    %378 = vector.load %arg9[%c0_235, %c0_236, %c0_237] : memref<4x18x18xf32, #tpu.memory_space<vmem>>, vector<1x18x18xf32>
    %379 = vector.shape_cast %378 : vector<1x18x18xf32> to vector<18x18xf32>
    %c5_238 = arith.constant 5 : index
    %c0_239 = arith.constant 0 : index
    %380 = memref.load %arg5[%c5_238, %c0_239] : memref<8x4xf32, #tpu.memory_space<smem>>
    %381 = vector.broadcast %380 : f32 to vector<18x18xf32>
    %382 = arith.mulf %379, %381 : vector<18x18xf32>
    %c1_240 = arith.constant 1 : index
    %c0_241 = arith.constant 0 : index
    %c0_242 = arith.constant 0 : index
    %383 = vector.load %arg9[%c1_240, %c0_241, %c0_242] : memref<4x18x18xf32, #tpu.memory_space<vmem>>, vector<1x18x18xf32>
    %384 = vector.shape_cast %383 : vector<1x18x18xf32> to vector<18x18xf32>
    %c5_243 = arith.constant 5 : index
    %c1_244 = arith.constant 1 : index
    %385 = memref.load %arg5[%c5_243, %c1_244] : memref<8x4xf32, #tpu.memory_space<smem>>
    %386 = vector.broadcast %385 : f32 to vector<18x18xf32>
    %387 = arith.mulf %384, %386 : vector<18x18xf32>
    %388 = arith.addf %382, %387 : vector<18x18xf32>
    %c2_245 = arith.constant 2 : index
    %c0_246 = arith.constant 0 : index
    %c0_247 = arith.constant 0 : index
    %389 = vector.load %arg9[%c2_245, %c0_246, %c0_247] : memref<4x18x18xf32, #tpu.memory_space<vmem>>, vector<1x18x18xf32>
    %390 = vector.shape_cast %389 : vector<1x18x18xf32> to vector<18x18xf32>
    %c5_248 = arith.constant 5 : index
    %c2_249 = arith.constant 2 : index
    %391 = memref.load %arg5[%c5_248, %c2_249] : memref<8x4xf32, #tpu.memory_space<smem>>
    %392 = vector.broadcast %391 : f32 to vector<18x18xf32>
    %393 = arith.mulf %390, %392 : vector<18x18xf32>
    %394 = arith.addf %388, %393 : vector<18x18xf32>
    %c3_250 = arith.constant 3 : index
    %c0_251 = arith.constant 0 : index
    %c0_252 = arith.constant 0 : index
    %395 = vector.load %arg9[%c3_250, %c0_251, %c0_252] : memref<4x18x18xf32, #tpu.memory_space<vmem>>, vector<1x18x18xf32>
    %396 = vector.shape_cast %395 : vector<1x18x18xf32> to vector<18x18xf32>
    %c5_253 = arith.constant 5 : index
    %c3_254 = arith.constant 3 : index
    %397 = memref.load %arg5[%c5_253, %c3_254] : memref<8x4xf32, #tpu.memory_space<smem>>
    %398 = vector.broadcast %397 : f32 to vector<18x18xf32>
    %399 = arith.mulf %396, %398 : vector<18x18xf32>
    %400 = arith.addf %394, %399 : vector<18x18xf32>
    %401 = vector.extract_strided_slice %400 {offsets = [0, 0], sizes = [16, 16], strides = [1, 1]} : vector<18x18xf32> to vector<16x16xf32>
    %c5_255 = arith.constant 5 : index
    %c0_256 = arith.constant 0 : index
    %402 = memref.load %arg6[%c5_255, %c0_256] : memref<8x9xf32, #tpu.memory_space<smem>>
    %403 = vector.broadcast %402 : f32 to vector<16x16xf32>
    %404 = arith.mulf %401, %403 : vector<16x16xf32>
    %405 = vector.extract_strided_slice %400 {offsets = [0, 1], sizes = [16, 16], strides = [1, 1]} : vector<18x18xf32> to vector<16x16xf32>
    %c5_257 = arith.constant 5 : index
    %c1_258 = arith.constant 1 : index
    %406 = memref.load %arg6[%c5_257, %c1_258] : memref<8x9xf32, #tpu.memory_space<smem>>
    %407 = vector.broadcast %406 : f32 to vector<16x16xf32>
    %408 = arith.mulf %405, %407 : vector<16x16xf32>
    %409 = arith.addf %404, %408 : vector<16x16xf32>
    %410 = vector.extract_strided_slice %400 {offsets = [0, 2], sizes = [16, 16], strides = [1, 1]} : vector<18x18xf32> to vector<16x16xf32>
    %c5_259 = arith.constant 5 : index
    %c2_260 = arith.constant 2 : index
    %411 = memref.load %arg6[%c5_259, %c2_260] : memref<8x9xf32, #tpu.memory_space<smem>>
    %412 = vector.broadcast %411 : f32 to vector<16x16xf32>
    %413 = arith.mulf %410, %412 : vector<16x16xf32>
    %414 = arith.addf %409, %413 : vector<16x16xf32>
    %415 = vector.extract_strided_slice %400 {offsets = [1, 0], sizes = [16, 16], strides = [1, 1]} : vector<18x18xf32> to vector<16x16xf32>
    %c5_261 = arith.constant 5 : index
    %c3_262 = arith.constant 3 : index
    %416 = memref.load %arg6[%c5_261, %c3_262] : memref<8x9xf32, #tpu.memory_space<smem>>
    %417 = vector.broadcast %416 : f32 to vector<16x16xf32>
    %418 = arith.mulf %415, %417 : vector<16x16xf32>
    %419 = arith.addf %414, %418 : vector<16x16xf32>
    %420 = vector.extract_strided_slice %400 {offsets = [1, 1], sizes = [16, 16], strides = [1, 1]} : vector<18x18xf32> to vector<16x16xf32>
    %c5_263 = arith.constant 5 : index
    %c4_264 = arith.constant 4 : index
    %421 = memref.load %arg6[%c5_263, %c4_264] : memref<8x9xf32, #tpu.memory_space<smem>>
    %422 = vector.broadcast %421 : f32 to vector<16x16xf32>
    %423 = arith.mulf %420, %422 : vector<16x16xf32>
    %424 = arith.addf %419, %423 : vector<16x16xf32>
    %425 = vector.extract_strided_slice %400 {offsets = [1, 2], sizes = [16, 16], strides = [1, 1]} : vector<18x18xf32> to vector<16x16xf32>
    %c5_265 = arith.constant 5 : index
    %c5_266 = arith.constant 5 : index
    %426 = memref.load %arg6[%c5_265, %c5_266] : memref<8x9xf32, #tpu.memory_space<smem>>
    %427 = vector.broadcast %426 : f32 to vector<16x16xf32>
    %428 = arith.mulf %425, %427 : vector<16x16xf32>
    %429 = arith.addf %424, %428 : vector<16x16xf32>
    %430 = vector.extract_strided_slice %400 {offsets = [2, 0], sizes = [16, 16], strides = [1, 1]} : vector<18x18xf32> to vector<16x16xf32>
    %c5_267 = arith.constant 5 : index
    %c6_268 = arith.constant 6 : index
    %431 = memref.load %arg6[%c5_267, %c6_268] : memref<8x9xf32, #tpu.memory_space<smem>>
    %432 = vector.broadcast %431 : f32 to vector<16x16xf32>
    %433 = arith.mulf %430, %432 : vector<16x16xf32>
    %434 = arith.addf %429, %433 : vector<16x16xf32>
    %435 = vector.extract_strided_slice %400 {offsets = [2, 1], sizes = [16, 16], strides = [1, 1]} : vector<18x18xf32> to vector<16x16xf32>
    %c5_269 = arith.constant 5 : index
    %c7_270 = arith.constant 7 : index
    %436 = memref.load %arg6[%c5_269, %c7_270] : memref<8x9xf32, #tpu.memory_space<smem>>
    %437 = vector.broadcast %436 : f32 to vector<16x16xf32>
    %438 = arith.mulf %435, %437 : vector<16x16xf32>
    %439 = arith.addf %434, %438 : vector<16x16xf32>
    %440 = vector.extract_strided_slice %400 {offsets = [2, 2], sizes = [16, 16], strides = [1, 1]} : vector<18x18xf32> to vector<16x16xf32>
    %c5_271 = arith.constant 5 : index
    %c8_272 = arith.constant 8 : index
    %441 = memref.load %arg6[%c5_271, %c8_272] : memref<8x9xf32, #tpu.memory_space<smem>>
    %442 = vector.broadcast %441 : f32 to vector<16x16xf32>
    %443 = arith.mulf %440, %442 : vector<16x16xf32>
    %444 = arith.addf %439, %443 : vector<16x16xf32>
    %c5_273 = arith.constant 5 : index
    %445 = memref.load %arg7[%c5_273] : memref<8xf32, #tpu.memory_space<smem>>
    %446 = vector.broadcast %445 : f32 to vector<16x16xf32>
    %447 = arith.addf %444, %446 : vector<16x16xf32>
    %c0_274 = arith.constant 0 : index
    %c5_275 = arith.constant 5 : index
    %c0_276 = arith.constant 0 : index
    %c0_277 = arith.constant 0 : index
    %448 = vector.load %arg8[%c0_274, %c5_275, %c0_276, %c0_277] : memref<1x8x16x16xf32, #tpu.memory_space<vmem>>, vector<1x1x16x16xf32>
    %449 = vector.shape_cast %448 : vector<1x1x16x16xf32> to vector<16x16xf32>
    %450 = vector.shape_cast %447 : vector<16x16xf32> to vector<1x1x16x16xf32>
    tpu.vector_store %arg8[%c0_274, %c5_275, %c0_276, %c0_277], %450 {strides = array<i32>} : memref<1x8x16x16xf32, #tpu.memory_space<vmem>>, vector<1x1x16x16xf32>,
    %c0_278 = arith.constant 0 : index
    %c0_279 = arith.constant 0 : index
    %c0_280 = arith.constant 0 : index
    %451 = vector.load %arg9[%c0_278, %c0_279, %c0_280] : memref<4x18x18xf32, #tpu.memory_space<vmem>>, vector<1x18x18xf32>
    %452 = vector.shape_cast %451 : vector<1x18x18xf32> to vector<18x18xf32>
    %c6_281 = arith.constant 6 : index
    %c0_282 = arith.constant 0 : index
    %453 = memref.load %arg5[%c6_281, %c0_282] : memref<8x4xf32, #tpu.memory_space<smem>>
    %454 = vector.broadcast %453 : f32 to vector<18x18xf32>
    %455 = arith.mulf %452, %454 : vector<18x18xf32>
    %c1_283 = arith.constant 1 : index
    %c0_284 = arith.constant 0 : index
    %c0_285 = arith.constant 0 : index
    %456 = vector.load %arg9[%c1_283, %c0_284, %c0_285] : memref<4x18x18xf32, #tpu.memory_space<vmem>>, vector<1x18x18xf32>
    %457 = vector.shape_cast %456 : vector<1x18x18xf32> to vector<18x18xf32>
    %c6_286 = arith.constant 6 : index
    %c1_287 = arith.constant 1 : index
    %458 = memref.load %arg5[%c6_286, %c1_287] : memref<8x4xf32, #tpu.memory_space<smem>>
    %459 = vector.broadcast %458 : f32 to vector<18x18xf32>
    %460 = arith.mulf %457, %459 : vector<18x18xf32>
    %461 = arith.addf %455, %460 : vector<18x18xf32>
    %c2_288 = arith.constant 2 : index
    %c0_289 = arith.constant 0 : index
    %c0_290 = arith.constant 0 : index
    %462 = vector.load %arg9[%c2_288, %c0_289, %c0_290] : memref<4x18x18xf32, #tpu.memory_space<vmem>>, vector<1x18x18xf32>
    %463 = vector.shape_cast %462 : vector<1x18x18xf32> to vector<18x18xf32>
    %c6_291 = arith.constant 6 : index
    %c2_292 = arith.constant 2 : index
    %464 = memref.load %arg5[%c6_291, %c2_292] : memref<8x4xf32, #tpu.memory_space<smem>>
    %465 = vector.broadcast %464 : f32 to vector<18x18xf32>
    %466 = arith.mulf %463, %465 : vector<18x18xf32>
    %467 = arith.addf %461, %466 : vector<18x18xf32>
    %c3_293 = arith.constant 3 : index
    %c0_294 = arith.constant 0 : index
    %c0_295 = arith.constant 0 : index
    %468 = vector.load %arg9[%c3_293, %c0_294, %c0_295] : memref<4x18x18xf32, #tpu.memory_space<vmem>>, vector<1x18x18xf32>
    %469 = vector.shape_cast %468 : vector<1x18x18xf32> to vector<18x18xf32>
    %c6_296 = arith.constant 6 : index
    %c3_297 = arith.constant 3 : index
    %470 = memref.load %arg5[%c6_296, %c3_297] : memref<8x4xf32, #tpu.memory_space<smem>>
    %471 = vector.broadcast %470 : f32 to vector<18x18xf32>
    %472 = arith.mulf %469, %471 : vector<18x18xf32>
    %473 = arith.addf %467, %472 : vector<18x18xf32>
    %474 = vector.extract_strided_slice %473 {offsets = [0, 0], sizes = [16, 16], strides = [1, 1]} : vector<18x18xf32> to vector<16x16xf32>
    %c6_298 = arith.constant 6 : index
    %c0_299 = arith.constant 0 : index
    %475 = memref.load %arg6[%c6_298, %c0_299] : memref<8x9xf32, #tpu.memory_space<smem>>
    %476 = vector.broadcast %475 : f32 to vector<16x16xf32>
    %477 = arith.mulf %474, %476 : vector<16x16xf32>
    %478 = vector.extract_strided_slice %473 {offsets = [0, 1], sizes = [16, 16], strides = [1, 1]} : vector<18x18xf32> to vector<16x16xf32>
    %c6_300 = arith.constant 6 : index
    %c1_301 = arith.constant 1 : index
    %479 = memref.load %arg6[%c6_300, %c1_301] : memref<8x9xf32, #tpu.memory_space<smem>>
    %480 = vector.broadcast %479 : f32 to vector<16x16xf32>
    %481 = arith.mulf %478, %480 : vector<16x16xf32>
    %482 = arith.addf %477, %481 : vector<16x16xf32>
    %483 = vector.extract_strided_slice %473 {offsets = [0, 2], sizes = [16, 16], strides = [1, 1]} : vector<18x18xf32> to vector<16x16xf32>
    %c6_302 = arith.constant 6 : index
    %c2_303 = arith.constant 2 : index
    %484 = memref.load %arg6[%c6_302, %c2_303] : memref<8x9xf32, #tpu.memory_space<smem>>
    %485 = vector.broadcast %484 : f32 to vector<16x16xf32>
    %486 = arith.mulf %483, %485 : vector<16x16xf32>
    %487 = arith.addf %482, %486 : vector<16x16xf32>
    %488 = vector.extract_strided_slice %473 {offsets = [1, 0], sizes = [16, 16], strides = [1, 1]} : vector<18x18xf32> to vector<16x16xf32>
    %c6_304 = arith.constant 6 : index
    %c3_305 = arith.constant 3 : index
    %489 = memref.load %arg6[%c6_304, %c3_305] : memref<8x9xf32, #tpu.memory_space<smem>>
    %490 = vector.broadcast %489 : f32 to vector<16x16xf32>
    %491 = arith.mulf %488, %490 : vector<16x16xf32>
    %492 = arith.addf %487, %491 : vector<16x16xf32>
    %493 = vector.extract_strided_slice %473 {offsets = [1, 1], sizes = [16, 16], strides = [1, 1]} : vector<18x18xf32> to vector<16x16xf32>
    %c6_306 = arith.constant 6 : index
    %c4_307 = arith.constant 4 : index
    %494 = memref.load %arg6[%c6_306, %c4_307] : memref<8x9xf32, #tpu.memory_space<smem>>
    %495 = vector.broadcast %494 : f32 to vector<16x16xf32>
    %496 = arith.mulf %493, %495 : vector<16x16xf32>
    %497 = arith.addf %492, %496 : vector<16x16xf32>
    %498 = vector.extract_strided_slice %473 {offsets = [1, 2], sizes = [16, 16], strides = [1, 1]} : vector<18x18xf32> to vector<16x16xf32>
    %c6_308 = arith.constant 6 : index
    %c5_309 = arith.constant 5 : index
    %499 = memref.load %arg6[%c6_308, %c5_309] : memref<8x9xf32, #tpu.memory_space<smem>>
    %500 = vector.broadcast %499 : f32 to vector<16x16xf32>
    %501 = arith.mulf %498, %500 : vector<16x16xf32>
    %502 = arith.addf %497, %501 : vector<16x16xf32>
    %503 = vector.extract_strided_slice %473 {offsets = [2, 0], sizes = [16, 16], strides = [1, 1]} : vector<18x18xf32> to vector<16x16xf32>
    %c6_310 = arith.constant 6 : index
    %c6_311 = arith.constant 6 : index
    %504 = memref.load %arg6[%c6_310, %c6_311] : memref<8x9xf32, #tpu.memory_space<smem>>
    %505 = vector.broadcast %504 : f32 to vector<16x16xf32>
    %506 = arith.mulf %503, %505 : vector<16x16xf32>
    %507 = arith.addf %502, %506 : vector<16x16xf32>
    %508 = vector.extract_strided_slice %473 {offsets = [2, 1], sizes = [16, 16], strides = [1, 1]} : vector<18x18xf32> to vector<16x16xf32>
    %c6_312 = arith.constant 6 : index
    %c7_313 = arith.constant 7 : index
    %509 = memref.load %arg6[%c6_312, %c7_313] : memref<8x9xf32, #tpu.memory_space<smem>>
    %510 = vector.broadcast %509 : f32 to vector<16x16xf32>
    %511 = arith.mulf %508, %510 : vector<16x16xf32>
    %512 = arith.addf %507, %511 : vector<16x16xf32>
    %513 = vector.extract_strided_slice %473 {offsets = [2, 2], sizes = [16, 16], strides = [1, 1]} : vector<18x18xf32> to vector<16x16xf32>
    %c6_314 = arith.constant 6 : index
    %c8_315 = arith.constant 8 : index
    %514 = memref.load %arg6[%c6_314, %c8_315] : memref<8x9xf32, #tpu.memory_space<smem>>
    %515 = vector.broadcast %514 : f32 to vector<16x16xf32>
    %516 = arith.mulf %513, %515 : vector<16x16xf32>
    %517 = arith.addf %512, %516 : vector<16x16xf32>
    %c6_316 = arith.constant 6 : index
    %518 = memref.load %arg7[%c6_316] : memref<8xf32, #tpu.memory_space<smem>>
    %519 = vector.broadcast %518 : f32 to vector<16x16xf32>
    %520 = arith.addf %517, %519 : vector<16x16xf32>
    %c0_317 = arith.constant 0 : index
    %c6_318 = arith.constant 6 : index
    %c0_319 = arith.constant 0 : index
    %c0_320 = arith.constant 0 : index
    %521 = vector.load %arg8[%c0_317, %c6_318, %c0_319, %c0_320] : memref<1x8x16x16xf32, #tpu.memory_space<vmem>>, vector<1x1x16x16xf32>
    %522 = vector.shape_cast %521 : vector<1x1x16x16xf32> to vector<16x16xf32>
    %523 = vector.shape_cast %520 : vector<16x16xf32> to vector<1x1x16x16xf32>
    tpu.vector_store %arg8[%c0_317, %c6_318, %c0_319, %c0_320], %523 {strides = array<i32>} : memref<1x8x16x16xf32, #tpu.memory_space<vmem>>, vector<1x1x16x16xf32>,
    %c0_321 = arith.constant 0 : index
    %c0_322 = arith.constant 0 : index
    %c0_323 = arith.constant 0 : index
    %524 = vector.load %arg9[%c0_321, %c0_322, %c0_323] : memref<4x18x18xf32, #tpu.memory_space<vmem>>, vector<1x18x18xf32>
    %525 = vector.shape_cast %524 : vector<1x18x18xf32> to vector<18x18xf32>
    %c7_324 = arith.constant 7 : index
    %c0_325 = arith.constant 0 : index
    %526 = memref.load %arg5[%c7_324, %c0_325] : memref<8x4xf32, #tpu.memory_space<smem>>
    %527 = vector.broadcast %526 : f32 to vector<18x18xf32>
    %528 = arith.mulf %525, %527 : vector<18x18xf32>
    %c1_326 = arith.constant 1 : index
    %c0_327 = arith.constant 0 : index
    %c0_328 = arith.constant 0 : index
    %529 = vector.load %arg9[%c1_326, %c0_327, %c0_328] : memref<4x18x18xf32, #tpu.memory_space<vmem>>, vector<1x18x18xf32>
    %530 = vector.shape_cast %529 : vector<1x18x18xf32> to vector<18x18xf32>
    %c7_329 = arith.constant 7 : index
    %c1_330 = arith.constant 1 : index
    %531 = memref.load %arg5[%c7_329, %c1_330] : memref<8x4xf32, #tpu.memory_space<smem>>
    %532 = vector.broadcast %531 : f32 to vector<18x18xf32>
    %533 = arith.mulf %530, %532 : vector<18x18xf32>
    %534 = arith.addf %528, %533 : vector<18x18xf32>
    %c2_331 = arith.constant 2 : index
    %c0_332 = arith.constant 0 : index
    %c0_333 = arith.constant 0 : index
    %535 = vector.load %arg9[%c2_331, %c0_332, %c0_333] : memref<4x18x18xf32, #tpu.memory_space<vmem>>, vector<1x18x18xf32>
    %536 = vector.shape_cast %535 : vector<1x18x18xf32> to vector<18x18xf32>
    %c7_334 = arith.constant 7 : index
    %c2_335 = arith.constant 2 : index
    %537 = memref.load %arg5[%c7_334, %c2_335] : memref<8x4xf32, #tpu.memory_space<smem>>
    %538 = vector.broadcast %537 : f32 to vector<18x18xf32>
    %539 = arith.mulf %536, %538 : vector<18x18xf32>
    %540 = arith.addf %534, %539 : vector<18x18xf32>
    %c3_336 = arith.constant 3 : index
    %c0_337 = arith.constant 0 : index
    %c0_338 = arith.constant 0 : index
    %541 = vector.load %arg9[%c3_336, %c0_337, %c0_338] : memref<4x18x18xf32, #tpu.memory_space<vmem>>, vector<1x18x18xf32>
    %542 = vector.shape_cast %541 : vector<1x18x18xf32> to vector<18x18xf32>
    %c7_339 = arith.constant 7 : index
    %c3_340 = arith.constant 3 : index
    %543 = memref.load %arg5[%c7_339, %c3_340] : memref<8x4xf32, #tpu.memory_space<smem>>
    %544 = vector.broadcast %543 : f32 to vector<18x18xf32>
    %545 = arith.mulf %542, %544 : vector<18x18xf32>
    %546 = arith.addf %540, %545 : vector<18x18xf32>
    %547 = vector.extract_strided_slice %546 {offsets = [0, 0], sizes = [16, 16], strides = [1, 1]} : vector<18x18xf32> to vector<16x16xf32>
    %c7_341 = arith.constant 7 : index
    %c0_342 = arith.constant 0 : index
    %548 = memref.load %arg6[%c7_341, %c0_342] : memref<8x9xf32, #tpu.memory_space<smem>>
    %549 = vector.broadcast %548 : f32 to vector<16x16xf32>
    %550 = arith.mulf %547, %549 : vector<16x16xf32>
    %551 = vector.extract_strided_slice %546 {offsets = [0, 1], sizes = [16, 16], strides = [1, 1]} : vector<18x18xf32> to vector<16x16xf32>
    %c7_343 = arith.constant 7 : index
    %c1_344 = arith.constant 1 : index
    %552 = memref.load %arg6[%c7_343, %c1_344] : memref<8x9xf32, #tpu.memory_space<smem>>
    %553 = vector.broadcast %552 : f32 to vector<16x16xf32>
    %554 = arith.mulf %551, %553 : vector<16x16xf32>
    %555 = arith.addf %550, %554 : vector<16x16xf32>
    %556 = vector.extract_strided_slice %546 {offsets = [0, 2], sizes = [16, 16], strides = [1, 1]} : vector<18x18xf32> to vector<16x16xf32>
    %c7_345 = arith.constant 7 : index
    %c2_346 = arith.constant 2 : index
    %557 = memref.load %arg6[%c7_345, %c2_346] : memref<8x9xf32, #tpu.memory_space<smem>>
    %558 = vector.broadcast %557 : f32 to vector<16x16xf32>
    %559 = arith.mulf %556, %558 : vector<16x16xf32>
    %560 = arith.addf %555, %559 : vector<16x16xf32>
    %561 = vector.extract_strided_slice %546 {offsets = [1, 0], sizes = [16, 16], strides = [1, 1]} : vector<18x18xf32> to vector<16x16xf32>
    %c7_347 = arith.constant 7 : index
    %c3_348 = arith.constant 3 : index
    %562 = memref.load %arg6[%c7_347, %c3_348] : memref<8x9xf32, #tpu.memory_space<smem>>
    %563 = vector.broadcast %562 : f32 to vector<16x16xf32>
    %564 = arith.mulf %561, %563 : vector<16x16xf32>
    %565 = arith.addf %560, %564 : vector<16x16xf32>
    %566 = vector.extract_strided_slice %546 {offsets = [1, 1], sizes = [16, 16], strides = [1, 1]} : vector<18x18xf32> to vector<16x16xf32>
    %c7_349 = arith.constant 7 : index
    %c4_350 = arith.constant 4 : index
    %567 = memref.load %arg6[%c7_349, %c4_350] : memref<8x9xf32, #tpu.memory_space<smem>>
    %568 = vector.broadcast %567 : f32 to vector<16x16xf32>
    %569 = arith.mulf %566, %568 : vector<16x16xf32>
    %570 = arith.addf %565, %569 : vector<16x16xf32>
    %571 = vector.extract_strided_slice %546 {offsets = [1, 2], sizes = [16, 16], strides = [1, 1]} : vector<18x18xf32> to vector<16x16xf32>
    %c7_351 = arith.constant 7 : index
    %c5_352 = arith.constant 5 : index
    %572 = memref.load %arg6[%c7_351, %c5_352] : memref<8x9xf32, #tpu.memory_space<smem>>
    %573 = vector.broadcast %572 : f32 to vector<16x16xf32>
    %574 = arith.mulf %571, %573 : vector<16x16xf32>
    %575 = arith.addf %570, %574 : vector<16x16xf32>
    %576 = vector.extract_strided_slice %546 {offsets = [2, 0], sizes = [16, 16], strides = [1, 1]} : vector<18x18xf32> to vector<16x16xf32>
    %c7_353 = arith.constant 7 : index
    %c6_354 = arith.constant 6 : index
    %577 = memref.load %arg6[%c7_353, %c6_354] : memref<8x9xf32, #tpu.memory_space<smem>>
    %578 = vector.broadcast %577 : f32 to vector<16x16xf32>
    %579 = arith.mulf %576, %578 : vector<16x16xf32>
    %580 = arith.addf %575, %579 : vector<16x16xf32>
    %581 = vector.extract_strided_slice %546 {offsets = [2, 1], sizes = [16, 16], strides = [1, 1]} : vector<18x18xf32> to vector<16x16xf32>
    %c7_355 = arith.constant 7 : index
    %c7_356 = arith.constant 7 : index
    %582 = memref.load %arg6[%c7_355, %c7_356] : memref<8x9xf32, #tpu.memory_space<smem>>
    %583 = vector.broadcast %582 : f32 to vector<16x16xf32>
    %584 = arith.mulf %581, %583 : vector<16x16xf32>
    %585 = arith.addf %580, %584 : vector<16x16xf32>
    %586 = vector.extract_strided_slice %546 {offsets = [2, 2], sizes = [16, 16], strides = [1, 1]} : vector<18x18xf32> to vector<16x16xf32>
    %c7_357 = arith.constant 7 : index
    %c8_358 = arith.constant 8 : index
    %587 = memref.load %arg6[%c7_357, %c8_358] : memref<8x9xf32, #tpu.memory_space<smem>>
    %588 = vector.broadcast %587 : f32 to vector<16x16xf32>
    %589 = arith.mulf %586, %588 : vector<16x16xf32>
    %590 = arith.addf %585, %589 : vector<16x16xf32>
    %c7_359 = arith.constant 7 : index
    %591 = memref.load %arg7[%c7_359] : memref<8xf32, #tpu.memory_space<smem>>
    %592 = vector.broadcast %591 : f32 to vector<16x16xf32>
    %593 = arith.addf %590, %592 : vector<16x16xf32>
    %c0_360 = arith.constant 0 : index
    %c7_361 = arith.constant 7 : index
    %c0_362 = arith.constant 0 : index
    %c0_363 = arith.constant 0 : index
    %594 = vector.load %arg8[%c0_360, %c7_361, %c0_362, %c0_363] : memref<1x8x16x16xf32, #tpu.memory_space<vmem>>, vector<1x1x16x16xf32>
    %595 = vector.shape_cast %594 : vector<1x1x16x16xf32> to vector<16x16xf32>
    %596 = vector.shape_cast %593 : vector<16x16xf32> to vector<1x1x16x16xf32>
    tpu.vector_store %arg8[%c0_360, %c7_361, %c0_362, %c0_363], %596 {strides = array<i32>} : memref<1x8x16x16xf32, #tpu.memory_space<vmem>>, vector<1x1x16x16xf32>,
    return
  }
  func.func @transform_0(%arg0: i32, %arg1: i32) -> (i32, i32, i32, i32) {
    %c0_i32 = arith.constant 0 : i32
    %c0_i32_0 = arith.constant 0 : i32
    %c0_i32_1 = arith.constant 0 : i32
    return %arg0, %c0_i32, %arg1, %c0_i32_0 : i32, i32, i32, i32
  }
  func.func @transform_1(%arg0: i32, %arg1: i32) -> (i32, i32, i32, i32, i32) {
    %c0_i32 = arith.constant 0 : i32
    %c0_i32_0 = arith.constant 0 : i32
    %c0_i32_1 = arith.constant 0 : i32
    %c0_i32_2 = arith.constant 0 : i32
    return %arg0, %arg1, %c0_i32, %c0_i32_0, %c0_i32_1 : i32, i32, i32, i32, i32
  }
  func.func @transform_2(%arg0: i32, %arg1: i32) -> (i32, i32, i32, i32, i32) {
    %c0_i32 = arith.constant 0 : i32
    %c0_i32_0 = arith.constant 0 : i32
    %c0_i32_1 = arith.constant 0 : i32
    %c0_i32_2 = arith.constant 0 : i32
    return %arg0, %arg1, %c0_i32, %c0_i32_0, %c0_i32_1 : i32, i32, i32, i32, i32
  }
  func.func @transform_3(%arg0: i32, %arg1: i32) -> (i32, i32) {
    %c0_i32 = arith.constant 0 : i32
    %c0_i32_0 = arith.constant 0 : i32
    %c0_i32_1 = arith.constant 0 : i32
    return %c0_i32, %c0_i32_0 : i32, i32
  }
  func.func @transform_4(%arg0: i32, %arg1: i32) -> (i32, i32) {
    %c0_i32 = arith.constant 0 : i32
    %c0_i32_0 = arith.constant 0 : i32
    %c0_i32_1 = arith.constant 0 : i32
    return %c0_i32, %c0_i32_0 : i32, i32
  }
  func.func @transform_5(%arg0: i32, %arg1: i32) -> i32 {
    %c0_i32 = arith.constant 0 : i32
    %c0_i32_0 = arith.constant 0 : i32
    return %c0_i32 : i32
  }
  func.func @transform_6(%arg0: i32, %arg1: i32) -> (i32, i32, i32, i32) {
    %c0_i32 = arith.constant 0 : i32
    %c0_i32_0 = arith.constant 0 : i32
    %c0_i32_1 = arith.constant 0 : i32
    return %arg0, %c0_i32, %arg1, %c0_i32_0 : i32, i32, i32, i32
  }
}

</mosaic_0001>

<bundles_post_ra>
// kernel: bsconvs_forward.1
= control target key start
LH: loop header
LB: loop body
LE: loop exit
PB: predicated region body
PF: predicated region fallthrough
CT: control target
= control target key end

     0   :  { %s4303_s0 = inlined_call_operand.hbm [shape: f32[2,4,16,16], index: 0, kind: input, shape index: {}]   ;;  %s4304_s1 = inlined_call_operand.vmem [shape: f32[2,1,4,1,16], index: 1, kind: input, shape index: {}, may-alias: {1,2}]   ;;  %s4305_s2 = inlined_call_operand.vmem [shape: f32[2,1,4,1,16], index: 2, kind: input, shape index: {}, may-alias: {1,2}]   ;;  %s4306_s3 = inlined_call_operand.vmem [shape: f32[8,4], index: 3, kind: input, shape index: {}]   ;;  %s4307_s4 = inlined_call_operand.vmem [shape: f32[8,9], index: 4, kind: input, shape index: {}]   ;;  %s4308_s5 = inlined_call_operand.vmem [shape: f32[8], index: 5, kind: input, shape index: {}]   ;;  %s4309_s6 = inlined_call_operand.hbm [shape: f32[2,8,16,16], index: 6, kind: output, shape index: {}]  }
   0x1   :  { %4340 = sst [smem:[#allocation38_spill]] %s4303_s0 }
   0x2   :  { %4341 = sst [smem:[#allocation39_spill]] %s4304_s1 }
   0x3   :  { %4342 = sst [smem:[#allocation40_spill]] %s4305_s2 }
   0x4   :  { %4343 = sst [smem:[#allocation41_spill]] %s4306_s3 }
   0x5   :  { %4344 = sst [smem:[#allocation42_spill]] %s4307_s4 }
   0x6   :  { %4345 = sst [smem:[#allocation43_spill]] %s4308_s5 }
   0x7   :  { %11 = vsyncpa [#allocation4], 0 }
   0x8   :  { %13 = vsyncpa [#allocation4 + $0x1], 0 }
   0x9   :  { %14 = vsyncpa [#allocation6], 0 }
   0xa   :  { %15 = vsyncpa [#allocation9], 0 }
   0xb   :  { %16 = vsyncpa [#allocation5], 0 }
   0xc   :  { %18 = vsyncpa [#allocation5 + $0x1], 0  ;;  %s2780_s21 = smov 0   ;;  %s2782_s22 = smov 0  }
   0xd   :  { %s2784_s23 = smov 0   ;;  %s2786_s24 = smov 0  }
   0xe   :  { %s2788_s25 = smov 0   ;;  %s2790_s26 = smov 0  }
   0xf LB: > { %4346 = sst [smem:[#allocation16_spill]] %s2726_s25  ;;  %s2308_s27 = sadd.s32 4294967295, %s2730_s26   ;;  %s2730_s26 = sphi %s2790_s26, %s24_s26   ;;  %s2726_s25 = sphi %s2788_s25, %s4437_s25   ;;  %s2722_s24 = sphi %s2786_s24, %s4436_s24   ;;  %s2718_s23 = sphi %s2784_s23, %s4440_s23   ;;  %s2714_s22 = sphi %s2782_s22, %s4439_s22   ;;  %s2710_s21 = sphi %s2780_s21, %s4438_s21  }
  0x10   : > { %s2309_s28 = sadd.s32 4294967294, %s2730_s26   ;;  %p58_p0 = scmp.ne.s32.totalorder %s2714_s22, %s2710_s21 }
  0x11   : > { %p2814_p1 = scmp.eq.s32.totalorder %s2308_s27, 0  ;;  %p2818_p2 = scmp.eq.s32.totalorder %s2308_s27, 1 }
  0x12   : > { %p209_p3 = scmp.eq.s32.totalorder %s2309_s28, 1  ;;  %p2310_p5 = scmp.ge.s32.totalorder %s2730_s26, 1 }
  0x13   : > { %s4347_s29 = scalar_select %p2814_p1, 1, 0 }
  0x14   : > { %s4348_s30 = scalar_select %p2818_p2, 1, 0 }
  0x15   : > { %p2824_p4 = por %p2814_p1, %p58_p0  ;;  %p2829_p6 = por %p209_p3, %p58_p0 }
  0x16   : > { %p216_p7 = scmp.lt.s32.totalorder %s2730_s26, 3  ;;  %s4351_s4 = sld [smem:[#allocation42_spill]] }
  0x17   : > { %s4349_s7 = scalar_select %p2824_p4, 1, 0 }
  0x18   : > { %s4350_s8 = scalar_select %p2829_p6, 1, 0 }
  0x19   : > { %p2837_p8 = pnand %p2310_p5, %p216_p7  ;;  %s4353_s3 = sld [smem:[#allocation41_spill]] }
  0x1a   : > { %s4355_s5 = sld [smem:[#allocation43_spill]] }
  0x1b   : > { %s4352_s12 = scalar_select %p2837_p8, 1, 0 }
  0x1c   : > { %s240_s11 = sshll.u32 %s4351_s4, 4  ;;  %p2480_p10 = pneg %p2837_p8  ;;  %s241_s11 = int_to_ptr.vmem [resolvable:$true] %s240_s11 }
  0x1d   : > { %s2565_s20 = scalar_lea.vmem %s241_s11, 128  ;;  %p2573_p5 = scmp.lt.s32.totalorder %s241_s11, %s241_s11 }
  0x1e   : > { %p2849_p11 = pnand %p2480_p10, %p2814_p1  ;;  %p2566_p12 = scmp.ne.s32.totalorder %s241_s11, %s2565_s20 }
  0x1f   : > { %s229_s15 = sshll.u32 %s4353_s3, 4  ;;  %p2574_p7 = scmp.lt.s32.totalorder %s2565_s20, %s2565_s20  ;;  %s230_s15 = int_to_ptr.vmem [resolvable:$true] %s229_s15 }
  0x20   : > { %s251_s19 = sshll.u32 %s4355_s5, 4  ;;  %p2567_p13 = pneg %p2849_p11  ;;  %s2856_s19 = int_to_ptr.vmem [resolvable:$true] %s251_s19 }
  0x21   : > { %p2575_p10 = por %p2574_p7, %p2573_p5 }
  0x22   : > { %p2568_p0 = pnand %p2567_p13, %p2566_p12 }
  0x24   : > { %p2569_p3 = pneg %p2568_p0 }
  0x26   : > { %p2576_p9 = pnand %p2575_p10, %p2569_p3 }
  0x28   : > { %2579 = shalt.err (!%p2576_p9)
}
  0x29   : > { %s2732_s27 = smov [#allocation8]   ;;  %s2580_s28 = scalar_lea.vmem %s230_s15, 128 }
  0x2a   : > { %2486 = dma.vmem_to_smem (!%p2849_p11), %s241_s11, 128, %s2732_s27, [#allocation9]  }
  0x2b   : > { %p2581_p6 = scmp.ne.s32.totalorder %s230_s15, %s2580_s28  ;;  %p2588_p8 = scmp.lt.s32.totalorder %s230_s15, %s230_s15 }
  0x2c   : > { %p2589_p2 = scmp.lt.s32.totalorder %s2580_s28, %s2580_s28 }
  0x2d   : > { %p2583_p1 = pnand %p2581_p6, %p2567_p13 }
  0x2e   : > { %p2590_p12 = por %p2589_p2, %p2588_p8 }
  0x2f   : > { %p2584_p4 = pneg %p2583_p1 }
  0x31   : > { %p2591_p0 = pnand %p2590_p12, %p2584_p4 }
  0x33   : > { %2594 = shalt.err (!%p2591_p0)
}
  0x34   : > { %s2733_s9 = smov [#allocation7]   ;;  %s2595_s10 = scalar_lea.vmem %s2856_s19, 16 }
  0x35   : > { %2483 = dma.vmem_to_smem (!%p2849_p11), %s230_s15, 128, %s2733_s9, [#allocation6]  }
  0x36   : > { %p2596_p9 = scmp.ne.s32.totalorder %s2856_s19, %s2595_s10  ;;  %p2603_p1 = scmp.lt.s32.totalorder %s2856_s19, %s2856_s19 }
  0x37   : > { %p2604_p5 = scmp.lt.s32.totalorder %s2595_s10, %s2595_s10 }
  0x38   : > { %p2598_p3 = pnand %p2596_p9, %p2567_p13 }
  0x39   : > { %p2605_p2 = por %p2604_p5, %p2603_p1 }
  0x3a   : > { %p2599_p6 = pneg %p2598_p3 }
  0x3c   : > { %p2606_p4 = pnand %p2605_p2, %p2599_p6 }
  0x3e   : > { %2609 = shalt.err (!%p2606_p4)
}
  0x3f   : > { %s2734_s11 = smov [#allocation10]   ;;  %s45_s13 = sadd.s32 1, %s2718_s23 }
  0x40   : > { %2489 = dma.vmem_to_smem (!%p2849_p11), %s2856_s19, 16, %s2734_s11, [#allocation9]  }
  0x41   : > { %s36_s14 = sadd.s32 1, %s2726_s25  ;;  %p52_p8 = scmp.ne.s32.totalorder %s2718_s23, %s2714_s22 }
  0x42   : > { %p38_p13 = scmp.ge.s32.totalorder %s36_s14, 2  ;;  %p53_p7 = scmp.eq.s32.totalorder %s2730_s26, 0 }
  0x43   : > { %p4356_p10 = scmp.ne.s32.totalorder %s4348_s30, 0  ;;  %p2501_p0 = scmp.lt.s32.totalorder %s2730_s26, 2 }
  0x44   : > { %s4442_s14 = smov (%p38_p13, %s36_s14), 0  ;;  %p54_p9 = por %p53_p7, %p52_p8 }
  0x45   : > { %p2887_p12 = por %p4356_p10, %p52_p8  ;;  %4358 = sst [smem:[#allocation17_spill]] %s4442_s14 }
  0x46   : > { %s262_s16 = sand.u32 1, %s2718_s23   ;;  %s40_s17 = ssub.s32 %s2726_s25, %s4442_s14 }
  0x47   : > { %p43_p3 = scmp.eq.s32.totalorder %s40_s17, 0  ;;  %s2315_s18 = sshll.u32 %s262_s16, 6 }
  0x48   : > { %s2462_s19 = sshll.u32 %s2726_s25, 10  ;;  %s4359_s0 = sld [smem:[#allocation38_spill]] }
  0x49   : > { %s2899_s20 = scalar_select %p43_p3, %s2718_s23, %s45_s13  }
  0x4a   : > { %s266_s9 = scalar_lea.vmem [#allocation3], %s2315_s18  ;;  %p2910_p11 = pnand %p2501_p0, %p54_p9 }
  0x4b   : > { %s275_s10 = sshll.u32 %s266_s9, 4  ;;  %s2914_s13 = scalar_lea.sflag [#allocation4], %s262_s16  ;;  %s2906_s10 = int_to_ptr.vmem [resolvable:$true] %s275_s10 }
  0x4c   : > { %p2612_p1 = pneg %p2910_p11 }
  0x4e   : > { %s2904_s30 = scalar_lea.hbm %s4359_s0, %s2462_s19  ;;  %s2615_s27 = scalar_lea.hbm %s4359_s0, 2048 }
  0x4f   : > { %s2610_s17 = scalar_lea.hbm %s2904_s30, 1024  ;;  %p2616_p4 = scmp.lt.u32.totalorder %s2904_s30, %s4359_s0 }
  0x50   : > { %p2611_p6 = scmp.ne.s32.totalorder %s2904_s30, %s2610_s17  ;;  %p2617_p8 = scmp.lt.u32.totalorder %s2615_s27, %s2610_s17 }
  0x51   : > { %p2619_p7 = scmp.lt.u32.totalorder %s2610_s17, %s2904_s30 }
  0x52   : > { %p2613_p5 = pnand %p2612_p1, %p2611_p6  ;;  %p2618_p13 = por %p2617_p8, %p2616_p4 }
  0x54   : > { %p2614_p2 = pneg %p2613_p5  ;;  %p2620_p10 = por %p2619_p7, %p2618_p13 }
  0x56   : > { %p2621_p0 = pnand %p2620_p10, %p2614_p2 }
  0x58   : > { %2624 = shalt.err (!%p2621_p0)
}
  0x59   : > { %s2625_s16 = scalar_lea.vmem %s2906_s10, 1024  ;;  %s2735_s18 = smov [#allocation3]  }
  0x5a   : > { %p2626_p9 = scmp.ne.s32.totalorder %s2906_s10, %s2625_s16  ;;  %s2630_s19 = sshll.u32 %s2735_s18, 4  ;;  %s2631_s19 = int_to_ptr.vmem [resolvable:$false] %s2630_s19 }
  0x5b   : > { %s2632_s28 = scalar_lea.vmem %s2631_s19, 2048  ;;  %p2633_p5 = scmp.lt.s32.totalorder %s2906_s10, %s2631_s19 }
  0x5c   : > { %p2628_p3 = pnand %p2626_p9, %p2612_p1  ;;  %p2634_p4 = scmp.lt.s32.totalorder %s2632_s28, %s2625_s16 }
  0x5e   : > { %p2629_p6 = pneg %p2628_p3  ;;  %p2635_p8 = por %p2634_p4, %p2633_p5 }
  0x60   : > { %p2636_p13 = pnand %p2635_p8, %p2629_p6 }
  0x62   : > { %2639 = shalt.err (!%p2636_p13)
}
  0x63   : > { %s2736_s17 = smov 128   ;;  %s2737_s27 = smov 8  }
  0x64   : > { %2493 = dma.hbm_to_vmem [thread:$0]  (!%p2910_p11), %s2904_s30, 1024, %s2906_s10, %s2914_s13, %s2736_s17, %s2736_s17, %s2737_s27  }
  0x65   : > { %p4361_p1 = scmp.ne.s32.totalorder %s4352_s12, 0 }
  0x67   : > { %309 = sbr.rel (%p4361_p1) target bundleno = 604 (0x25c), region = 44 }
  0x6e   : > { %s2945_s9 = sand.u32 1, %s2714_s22   ;;  %p4362_p2 = scmp.ne.s32.totalorder %s4349_s7, 0 }
  0x6f   : > { %s2319_s16 = sshll.u32 %s2945_s9, 6  ;;  %s312_s18 = scalar_lea.sflag [#allocation4], %s2945_s9 }
  0x70   : > { %s2949_s19 = scalar_lea.vmem [#allocation3], %s2319_s16 }
  0x71   : > { %2693 = dma.done.wait (%p4362_p2), %s312_s18, 1024  }
  0x72   : > { %2695 = vsyncadd (%p4362_p2), %s312_s18, 4294966272  ;;  %p4363_p11 = scmp.ne.s32.totalorder %s4347_s29, 0 }
  0x74   : > { %2697 = dma.done.wait (%p4363_p11), [#allocation6], 128  }
  0x75   : > { %2699 = vsyncadd (%p4363_p11), [#allocation6], 4294967168 }
  0x76   : > { %2701 = dma.done.wait (%p4363_p11), [#allocation9], 144  }
  0x77   : > { %2703 = vsyncadd (%p4363_p11), [#allocation9], 4294967152 }
  0x78   : > { %332 = sfence }
  0x79   : > { %p374_p7 = scmp.lt.s32.totalorder %s2722_s24, 1  ;;  %vm391_vm0 = vcmask 7168   ;;  %vm405_vm1 = vcmask 146568   ;;  %v2738_v0 = vmov 0.0   ;;  %vm394_vm2 = vcmask 1024   ;;  %s4364_s1 = sld [smem:[#allocation39_spill]] }
  0x7a   : > { %399 = vst.msk [vmem:[#allocation2 + $0x30] sm:$0xff] %vm391_vm0, %v2738_v0  ;;  %392 = vst.msk [vmem:[#allocation2] sm:$0xff] %vm391_vm0, %v2738_v0  ;;  %vm408_vm3 = vcmask 140424   ;;  %s2739_s11 = smov 1   ;;  %v461_v5 = vld [vmem:[%s2949_s19 + $0x8] sm:$0xff]  ;;  %v460_v6 = vld [vmem:[%s2949_s19] sm:$0xff] }
  0x7b   : > { %s2965_s7 = scalar_select %p374_p7, %s2722_s24, 1  ;;  %393 = vst.msk [vmem:[#allocation2 + $0x8] sm:$0xff] %vm391_vm0, %v2738_v0  ;;  %396 = vst.msk [vmem:[#allocation2 + $0x18] sm:$0xff] %vm391_vm0, %v2738_v0  ;;  %v463_v7 = vld [vmem:[%s2949_s19 + $0x18] sm:$0xff]  ;;  %v462_v8 = vld [vmem:[%s2949_s19 + $0x10] sm:$0xff]  ;;  %vm455_vm4 = vcmask 131080  }
  0x7c   : > { %397 = vst.msk [vmem:[#allocation2 + $0x20] sm:$0xff] %vm391_vm0, %v2738_v0  ;;  %400 = vst.msk [vmem:[#allocation2 + $0x38] sm:$0xff] %vm391_vm0, %v2738_v0  ;;  %v465_v9 = vld [vmem:[%s2949_s19 + $0x28] sm:$0xff]  ;;  %v464_v10 = vld [vmem:[%s2949_s19 + $0x20] sm:$0xff]  ;;  %s4365_s2 = sld [smem:[#allocation40_spill]]  ;;  %vm500_vm5 = vcmask 138248  }
  0x7d   : > { %402 = vst.msk [vmem:[#allocation2 + $0x48] sm:$0xff] %vm391_vm0, %v2738_v0  ;;  %403 = vst.msk [vmem:[#allocation2 + $0x50] sm:$0xff] %vm391_vm0, %v2738_v0  ;;  %s2324_s29 = sshll.u32 %s2965_s7, 2  ;;  %v467_v11 = vld [vmem:[%s2949_s19 + $0x38] sm:$0xff]  ;;  %v466_v12 = vld [vmem:[%s2949_s19 + $0x30] sm:$0xff]  ;;  %s2409_s27 = sld [smem:[#allocation7 + $0x280]] }
  0x7e   : > { %413 = vst.msk [vmem:[#allocation2 + $0x30] sm:$0xff] %vm405_vm1, %v2738_v0  ;;  %406 = vst.msk [vmem:[#allocation2] sm:$0xff] %vm405_vm1, %v2738_v0  ;;  %s2425_s16 = sld [smem:[#allocation7 + $0x300]]  ;;  %s2410_s19 = sld [smem:[#allocation7 + $0x281]]  ;;  %vm633_vm6 = vcmask 1046528   ;;  %vm693_vm7 = vcmask 1045504  }
  0x7f   : > { %407 = vst.msk [vmem:[#allocation2 + $0x8] sm:$0xff] %vm405_vm1, %v2738_v0  ;;  %410 = vst.msk [vmem:[#allocation2 + $0x18] sm:$0xff] %vm405_vm1, %v2738_v0  ;;  %s381_s10 = scalar_lea.vmem %s4364_s1, %s2324_s29  ;;  %s2441_s18 = sld [smem:[#allocation7 + $0x380]]  ;;  %vm749_vm8 = vcmask 130048  }
  0x80   : > { %411 = vst.msk [vmem:[#allocation2 + $0x20] sm:$0xff] %vm405_vm1, %v2738_v0  ;;  %414 = vst.msk [vmem:[#allocation2 + $0x38] sm:$0xff] %vm405_vm1, %v2738_v0  ;;  %v2328_v1 = vld [vmem:[%s381_s10 + $0x2] ss:$0 sm:$0xff]  ;;  %v2326_v2 = vld [vmem:[%s381_s10] ss:$0 sm:$0xff] }
  0x81   : > { %416 = vst.msk [vmem:[#allocation2 + $0x48] sm:$0xff] %vm405_vm1, %v2738_v0  ;;  %417 = vst.msk [vmem:[#allocation2 + $0x50] sm:$0xff] %vm405_vm1, %v2738_v0  ;;  %447 = vrot.lane.b32.xlu1 %v2328_v1, %s2739_s11  ;;  %443 = vrot.lane.b32.xlu0 %v2326_v2, %s2739_s11  ;;  %v2329_v3 = vld [vmem:[%s381_s10 + $0x3] ss:$0 sm:$0xff]  ;;  %v2327_v4 = vld [vmem:[%s381_s10 + $0x1] ss:$0 sm:$0xff] }
  0x82   : > { %395 = vst.msk [vmem:[#allocation2 + $0x10] sm:$0x3] %vm394_vm2, %v2738_v0  ;;  %398 = vst.msk [vmem:[#allocation2 + $0x28] sm:$0x3] %vm394_vm2, %v2738_v0  ;;  %s389_s17 = scalar_lea.vmem %s4365_s2, %s2324_s29  ;;  %s2426_s7 = sld [smem:[#allocation7 + $0x301]] }
  0x83   : > { %401 = vst.msk [vmem:[#allocation2 + $0x40] sm:$0x3] %vm394_vm2, %v2738_v0  ;;  %404 = vst.msk [vmem:[#allocation2 + $0x58] sm:$0x3] %vm394_vm2, %v2738_v0  ;;  %v2331_v13 = vld [vmem:[%s389_s17 + $0x1] ss:$0 sm:$0xff]  ;;  %v3032_v29 = vstv %s2409_s27 }
  0x84   : > { %409 = vst.msk [vmem:[#allocation2 + $0x10] sm:$0x3] %vm408_vm3, %v2738_v0  ;;  %412 = vst.msk [vmem:[#allocation2 + $0x28] sm:$0x3] %vm408_vm3, %v2738_v0  ;;  %v2330_v14 = vld [vmem:[%s389_s17] ss:$0 sm:$0xff]  ;;  %v3034_v30 = vstv %s2425_s16  ;;  %v3048_v34 = vstv %s2410_s19 }
  0x85   : > { %415 = vst.msk [vmem:[#allocation2 + $0x40] sm:$0x3] %vm408_vm3, %v2738_v0  ;;  %418 = vst.msk [vmem:[#allocation2 + $0x58] sm:$0x3] %vm408_vm3, %v2738_v0  ;;  %449 = vrot.lane.b32.xlu1 %v2329_v3, %s2739_s11  ;;  %445 = vrot.lane.b32.xlu0 %v2327_v4, %s2739_s11  ;;  %v2333_v15 = vld [vmem:[%s389_s17 + $0x3] ss:$0 sm:$0xff]  ;;  %v3046_v33 = vstv %s2441_s18 }
  0x86   : > { %v2332_v16 = vld [vmem:[%s389_s17 + $0x2] ss:$0 sm:$0xff]  ;;  %s2442_s29 = sld [smem:[#allocation7 + $0x381]]  ;;  %s3024_s12 = sld [smem:[#allocation7]]  ;;  %4366 = vst [vmem:[#allocation18_spill] sm:$0xff] %v3046_v33 }
  0x87   : > { %s3026_s30 = sld [smem:[#allocation7 + $0x80]]  ;;  %s3028_s10 = sld [smem:[#allocation7 + $0x1]] }
  0x88   : > { %s3040_s13 = sld [smem:[#allocation7 + $0x101]]  ;;  %s3042_s28 = sld [smem:[#allocation7 + $0x2]]  ;;  %v3058_v37 = vstv %s2426_s7 }
  0x89   : > { %478 = vrot.lane.b32.xlu1 %v461_v5, %s2739_s11  ;;  %476 = vrot.lane.b32.xlu0 %v460_v6, %s2739_s11  ;;  %s3054_s17 = sld [smem:[#allocation7 + $0x282]]  ;;  %s3064_s0 = sld [smem:[#allocation7 + $0x3]] }
  0x8a   : > { %s3056_s27 = sld [smem:[#allocation7 + $0x302]]  ;;  %s3118_s19 = sld [smem:[#allocation7 + $0x283]] }
  0x8b   : > { %s3062_s16 = sld [smem:[#allocation7 + $0x382]]  ;;  %s3132_s7 = sld [smem:[#allocation7 + $0x303]] }
  0x8c   : > { %v3060_v38 = vstv %s2442_s29  ;;  %v3093_v61 = vstv %s3024_s12  ;;  %s3109_s18 = sld [smem:[#allocation7 + $0x82]]  ;;  %s3134_s29 = sld [smem:[#allocation7 + $0x383]] }
  0x8d   : > { %482 = vrot.lane.b32.xlu1 %v463_v7, %s2739_s11  ;;  %480 = vrot.lane.b32.xlu0 %v462_v8, %s2739_s11  ;;  %4367 = vst [vmem:[#allocation19_spill] sm:$0xff] %v3060_v38  ;;  %v3096_v62 = vstv %s3028_s10  ;;  %v3101_v63 = vstv %s3026_s30  ;;  %s3144_s12 = sld [smem:[#allocation7 + $0x83]]  ;;  %s3186_s30 = sld [smem:[#allocation8 + $0x2]] }
  0x8e   : > { %v3107_v1 = vstv %s3040_s13  ;;  %v3121_v5 = vstv %s3042_s28  ;;  %s3188_s10 = sld [smem:[#allocation7 + $0x100]]  ;;  %s3210_s13 = sld [smem:[#allocation7 + $0x103]] }
  0x8f   : > { %v3112_v2 = vstv %s3054_s17  ;;  %v3130_v8 = vstv %s3064_s0  ;;  %s3146_s0 = sld [smem:[#allocation8 + $0x1]]  ;;  %s3642_s1 = sld [smem:[#allocation8 + $0x385]] }
  0x90   : > { %v3124_v6 = vstv %s3056_s27  ;;  %s3220_s28 = sld [smem:[#allocation8 + $0x81]]  ;;  %s3247_s27 = sld [smem:[#allocation8 + $0x82]] }
  0x91   : > { %486 = vrot.lane.b32.xlu1 %v465_v9, %s2739_s11  ;;  %484 = vrot.lane.b32.xlu0 %v464_v10, %s2739_s11  ;;  %v3127_v7 = vstv %s3062_s16  ;;  %s3230_s17 = sld [smem:[#allocation7 + $0x181]]  ;;  %s3252_s16 = sld [smem:[#allocation7 + $0x180]] }
  0x92   : > { %4368 = vst [vmem:[#allocation20_spill] sm:$0xff] %v3127_v7  ;;  %s3644_s2 = sld [smem:[#allocation8 + $0x6]]  ;;  %s4378_s3 = smov 127  }
  0x93   : > { %s3650_s4 = sld [smem:[#allocation8 + $0x287]]  ;;  %s3678_s25 = sld [smem:[#allocation8 + $0x86]] }
  0x94   : > { %s3652_s5 = sld [smem:[#allocation8 + $0x307]] }
  0x95   : > { %490 = vrot.lane.b32.xlu1 %v467_v11, %s2739_s11  ;;  %488 = vrot.lane.b32.xlu0 %v466_v12, %s2739_s11  ;;  %s3659_s14 = sld [smem:[#allocation8 + $0x387]] }
  0x99   : > { %535 = vrot.lane.b32.xlu1 %v2331_v13, %s2739_s11  ;;  %533 = vrot.lane.b32.xlu0 %v2330_v14, %s2739_s11 }
  0x9d   : > { %539 = vrot.lane.b32.xlu1 %v2333_v15, %s2739_s11  ;;  %537 = vrot.lane.b32.xlu0 %v2332_v16, %s2739_s11  ;;  %s3030_s11 = sld [smem:[#allocation7 + $0x81]] }
  0xa3   : > { %v3104_v0 = vstv %s3030_s11  ;;  %s3196_s11 = sld [smem:[#allocation7 + $0x102]] }
  0xf3   : > { %v448_v17 = vpop.permute.xlu1 %447  ;;  %v444_v18 = vpop.permute.xlu0 %443 }
  0xf4   : > { %458 = vst.msk [vmem:[#allocation2 + $0x30] sm:$0x1] %vm455_vm4, %v448_v17  ;;  %456 = vst.msk [vmem:[#allocation2] sm:$0x1] %vm455_vm4, %v444_v18 }
  0xf7   : > { %v450_v19 = vpop.permute.xlu1 %449  ;;  %v446_v20 = vpop.permute.xlu0 %445 }
  0xf8   : > { %459 = vst.msk [vmem:[#allocation2 + $0x48] sm:$0x1] %vm455_vm4, %v450_v19  ;;  %457 = vst.msk [vmem:[#allocation2 + $0x18] sm:$0x1] %vm455_vm4, %v446_v20 }
  0xfb   : > { %v479_v21 = vpop.permute.xlu1 %478  ;;  %v477_v22 = vpop.permute.xlu0 %476 }
  0xfc   : > { %502 = vst.msk [vmem:[#allocation2 + $0x9] sm:$0xff] %vm500_vm5, %v479_v21  ;;  %501 = vst.msk [vmem:[#allocation2 + $0x1] sm:$0xff] %vm500_vm5, %v477_v22 }
  0xff   : > { %v483_v23 = vpop.permute.xlu1 %482  ;;  %v481_v24 = vpop.permute.xlu0 %480 }
 0x100   : > { %504 = vst.msk [vmem:[#allocation2 + $0x21] sm:$0xff] %vm500_vm5, %v483_v23  ;;  %503 = vst.msk [vmem:[#allocation2 + $0x19] sm:$0xff] %vm500_vm5, %v481_v24 }
 0x103   : > { %v487_v25 = vpop.permute.xlu1 %486  ;;  %v485_v26 = vpop.permute.xlu0 %484  ;;  %v3036_v31 = vld [vmem:[#allocation2] sm:$0xff]  ;;  %v3038_v32 = vld [vmem:[#allocation2 + $0x8] sm:$0xff] }
 0x104   : > { %506 = vst.msk [vmem:[#allocation2 + $0x39] sm:$0xff] %vm500_vm5, %v487_v25  ;;  %505 = vst.msk [vmem:[#allocation2 + $0x31] sm:$0xff] %vm500_vm5, %v485_v26  ;;  %v1549_v39 = vmul.f32 %v3032_v29, %v3036_v31  ;;  %v1550_v40 = vmul.f32 %v3032_v29, %v3038_v32  ;;  %v1747_v41 = vmul.f32 %v3034_v30, %v3036_v31 }
 0x105   : > { %v1748_v42 = vmul.f32 %v3034_v30, %v3038_v32  ;;  %v1945_v45 = vmul.f32 %v3046_v33, %v3036_v31  ;;  %v1946_v46 = vmul.f32 %v3046_v33, %v3038_v32  ;;  %v554_v9 = vmul.f32 %v3093_v61, %v3036_v31 }
 0x106   : > { %v555_v10 = vmul.f32 %v3093_v61, %v3038_v32 }
 0x107   : > { %v491_v27 = vpop.permute.xlu1 %490  ;;  %v489_v28 = vpop.permute.xlu0 %488  ;;  %v3050_v35 = vld [vmem:[#allocation2 + $0x18] sm:$0xff]  ;;  %v3052_v36 = vld [vmem:[#allocation2 + $0x20] sm:$0xff] }
 0x108   : > { %508 = vst.msk [vmem:[#allocation2 + $0x51] sm:$0xff] %vm500_vm5, %v491_v27  ;;  %507 = vst.msk [vmem:[#allocation2 + $0x49] sm:$0xff] %vm500_vm5, %v489_v28  ;;  %v1557_v47 = vmul.f32 %v3048_v34, %v3050_v35  ;;  %v1558_v48 = vmul.f32 %v3048_v34, %v3052_v36  ;;  %v1755_v49 = vmul.f32 %v3058_v37, %v3050_v35 }
 0x109   : > { %v1756_v50 = vmul.f32 %v3058_v37, %v3052_v36  ;;  %v1953_v51 = vmul.f32 %v3060_v38, %v3050_v35  ;;  %v1954_v52 = vmul.f32 %v3060_v38, %v3052_v36  ;;  %v563_v11 = vmul.f32 %v3096_v62, %v3050_v35 }
 0x10a   : > { %v1560_v53 = vadd.f32 %v1557_v47, %v1549_v39  ;;  %v1561_v54 = vadd.f32 %v1558_v48, %v1550_v40  ;;  %v1758_v55 = vadd.f32 %v1755_v49, %v1747_v41  ;;  %v564_v12 = vmul.f32 %v3096_v62, %v3052_v36 }
 0x10b   : > { %v536_v43 = vpop.permute.xlu1 %535  ;;  %v534_v44 = vpop.permute.xlu0 %533  ;;  %v1759_v56 = vadd.f32 %v1756_v50, %v1748_v42  ;;  %v1956_v57 = vadd.f32 %v1953_v51, %v1945_v45  ;;  %v1957_v58 = vadd.f32 %v1954_v52, %v1946_v46  ;;  %v3114_v3 = vld [vmem:[#allocation2 + $0x30] sm:$0xff]  ;;  %v3116_v4 = vld [vmem:[#allocation2 + $0x38] sm:$0xff]  ;;  %v765_v13 = vmul.f32 %v3104_v0, %v3050_v35 }
 0x10c   : > { %546 = vst.msk [vmem:[#allocation2 + $0x29] sm:$0x1] %vm455_vm4, %v536_v43  ;;  %545 = vst.msk [vmem:[#allocation2 + $0x11] sm:$0x1] %vm455_vm4, %v534_v44  ;;  %v766_v14 = vmul.f32 %v3104_v0, %v3052_v36  ;;  %v1568_v15 = vmul.f32 %v3112_v2, %v3114_v3  ;;  %v1569_v16 = vmul.f32 %v3112_v2, %v3116_v4  ;;  %v3181_v47 = vstv %s3109_s18  ;;  %s4322_s18 = smov 127  }
 0x10d   : > { %v1766_v17 = vmul.f32 %v3124_v6, %v3114_v3  ;;  %v1767_v18 = vmul.f32 %v3124_v6, %v3116_v4  ;;  %v1964_v19 = vmul.f32 %v3127_v7, %v3114_v3  ;;  %v1965_v20 = vmul.f32 %v3127_v7, %v3116_v4 }
 0x10e   : > { %v575_v23 = vmul.f32 %v3121_v5, %v3114_v3  ;;  %v576_v24 = vmul.f32 %v3121_v5, %v3116_v4  ;;  %v1571_v25 = vadd.f32 %v1568_v15, %v1560_v53  ;;  %v1572_v26 = vadd.f32 %v1569_v16, %v1561_v54 }
 0x10f   : > { %v540_v59 = vpop.permute.xlu1 %539  ;;  %v538_v60 = vpop.permute.xlu0 %537  ;;  %v3164_v21 = vld [vmem:[#allocation2 + $0x48] sm:$0xff]  ;;  %v3166_v22 = vld [vmem:[#allocation2 + $0x50] sm:$0xff]  ;;  %v1769_v27 = vadd.f32 %v1766_v17, %v1758_v55  ;;  %v1770_v28 = vadd.f32 %v1767_v18, %v1759_v56  ;;  %v1967_v39 = vadd.f32 %v1964_v19, %v1956_v57  ;;  %v1968_v40 = vadd.f32 %v1965_v20, %v1957_v58 }
 0x110   : > { %548 = vst.msk [vmem:[#allocation2 + $0x59] sm:$0x1] %vm455_vm4, %v540_v59  ;;  %547 = vst.msk [vmem:[#allocation2 + $0x41] sm:$0x1] %vm455_vm4, %v538_v60  ;;  %v566_v41 = vadd.f32 %v563_v11, %v554_v9  ;;  %v567_v42 = vadd.f32 %v564_v12, %v555_v10  ;;  %v587_v43 = vmul.f32 %v3130_v8, %v3164_v21  ;;  %v3184_v48 = vstv %s3118_s19  ;;  %s3263_s19 = sld [smem:[#allocation7 + $0x182]] }
 0x111   : > { %v588_v44 = vmul.f32 %v3130_v8, %v3166_v22  ;;  %v757_v45 = vmul.f32 %v3101_v63, %v3036_v31  ;;  %v758_v46 = vmul.f32 %v3101_v63, %v3038_v32  ;;  %4369 = vst [vmem:[#allocation21_spill] sm:$0xff] %v3184_v48  ;;  %v3191_v51 = vstv %s3132_s7  ;;  %s3278_s7 = sld [smem:[#allocation7 + $0x183]] }
 0x112   : > { %v578_v49 = vadd.f32 %v575_v23, %v566_v41  ;;  %v579_v50 = vadd.f32 %v576_v24, %v567_v42  ;;  %4370 = vst [vmem:[#allocation22_spill] sm:$0xff] %v3191_v51  ;;  %v3194_v52 = vstv %s3134_s29  ;;  %v3199_v55 = vstv %s3144_s12  ;;  %s3281_s29 = sld [smem:[#allocation8 + $0x101]]  ;;  %s4320_s12 = smov 126  }
 0x113   : > { %4371 = vst [vmem:[#allocation23_spill] sm:$0xff] %v3194_v52  ;;  %v768_v53 = vadd.f32 %v765_v13, %v757_v45  ;;  %v769_v54 = vadd.f32 %v766_v14, %v758_v46  ;;  %v598_v56 = vstv %s3146_s0  ;;  %v1579_v59 = vmul.f32 %v3184_v48, %v3164_v21  ;;  %s3292_s0 = sld [smem:[#allocation7 + $0x201]] }
 0x114   : > { %v3202_v57 = vadd.f32 %v587_v43, %v578_v49  ;;  %v3204_v58 = vadd.f32 %v588_v44, %v579_v50  ;;  %v1580_v60 = vmul.f32 %v3184_v48, %v3166_v22  ;;  %v1777_v9 = vmul.f32 %v3191_v51, %v3164_v21 }
 0x115   : > { %v1778_v10 = vmul.f32 %v3191_v51, %v3166_v22  ;;  %v1975_v11 = vmul.f32 %v3194_v52, %v3164_v21  ;;  %v1976_v12 = vmul.f32 %v3194_v52, %v3166_v22  ;;  %v776_v13 = vmul.f32 %v3181_v47, %v3114_v3  ;;  %v551_v52 = vld [vmem:[#allocation2 + $0x10] sm:$0x3]  ;;  %v560_v51 = vld [vmem:[#allocation2 + $0x28] sm:$0x3] }
 0x116   : > { %v777_v14 = vmul.f32 %v3181_v47, %v3116_v4  ;;  %v3226_v15 = vadd.f32 %v1579_v59, %v1571_v25  ;;  %v3228_v16 = vadd.f32 %v1580_v60, %v1572_v26  ;;  %v3232_v17 = vadd.f32 %v1777_v9, %v1769_v27 }
 0x117   : > { %v3234_v18 = vadd.f32 %v1778_v10, %v1770_v28  ;;  %v3236_v19 = vadd.f32 %v1975_v11, %v1967_v39  ;;  %v3238_v20 = vadd.f32 %v1976_v12, %v1968_v40  ;;  %v787_v23 = vmul.f32 %v3199_v55, %v3164_v21 }
 0x118   : > { %v788_v24 = vmul.f32 %v3199_v55, %v3166_v22  ;;  %v600_v25 = vmul.f32 %v598_v56, %v3204_v58  ;;  %v599_v26 = vmul.f32 %v598_v56, %v3202_v57  ;;  %v612_v41 = vstv %s3186_s30  ;;  %s3300_s30 = sld [smem:[#allocation7 + $0x200]] }
 0x119   : > { %v3250_v27 = vstv %s3188_s10  ;;  %v779_v28 = vadd.f32 %v776_v13, %v768_v53  ;;  %v780_v39 = vadd.f32 %v777_v14, %v769_v54  ;;  %v963_v40 = vmul.f32 %v3107_v1, %v3050_v35  ;;  %s3303_s10 = sld [smem:[#allocation8 + $0x102]] }
 0x11a   : > { %605 = vrot.lane.b32.xlu1 %v600_v25, %s4322_s18  ;;  %603 = vrot.lane.b32.xlu0 %v599_v26, %s4322_s18  ;;  %v964_v42 = vmul.f32 %v3107_v1, %v3052_v36  ;;  %v3261_v43 = vstv %s3196_s11  ;;  %v614_v46 = vmul.f32 %v612_v41, %v3204_v58  ;;  %v613_v49 = vmul.f32 %v612_v41, %v3202_v57  ;;  %s3308_s11 = sld [smem:[#allocation7 + $0x202]] }
 0x11b   : > { %v3265_v44 = vadd.f32 %v787_v23, %v779_v28  ;;  %v3267_v45 = vadd.f32 %v788_v24, %v780_v39  ;;  %v955_v50 = vmul.f32 %v3250_v27, %v3036_v31  ;;  %v956_v53 = vmul.f32 %v3250_v27, %v3038_v32 }
 0x11c   : > { %v3276_v54 = vstv %s3210_s13  ;;  %v798_v56 = vstv %s3220_s28  ;;  %v974_v59 = vmul.f32 %v3261_v43, %v3114_v3  ;;  %v975_v60 = vmul.f32 %v3261_v43, %v3116_v4  ;;  %s3310_s13 = sld [smem:[#allocation7 + $0x203]]  ;;  %s3335_s28 = sld [smem:[#allocation8 + $0x181]] }
 0x11d   : > { %v3290_v9 = vstv %s3230_s17  ;;  %v966_v10 = vadd.f32 %v963_v40, %v955_v50  ;;  %v967_v11 = vadd.f32 %v964_v42, %v956_v53  ;;  %v985_v12 = vmul.f32 %v3276_v54, %v3164_v21  ;;  %s3356_s17 = sld [smem:[#allocation8 + $0x182]] }
 0x11e   : > { %619 = vrot.lane.b32.xlu1 %v614_v46, %s4320_s12  ;;  %617 = vrot.lane.b32.xlu0 %v613_v49, %s4320_s12  ;;  %v986_v13 = vmul.f32 %v3276_v54, %v3166_v22  ;;  %v800_v14 = vmul.f32 %v798_v56, %v3267_v45  ;;  %v799_v23 = vmul.f32 %v798_v56, %v3265_v44  ;;  %v812_v24 = vstv %s3247_s27  ;;  %s3383_s27 = sld [smem:[#allocation8 + $0x201]] }
 0x11f   : > { %v3306_v25 = vstv %s3252_s16  ;;  %v977_v26 = vadd.f32 %v974_v59, %v966_v10  ;;  %v978_v41 = vadd.f32 %v975_v60, %v967_v11  ;;  %v1161_v28 = vmul.f32 %v3290_v9, %v3050_v35  ;;  %s2340_s16 = sld [smem:[#allocation8 + $0x4]] }
 0x120   : > { %v1162_v39 = vmul.f32 %v3290_v9, %v3052_v36  ;;  %v3319_v40 = vstv %s3263_s19  ;;  %v814_v49 = vmul.f32 %v812_v24, %v3267_v45  ;;  %v813_v50 = vmul.f32 %v812_v24, %v3265_v44  ;;  %s3392_s19 = sld [smem:[#allocation8 + $0x202]] }
 0x121   : > { %v3321_v42 = vadd.f32 %v985_v12, %v977_v26  ;;  %v3323_v46 = vadd.f32 %v986_v13, %v978_v41  ;;  %v1153_v53 = vmul.f32 %v3306_v25, %v3036_v31  ;;  %v1154_v56 = vmul.f32 %v3306_v25, %v3038_v32 }
 0x122   : > { %805 = vrot.lane.b32.xlu1 %v800_v14, %s4322_s18  ;;  %803 = vrot.lane.b32.xlu0 %v799_v23, %s4322_s18  ;;  %v3332_v59 = vstv %s3278_s7  ;;  %v996_v60 = vstv %s3281_s29  ;;  %v1172_v10 = vmul.f32 %v3319_v40, %v3114_v3  ;;  %v1173_v11 = vmul.f32 %v3319_v40, %v3116_v4  ;;  %s2341_s7 = sld [smem:[#allocation8 + $0x5]]  ;;  %s2343_s29 = sld [smem:[#allocation8 + $0x7]] }
 0x123   : > { %4372 = vst [vmem:[#allocation24_spill] sm:$0xff] %v3321_v42  ;;  %4373 = vst [vmem:[#allocation25_spill] sm:$0xff] %v3323_v46  ;;  %v3344_v12 = vstv %s3292_s0  ;;  %v1164_v13 = vadd.f32 %v1161_v28, %v1153_v53  ;;  %v1165_v14 = vadd.f32 %v1162_v39, %v1154_v56  ;;  %v1183_v23 = vmul.f32 %v3332_v59, %v3164_v21  ;;  %v572_v56 = vld [vmem:[#allocation2 + $0x40] sm:$0x3]  ;;  %s2344_s0 = sld [smem:[#allocation8 + $0x8]] }
 0x124   : > { %v1184_v24 = vmul.f32 %v3332_v59, %v3166_v22  ;;  %v998_v26 = vmul.f32 %v996_v60, %v3323_v46  ;;  %v997_v41 = vmul.f32 %v996_v60, %v3321_v42  ;;  %v3359_v7 = vstv %s3308_s11  ;;  %s3444_s11 = sld [smem:[#allocation8 + $0x87]] }
 0x125   : > { %v1175_v28 = vadd.f32 %v1172_v10, %v1164_v13  ;;  %v1176_v39 = vadd.f32 %v1173_v11, %v1165_v14  ;;  %v3362_v53 = vstv %s3310_s13  ;;  %v1359_v60 = vmul.f32 %v3344_v12, %v3050_v35  ;;  %s3460_s13 = sld [smem:[#allocation8 + $0x88]] }
 0x126   : > { %819 = vrot.lane.b32.xlu1 %v814_v49, %s4320_s12  ;;  %817 = vrot.lane.b32.xlu0 %v813_v50, %s4320_s12  ;;  %v3353_v49 = vstv %s3300_s30  ;;  %v1010_v50 = vstv %s3303_s10  ;;  %v1360_v38 = vmul.f32 %v3344_v12, %v3052_v36  ;;  %v556_v33 = vmul.f32 %v3093_v61, %v551_v52  ;;  %s3425_s30 = sld [smem:[#allocation8 + $0x84]]  ;;  %s3438_s10 = sld [smem:[#allocation8 + $0x85]] }
 0x127   : > { %v565_v48 = vmul.f32 %v3096_v62, %v560_v51  ;;  %v3372_v10 = vadd.f32 %v1183_v23, %v1175_v28  ;;  %v3374_v11 = vadd.f32 %v1184_v24, %v1176_v39  ;;  %v1012_v13 = vmul.f32 %v1010_v50, %v3323_v46  ;;  %v584_v23 = vld [vmem:[#allocation2 + $0x58] sm:$0x3] }
 0x128   : > { %v1011_v14 = vmul.f32 %v1010_v50, %v3321_v42  ;;  %v1352_v35 = vmul.f32 %v3353_v49, %v3038_v32  ;;  %v577_v36 = vmul.f32 %v3121_v5, %v572_v56  ;;  %v1370_v61 = vmul.f32 %v3359_v7, %v3114_v3 }
 0x129   : > { %4374 = vst [vmem:[#allocation26_spill] sm:$0xff] %v3372_v10  ;;  %4375 = vst [vmem:[#allocation27_spill] sm:$0xff] %v3374_v11  ;;  %v1371_v62 = vmul.f32 %v3359_v7, %v3116_v4  ;;  %v568_v32 = vadd.f32 %v565_v48, %v556_v33  ;;  %v1381_v52 = vmul.f32 %v3362_v53, %v3164_v21  ;;  %v1208_v24 = vstv %s3356_s17  ;;  %s2370_s17 = sld [smem:[#allocation8 + $0x105]] }
 0x12a   : > { %1003 = vrot.lane.b32.xlu1 %v998_v26, %s4322_s18  ;;  %1001 = vrot.lane.b32.xlu0 %v997_v41, %s4322_s18  ;;  %v1351_v26 = vmul.f32 %v3353_v49, %v3036_v31  ;;  %v1194_v41 = vstv %s3335_s28  ;;  %v1363_v51 = vadd.f32 %v1360_v38, %v1352_v35  ;;  %v1382_v5 = vmul.f32 %v3362_v53, %v3166_v22  ;;  %s2369_s28 = sld [smem:[#allocation8 + $0x104]] }
 0x12b   : > { %v1196_v3 = vmul.f32 %v1194_v41, %v3374_v11  ;;  %v1195_v4 = vmul.f32 %v1194_v41, %v3372_v10  ;;  %v580_v50 = vadd.f32 %v577_v36, %v568_v32  ;;  %v589_v33 = vmul.f32 %v3130_v8, %v584_v23  ;;  %v754_v36 = vld [vmem:[#allocation2 + $0x10] sm:$0x3]  ;;  %v773_v32 = vld [vmem:[#allocation2 + $0x40] sm:$0x3] }
 0x12c   : > { %v1362_v31 = vadd.f32 %v1359_v60, %v1351_v26  ;;  %v1374_v28 = vadd.f32 %v1371_v62, %v1363_v51  ;;  %v1210_v48 = vmul.f32 %v1208_v24, %v3374_v11  ;;  %v1209_v39 = vmul.f32 %v1208_v24, %v3372_v10 }
 0x12d   : > { %v1392_v56 = vstv %s3383_s27  ;;  %v644_v60 = vstv %s2340_s16  ;;  %v704_v51 = vstv %s2343_s29  ;;  %s2372_s27 = sld [smem:[#allocation8 + $0x107]]  ;;  %s2373_s16 = sld [smem:[#allocation8 + $0x108]] }
 0x12e   : > { %1017 = vrot.lane.b32.xlu1 %v1012_v13, %s4320_s12  ;;  %1015 = vrot.lane.b32.xlu0 %v1011_v14, %s4320_s12  ;;  %v1373_v38 = vadd.f32 %v1370_v61, %v1362_v31  ;;  %v3406_v22 = vadd.f32 %v1382_v5, %v1374_v28  ;;  %v3411_v13 = vadd.f32 %v589_v33, %v580_v50  ;;  %v1406_v14 = vstv %s3392_s19  ;;  %v762_v61 = vld [vmem:[#allocation2 + $0x28] sm:$0x3]  ;;  %s2385_s19 = sld [smem:[#allocation8 + $0x184]]  ;;  %s2388_s29 = sld [smem:[#allocation8 + $0x187]] }
 0x12f   : > { %v645_v35 = vmul.f32 %v644_v60, %v3202_v57  ;;  %v646_v41 = vmul.f32 %v644_v60, %v3204_v58  ;;  %v665_v31 = vstv %s2341_s7  ;;  %s2386_s7 = sld [smem:[#allocation8 + $0x185]] }
 0x130   : > { %v3404_v21 = vadd.f32 %v1381_v52, %v1373_v38  ;;  %v1394_v8 = vmul.f32 %v1392_v56, %v3406_v22  ;;  %v647_v62 = vmul.f32 %v644_v60, %v3411_v13  ;;  %v1408_v52 = vmul.f32 %v1406_v14, %v3406_v22 }
 0x131   : > { %v651_v23 = vrot.slane %v645_v35, 1  ;;  %v652_v24 = vrot.slane %v646_v41, 1  ;;  %v666_v50 = vmul.f32 %v665_v31, %v3202_v57  ;;  %v667_v38 = vmul.f32 %v665_v31, %v3204_v58 }
 0x132   : > { %1201 = vrot.lane.b32.xlu1 %v1196_v3, %s4322_s18  ;;  %1199 = vrot.lane.b32.xlu0 %v1195_v4, %s4322_s18  ;;  %v1393_v26 = vmul.f32 %v1392_v56, %v3404_v21  ;;  %v1407_v5 = vmul.f32 %v1406_v14, %v3404_v21  ;;  %v759_v3 = vmul.f32 %v3101_v63, %v754_v36  ;;  %v654_v28 = vrot.slane %v647_v62, 1 }
 0x133   : > { %v767_v4 = vmul.f32 %v3104_v0, %v762_v61  ;;  %v668_v33 = vmul.f32 %v665_v31, %v3411_v13  ;;  %v705_v63 = vmul.f32 %v704_v51, %v3202_v57  ;;  %v653_v56 = vsel %vm633_vm6, %v651_v23, %v652_v24  ;;  %v1348_v61 = vld [vmem:[#allocation2 + $0x10] sm:$0x3] }
 0x134   : > { %v672_v60 = vrot.slane %v666_v50, 1  ;;  %v673_v14 = vrot.slane %v667_v38, 1  ;;  %v707_v41 = vmul.f32 %v704_v51, %v3411_v13 }
 0x135   : > { %v770_v0 = vadd.f32 %v767_v4, %v759_v3  ;;  %v675_v35 = vrot.slane %v668_v33, 1  ;;  %v711_v4 = vrot.slane %v705_v63, 2  ;;  %v1353_v33 = vmul.f32 %v3353_v49, %v1348_v61 }
 0x136   : > { %1215 = vrot.lane.b32.xlu1 %v1210_v48, %s4320_s12  ;;  %1213 = vrot.lane.b32.xlu0 %v1209_v39, %s4320_s12  ;;  %v778_v48 = vmul.f32 %v3181_v47, %v773_v32  ;;  %v725_v39 = vstv %s2344_s0  ;;  %v655_v47 = vsel %vm633_vm6, %v652_v24, %v654_v28  ;;  %v843_v32 = vstv %s3425_s30  ;;  %v1367_v24 = vld [vmem:[#allocation2 + $0x40] sm:$0x3]  ;;  %s2389_s0 = sld [smem:[#allocation8 + $0x188]]  ;;  %s2401_s30 = sld [smem:[#allocation8 + $0x204]] }
 0x137   : > { %v726_v62 = vmul.f32 %v725_v39, %v3202_v57  ;;  %v727_v31 = vmul.f32 %v725_v39, %v3204_v58  ;;  %v674_v3 = vsel %vm633_vm6, %v672_v60, %v673_v14  ;;  %v728_v23 = vmul.f32 %v725_v39, %v3411_v13 }
 0x138   : > { %v781_v36 = vadd.f32 %v778_v48, %v770_v0  ;;  %v676_v50 = vsel %vm633_vm6, %v673_v14, %v675_v35  ;;  %v714_v38 = vrot.slane %v707_v41, 2  ;;  %v844_v39 = vmul.f32 %v843_v32, %v3265_v44  ;;  %v952_v14 = vld [vmem:[#allocation2 + $0x10] sm:$0x3] }
 0x139   : > { %v732_v48 = vrot.slane %v726_v62, 2  ;;  %v733_v63 = vrot.slane %v727_v31, 2  ;;  %v1372_v0 = vmul.f32 %v3359_v7, %v1367_v24  ;;  %v845_v60 = vmul.f32 %v843_v32, %v3267_v45  ;;  %v971_v7 = vld [vmem:[#allocation2 + $0x40] sm:$0x3] }
 0x13a   : > { %1399 = vrot.lane.b32.xlu1 %v1394_v8, %s4322_s18  ;;  %1397 = vrot.lane.b32.xlu0 %v1393_v26, %s4322_s18  ;;  %v706_v8 = vmul.f32 %v704_v51, %v3204_v58  ;;  %v784_v26 = vld [vmem:[#allocation2 + $0x58] sm:$0x3]  ;;  %v864_v49 = vstv %s3438_s10  ;;  %v735_v35 = vrot.slane %v728_v23, 2  ;;  %s2402_s10 = sld [smem:[#allocation8 + $0x205]] }
 0x13b   : > { %v734_v31 = vsel %vm693_vm7, %v732_v48, %v733_v63 }
 0x13c   : > { %v712_v51 = vrot.slane %v706_v8, 2  ;;  %v960_v8 = vld [vmem:[#allocation2 + $0x28] sm:$0x3]  ;;  %v736_v24 = vsel %vm693_vm7, %v733_v63, %v735_v35  ;;  %v982_v63 = vld [vmem:[#allocation2 + $0x58] sm:$0x3] }
 0x13e   : > { %1413 = vrot.lane.b32.xlu1 %v1408_v52, %s4320_s12  ;;  %1411 = vrot.lane.b32.xlu0 %v1407_v5, %s4320_s12  ;;  %v789_v52 = vmul.f32 %v3199_v55, %v784_v26  ;;  %v1356_v5 = vld [vmem:[#allocation2 + $0x28] sm:$0x3] }
 0x13f   : > { %v1361_v55 = vmul.f32 %v3344_v12, %v1356_v5  ;;  %v715_v12 = vsel %vm693_vm7, %v712_v51, %v714_v38  ;;  %v957_v5 = vmul.f32 %v3250_v27, %v952_v14  ;;  %v976_v38 = vmul.f32 %v3261_v43, %v971_v7 }
 0x140   : > { %v3453_v28 = vadd.f32 %v789_v52, %v781_v36  ;;  %v902_v36 = vstv %s3444_s11  ;;  %v850_v52 = vrot.slane %v844_v39, 1  ;;  %v923_v27 = vstv %s3460_s13  ;;  %s2404_s11 = sld [smem:[#allocation8 + $0x207]]  ;;  %s2414_s13 = sld [smem:[#allocation8 + $0x281]] }
 0x141   : > { %v1364_v26 = vadd.f32 %v1361_v55, %v1353_v33  ;;  %v924_v35 = vmul.f32 %v923_v27, %v3265_v44 }
 0x142   : > { %656 = vrot.lane.b32.xlu0 %v653_v56, %s4322_s18  ;;  %658 = vrot.lane.b32.xlu1 %v655_v47, %s4322_s18  ;;  %v1378_v56 = vld [vmem:[#allocation2 + $0x58] sm:$0x3]  ;;  %v713_v47 = vsel %vm693_vm7, %v711_v4, %v712_v51  ;;  %v846_v41 = vmul.f32 %v843_v32, %v3453_v28  ;;  %v851_v4 = vrot.slane %v845_v60, 1  ;;  %v865_v32 = vmul.f32 %v864_v49, %v3265_v44 }
 0x143   : > { %v1375_v61 = vadd.f32 %v1372_v0, %v1364_v26  ;;  %v1383_v62 = vmul.f32 %v3362_v53, %v1378_v56  ;;  %v866_v51 = vmul.f32 %v864_v49, %v3267_v45  ;;  %v867_v53 = vmul.f32 %v864_v49, %v3453_v28 }
 0x144   : > { %v852_v55 = vsel %vm633_vm6, %v850_v52, %v851_v4  ;;  %v871_v48 = vrot.slane %v865_v32, 1  ;;  %v904_v0 = vmul.f32 %v902_v36, %v3267_v45  ;;  %v905_v43 = vmul.f32 %v902_v36, %v3453_v28  ;;  %v1158_v32 = vld [vmem:[#allocation2 + $0x28] sm:$0x3] }
 0x145   : > { %v3477_v23 = vadd.f32 %v1383_v62, %v1375_v61  ;;  %v872_v39 = vrot.slane %v866_v51, 1  ;;  %v874_v60 = vrot.slane %v867_v53, 1  ;;  %v987_v26 = vmul.f32 %v3276_v54, %v982_v63 }
 0x146   : > { %677 = vrot.lane.b32.xlu0 %v674_v3, %s4320_s12  ;;  %679 = vrot.lane.b32.xlu1 %v676_v50, %s4320_s12  ;;  %v965_v3 = vmul.f32 %v3107_v1, %v960_v8  ;;  %v853_v50 = vrot.slane %v846_v41, 1  ;;  %v903_v1 = vmul.f32 %v902_v36, %v3265_v44  ;;  %v1041_v8 = vstv %s2369_s28  ;;  %s3587_s28 = sld [smem:[#allocation8 + $0x301]] }
 0x147   : > { %v925_v41 = vmul.f32 %v923_v27, %v3267_v45  ;;  %v875_v7 = vsel %vm633_vm6, %v872_v39, %v874_v60  ;;  %v912_v36 = vrot.slane %v905_v43, 2  ;;  %v926_v61 = vmul.f32 %v923_v27, %v3453_v28 }
 0x148   : > { %v968_v33 = vadd.f32 %v965_v3, %v957_v5  ;;  %v854_v56 = vsel %vm633_vm6, %v851_v4, %v853_v50  ;;  %v909_v14 = vrot.slane %v903_v1, 2  ;;  %v1042_v54 = vmul.f32 %v1041_v8, %v3321_v42  ;;  %v1150_v4 = vld [vmem:[#allocation2 + $0x10] sm:$0x3] }
 0x149   : > { %v930_v52 = vrot.slane %v924_v35, 2  ;;  %v931_v5 = vrot.slane %v925_v41, 2  ;;  %v1062_v3 = vstv %s2370_s17  ;;  %v933_v50 = vrot.slane %v926_v61, 2  ;;  %v1180_v35 = vld [vmem:[#allocation2 + $0x58] sm:$0x3]  ;;  %s3593_s17 = sld [smem:[#allocation8]] }
 0x14a   : > { %716 = vrot.lane.b32.xlu0 %v713_v47, %s4322_s18  ;;  %718 = vrot.lane.b32.xlu1 %v715_v12, %s4322_s18  ;;  %v979_v49 = vadd.f32 %v976_v38, %v968_v33  ;;  %v873_v47 = vsel %vm633_vm6, %v871_v48, %v872_v39  ;;  %v910_v12 = vrot.slane %v904_v0, 2  ;;  %v1169_v38 = vld [vmem:[#allocation2 + $0x40] sm:$0x3]  ;;  %v1048_v1 = vrot.slane %v1042_v54, 1 }
 0x14b   : > { %v1155_v33 = vmul.f32 %v3306_v25, %v1150_v4  ;;  %v932_v48 = vsel %vm693_vm7, %v930_v52, %v931_v5  ;;  %v1063_v39 = vmul.f32 %v1062_v3, %v3321_v42  ;;  %v1064_v0 = vmul.f32 %v1062_v3, %v3323_v46 }
 0x14c   : > { %v3498_v62 = vadd.f32 %v987_v26, %v979_v49  ;;  %v911_v51 = vsel %vm693_vm7, %v909_v14, %v910_v12  ;;  %v1100_v63 = vstv %s2372_s27  ;;  %v1174_v49 = vmul.f32 %v3319_v40, %v1169_v38  ;;  %s3595_s27 = sld [smem:[#allocation8 + $0x381]] }
 0x14d   : > { %v1121_v25 = vstv %s2373_s16  ;;  %v1070_v26 = vrot.slane %v1064_v0, 1  ;;  %v1239_v54 = vstv %s2385_s19  ;;  %v1298_v0 = vstv %s2388_s29  ;;  %s3599_s16 = sld [smem:[#allocation8 + $0x80]]  ;;  %s3601_s19 = sld [smem:[#allocation8 + $0x282]] }
 0x14e   : > { %737 = vrot.lane.b32.xlu0 %v734_v31, %s4320_s12  ;;  %739 = vrot.lane.b32.xlu1 %v736_v24, %s4320_s12  ;;  %4376 = vst [vmem:[#allocation28_spill] sm:$0xff] %v3498_v62  ;;  %v1043_v31 = vmul.f32 %v1041_v8, %v3323_v46  ;;  %v913_v24 = vsel %vm693_vm7, %v910_v12, %v912_v36  ;;  %s3605_s29 = sld [smem:[#allocation8 + $0x302]] }
 0x14f   : > { %v1044_v53 = vmul.f32 %v1041_v8, %v3498_v62  ;;  %v1065_v43 = vmul.f32 %v1062_v3, %v3498_v62  ;;  %v1069_v8 = vrot.slane %v1063_v39, 1  ;;  %v1102_v12 = vmul.f32 %v1100_v63, %v3323_v46 }
 0x150   : > { %v1049_v27 = vrot.slane %v1043_v31, 1  ;;  %v1103_v40 = vmul.f32 %v1100_v63, %v3498_v62  ;;  %v1122_v61 = vmul.f32 %v1121_v25, %v3321_v42  ;;  %v1185_v31 = vmul.f32 %v3332_v59, %v1180_v35 }
 0x151   : > { %v1051_v60 = vrot.slane %v1044_v53, 1  ;;  %v1071_v52 = vsel %vm633_vm6, %v1069_v8, %v1070_v26  ;;  %v1108_v3 = vrot.slane %v1102_v12, 2  ;;  %v1123_v4 = vmul.f32 %v1121_v25, %v3323_v46 }
 0x152   : > { %855 = vrot.lane.b32.xlu0 %v852_v55, %s4322_s18  ;;  %857 = vrot.lane.b32.xlu1 %v854_v56, %s4322_s18  ;;  %v1163_v55 = vmul.f32 %v3290_v9, %v1158_v32  ;;  %v934_v56 = vsel %vm693_vm7, %v931_v5, %v933_v50  ;;  %v1050_v9 = vsel %vm633_vm6, %v1048_v1, %v1049_v27  ;;  %v1260_v53 = vstv %s2386_s7  ;;  %s3603_s7 = sld [smem:[#allocation8 + $0x100]] }
 0x153   : > { %v1052_v41 = vsel %vm633_vm6, %v1049_v27, %v1051_v60  ;;  %v1128_v59 = vrot.slane %v1122_v61, 2  ;;  %v1129_v38 = vrot.slane %v1123_v4, 2  ;;  %v1240_v1 = vmul.f32 %v1239_v54, %v3372_v10 }
 0x154   : > { %v1166_v14 = vadd.f32 %v1163_v55, %v1155_v33  ;;  %v1241_v27 = vmul.f32 %v1239_v54, %v3374_v11  ;;  %v1261_v60 = vmul.f32 %v1260_v53, %v3372_v10  ;;  %v1319_v8 = vstv %s2389_s0  ;;  %s3613_s0 = sld [smem:[#allocation8 + $0x382]] }
 0x155   : > { %v1299_v35 = vmul.f32 %v1298_v0, %v3372_v10  ;;  %v1437_v61 = vstv %s2401_s30  ;;  %s3616_s30 = sld [smem:[#allocation8 + $0x284]] }
 0x156   : > { %876 = vrot.lane.b32.xlu0 %v873_v47, %s4320_s12  ;;  %878 = vrot.lane.b32.xlu1 %v875_v7, %s4320_s12  ;;  %v1101_v47 = vmul.f32 %v1100_v63, %v3321_v42  ;;  %v1072_v7 = vrot.slane %v1065_v43, 1  ;;  %v1177_v36 = vadd.f32 %v1174_v49, %v1166_v14  ;;  %v1246_v63 = vrot.slane %v1240_v1, 1 }
 0x157   : > { %v1262_v43 = vmul.f32 %v1260_v53, %v3374_v11  ;;  %v1130_v49 = vsel %vm693_vm7, %v1128_v59, %v1129_v38  ;;  %v1439_v1 = vmul.f32 %v1437_v61, %v3406_v22 }
 0x158   : > { %v1107_v5 = vrot.slane %v1101_v47, 2  ;;  %v1073_v32 = vsel %vm633_vm6, %v1070_v26, %v1072_v7  ;;  %v3532_v50 = vadd.f32 %v1185_v31, %v1177_v36  ;;  %v1267_v47 = vrot.slane %v1261_v60, 1 }
 0x159   : > { %v1268_v12 = vrot.slane %v1262_v43, 1  ;;  %v1305_v31 = vrot.slane %v1299_v35, 2 }
 0x15a   : > { %914 = vrot.lane.b32.xlu0 %v911_v51, %s4322_s18  ;;  %916 = vrot.lane.b32.xlu1 %v913_v24, %s4322_s18  ;;  %v1110_v51 = vrot.slane %v1103_v40, 2  ;;  %v1124_v24 = vmul.f32 %v1121_v25, %v3498_v62  ;;  %4377 = vst [vmem:[#allocation29_spill] sm:$0xff] %v3532_v50  ;;  %v1109_v33 = vsel %vm693_vm7, %v1107_v5, %v1108_v3 }
 0x15b   : > { %v1242_v39 = vmul.f32 %v1239_v54, %v3532_v50  ;;  %v1263_v14 = vmul.f32 %v1260_v53, %v3532_v50  ;;  %v1300_v40 = vmul.f32 %v1298_v0, %v3374_v11  ;;  %v1301_v36 = vmul.f32 %v1298_v0, %v3532_v50 }
 0x15c   : > { %v1111_v55 = vsel %vm693_vm7, %v1108_v3, %v1110_v51  ;;  %v1269_v54 = vsel %vm633_vm6, %v1267_v47, %v1268_v12  ;;  %v1321_v5 = vmul.f32 %v1319_v8, %v3374_v11  ;;  %v1322_v51 = vmul.f32 %v1319_v8, %v3532_v50 }
 0x15d   : > { %v1249_v25 = vrot.slane %v1242_v39, 1  ;;  %v1270_v7 = vrot.slane %v1263_v14, 1  ;;  %v1306_v4 = vrot.slane %v1300_v40, 2  ;;  %v1496_v39 = vstv %s2404_s11  ;;  %s3622_s11 = sld [smem:[#allocation8 + $0x200]] }
 0x15e   : > { %935 = vrot.lane.b32.xlu0 %v932_v48, %s4320_s12  ;;  %937 = vrot.lane.b32.xlu1 %v934_v56, %s4320_s12  ;;  %v1131_v48 = vrot.slane %v1124_v24, 2  ;;  %v1247_v56 = vrot.slane %v1241_v27, 1  ;;  %v1458_v24 = vstv %s2402_s10  ;;  %v1327_v59 = vrot.slane %v1321_v5, 2  ;;  %s3618_s10 = sld [smem:[#allocation8 + $0x304]] }
 0x15f   : > { %v1271_v3 = vsel %vm633_vm6, %v1268_v12, %v1270_v7  ;;  %v1307_v27 = vsel %vm693_vm7, %v1305_v31, %v1306_v4  ;;  %v1459_v60 = vmul.f32 %v1458_v24, %v3404_v21  ;;  %v1498_v47 = vmul.f32 %v1496_v39, %v3406_v22 }
 0x160   : > { %v1248_v26 = vsel %vm633_vm6, %v1246_v63, %v1247_v56  ;;  %v1499_v7 = vmul.f32 %v1496_v39, %v3477_v23 }
 0x162   : > { %1053 = vrot.lane.b32.xlu0 %v1050_v9, %s4322_s18  ;;  %1055 = vrot.lane.b32.xlu1 %v1052_v41, %s4322_s18  ;;  %v1132_v9 = vsel %vm693_vm7, %v1129_v38, %v1131_v48  ;;  %v1250_v41 = vsel %vm633_vm6, %v1247_v56, %v1249_v25  ;;  %v1438_v38 = vmul.f32 %v1437_v61, %v3404_v21  ;;  %v1445_v56 = vrot.slane %v1439_v1, 1  ;;  %v1565_v1 = vld [vmem:[#allocation2 + $0x40] sm:$0x3] }
 0x163   : > { %v1440_v48 = vmul.f32 %v1437_v61, %v3477_v23  ;;  %v1461_v25 = vmul.f32 %v1458_v24, %v3477_v23  ;;  %v1506_v31 = vrot.slane %v1499_v7, 2  ;;  %v1950_v7 = vld [vmem:[#allocation2 + $0x28] sm:$0x3] }
 0x164   : > { %v1444_v63 = vrot.slane %v1438_v38, 1  ;;  %v1788_v38 = vstv %s3587_s28  ;;  %s3628_s28 = sld [smem:[#allocation8 + $0x285]] }
 0x166   : > { %1074 = vrot.lane.b32.xlu0 %v1071_v52, %s4320_s12  ;;  %1076 = vrot.lane.b32.xlu1 %v1073_v32, %s4320_s12  ;;  %v1320_v52 = vmul.f32 %v1319_v8, %v3372_v10  ;;  %v1308_v32 = vrot.slane %v1301_v36, 2  ;;  %v1446_v14 = vsel %vm633_vm6, %v1444_v63, %v1445_v56  ;;  %v1465_v8 = vrot.slane %v1459_v60, 1  ;;  %v1763_v60 = vld [vmem:[#allocation2 + $0x40] sm:$0x3] }
 0x167   : > { %v1789_v63 = vmul.f32 %v1788_v38, %v3232_v17 }
 0x168   : > { %v1326_v53 = vrot.slane %v1320_v52, 2 }
 0x16a   : > { %1112 = vrot.lane.b32.xlu0 %v1109_v33, %s4322_s18  ;;  %1114 = vrot.lane.b32.xlu1 %v1111_v55, %s4322_s18  ;;  %v1309_v33 = vsel %vm693_vm7, %v1306_v4, %v1308_v32  ;;  %v1329_v55 = vrot.slane %v1322_v51, 2  ;;  %v1328_v0 = vsel %vm693_vm7, %v1326_v53, %v1327_v59  ;;  %v1546_v53 = vld [vmem:[#allocation2 + $0x10] sm:$0x3] }
 0x16c   : > { %v1330_v43 = vsel %vm693_vm7, %v1327_v59, %v1329_v55  ;;  %v1554_v59 = vld [vmem:[#allocation2 + $0x28] sm:$0x3]  ;;  %v1744_v55 = vld [vmem:[#allocation2 + $0x10] sm:$0x3] }
 0x16e   : > { %1133 = vrot.lane.b32.xlu0 %v1130_v49, %s4320_s12  ;;  %1135 = vrot.lane.b32.xlu1 %v1132_v9, %s4320_s12  ;;  %v1447_v49 = vrot.slane %v1440_v48, 1  ;;  %v1460_v9 = vmul.f32 %v1458_v24, %v3406_v22  ;;  %v1752_v48 = vld [vmem:[#allocation2 + $0x28] sm:$0x3] }
 0x170   : > { %v1448_v12 = vsel %vm633_vm6, %v1445_v56, %v1447_v49  ;;  %v1466_v35 = vrot.slane %v1460_v9, 1  ;;  %v1790_v56 = vmul.f32 %v1788_v38, %v3234_v18  ;;  %v1757_v49 = vmul.f32 %v3058_v37, %v1752_v48 }
 0x172   : > { %1251 = vrot.lane.b32.xlu0 %v1248_v26, %s4322_s18  ;;  %1253 = vrot.lane.b32.xlu1 %v1250_v41, %s4322_s18  ;;  %v1497_v26 = vmul.f32 %v1496_v39, %v3404_v21  ;;  %v1468_v41 = vrot.slane %v1461_v25, 1  ;;  %v1467_v36 = vsel %vm633_vm6, %v1465_v8, %v1466_v35  ;;  %v1604_v25 = vstv %s3601_s19  ;;  %s3676_s19 = sld [smem:[#allocation8 + $0x208]] }
 0x173   : > { %v1605_v48 = vmul.f32 %v1604_v25, %v3226_v15 }
 0x174   : > { %v1503_v40 = vrot.slane %v1497_v26, 2  ;;  %v1469_v61 = vsel %vm633_vm6, %v1466_v35, %v1468_v41  ;;  %v1768_v35 = vmul.f32 %v3124_v6, %v1763_v60  ;;  %v1942_v41 = vld [vmem:[#allocation2 + $0x10] sm:$0x3]  ;;  %v4380_v6 = vld [vmem:[#allocation21_spill] sm:$0xff] }
 0x175   : > { %v4385_v60 = vld [vmem:[#allocation20_spill] sm:$0xff] }
 0x176   : > { %1272 = vrot.lane.b32.xlu0 %v1269_v54, %s4320_s12  ;;  %1274 = vrot.lane.b32.xlu1 %v1271_v3, %s4320_s12  ;;  %v1504_v54 = vrot.slane %v1498_v47, 2  ;;  %v1590_v3 = vstv %s2414_s13  ;;  %s3624_s13 = sld [smem:[#allocation8 + $0x384]]  ;;  %v4390_v47 = vld [vmem:[#allocation23_spill] sm:$0xff] }
 0x177   : > { %v1591_v51 = vmul.f32 %v1590_v3, %v3226_v15  ;;  %v1592_v24 = vmul.f32 %v1590_v3, %v3228_v16  ;;  %v1961_v3 = vld [vmem:[#allocation2 + $0x40] sm:$0x3] }
 0x178   : > { %v1505_v52 = vsel %vm693_vm7, %v1503_v40, %v1504_v54  ;;  %v1507_v5 = vsel %vm693_vm7, %v1504_v54, %v1506_v31  ;;  %v1802_v40 = vstv %s3605_s29  ;;  %v1833_v31 = vstv %s3618_s10  ;;  %s3686_s29 = sld [smem:[#allocation8 + $0x288]]  ;;  %s2390_s10 = sld [smem:[#allocation10 + $0x3]] }
 0x17a   : > { %1310 = vrot.lane.b32.xlu0 %v1307_v27, %s4322_s18  ;;  %1312 = vrot.lane.b32.xlu1 %v1309_v33, %s4322_s18  ;;  %v1551_v27 = vmul.f32 %v3032_v29, %v1546_v53  ;;  %v1559_v33 = vmul.f32 %v3048_v34, %v1554_v59  ;;  %v1986_v29 = vstv %s3595_s27  ;;  %v1570_v34 = vmul.f32 %v3112_v2, %v1565_v1  ;;  %s3657_s27 = sld [smem:[#allocation8 + $0x83]]  ;;  %v4381_v59 = vld [vmem:[#allocation18_spill] sm:$0xff]  ;;  %v4382_v1 = vld [vmem:[#allocation19_spill] sm:$0xff] }
 0x17b   : > { %v594_v2 = vstv %s3593_s17  ;;  %v1987_v37 = vmul.f32 %v1986_v29, %v3236_v19  ;;  %v1988_v26 = vmul.f32 %v1986_v29, %v3238_v20  ;;  %v1947_v38 = vmul.f32 %v4381_v59, %v1942_v41  ;;  %v1972_v59 = vld [vmem:[#allocation2 + $0x58] sm:$0x3]  ;;  %s4005_s17 = sld [smem:[#allocation8 + $0x180]] }
 0x17c   : > { %v3682_v53 = vstv %s3624_s13  ;;  %v1656_v29 = vstv %s3628_s28  ;;  %v3711_v41 = vstv %s3644_s2  ;;  %s3830_s2 = sld [smem:[#allocation10]]  ;;  %s2416_s13 = sld [smem:[#allocation8 + $0x283]] }
 0x17d   : > { %s2413_s28 = sld [smem:[#allocation8 + $0x280]] }
 0x17e   : > { %1331 = vrot.lane.b32.xlu0 %v1328_v0, %s4320_s12  ;;  %1333 = vrot.lane.b32.xlu1 %v1330_v43, %s4320_s12  ;;  %v1749_v43 = vmul.f32 %v3034_v30, %v1744_v55 }
 0x182   : > { %1449 = vrot.lane.b32.xlu0 %v1446_v14, %s4322_s18  ;;  %1451 = vrot.lane.b32.xlu1 %v1448_v12, %s4322_s18  ;;  %v1562_v14 = vadd.f32 %v1559_v33, %v1551_v27  ;;  %v1576_v12 = vld [vmem:[#allocation2 + $0x58] sm:$0x3]  ;;  %v1955_v27 = vmul.f32 %v4382_v1, %v1950_v7  ;;  %v3717_v7 = vstv %s3652_s5  ;;  %s3924_s5 = sld [smem:[#allocation8 + $0x388]] }
 0x184   : > { %v1573_v54 = vadd.f32 %v1570_v34, %v1562_v14 }
 0x186   : > { %1470 = vrot.lane.b32.xlu0 %v1467_v36, %s4320_s12  ;;  %1472 = vrot.lane.b32.xlu1 %v1469_v61, %s4320_s12  ;;  %s3636_s12 = sld [smem:[#allocation8 + $0x3]]  ;;  %v2000_v36 = vstv %s3613_s0  ;;  %v1635_v61 = vstv %s3616_s30  ;;  %s4386_s30 = smov 126  }
 0x187   : > { %s3688_s0 = sld [smem:[#allocation8 + $0x203]]  ;;  %v1636_v1 = vmul.f32 %v1635_v61, %v3226_v15  ;;  %v2001_v9 = vmul.f32 %v2000_v36, %v3236_v19  ;;  %v2002_v10 = vmul.f32 %v2000_v36, %v3238_v20  ;;  %v2033_v36 = vmul.f32 %v3682_v53, %v3238_v20 }
 0x18a   : > { %1508 = vrot.lane.b32.xlu0 %v1505_v52, %s4322_s18  ;;  %1510 = vrot.lane.b32.xlu1 %v1507_v5, %s4322_s18  ;;  %v1760_v52 = vadd.f32 %v1757_v49, %v1749_v43  ;;  %v1966_v43 = vmul.f32 %v4385_v60, %v1961_v3  ;;  %v3741_v60 = vstv %s3676_s19  ;;  %v1977_v5 = vmul.f32 %v4390_v47, %v1972_v59  ;;  %s2432_s19 = sld [smem:[#allocation8 + $0x303]] }
 0x18b   : > { %v1642_v47 = vrot.slane %v1636_v1, 1  ;;  %v4394_v1 = vstv %s3599_s16  ;;  %s2387_s16 = sld [smem:[#allocation8 + $0x186]] }
 0x18c   : > { %v3607_v4 = vpop.permute.xlu1 %605  ;;  %v3609_v32 = vpop.permute.xlu0 %603  ;;  %v626_v49 = vstv %s3636_s12  ;;  %v4397_v42 = vmov %v4394_v1  ;;  %s3961_s12 = sld [smem:[#allocation10 + $0x1]] }
 0x18d   : > { %v3798_v62 = vmul.f32 %v4397_v42, %v3265_v44 }
 0x18e   : > { %1595 = vrot.lane.b32.xlu0 %v1591_v51, %s4322_s18  ;;  %1597 = vrot.lane.b32.xlu1 %v1592_v24, %s4322_s18  ;;  %s3638_s18 = sld [smem:[#allocation8 + $0x305]]  ;;  %v1581_v51 = vmul.f32 %v4380_v6, %v1576_v12  ;;  %v1774_v24 = vld [vmem:[#allocation2 + $0x58] sm:$0x3]  ;;  %v3708_v12 = vstv %s3642_s1  ;;  %v1803_v6 = vmul.f32 %v1802_v40, %v3232_v17  ;;  %s3778_s1 = sld [smem:[#allocation8 + $0x308]] }
 0x18f   : > { %4398 = vst [vmem:[#allocation34_spill] sm:$0xff] %v3798_v62 }
 0x190   : > { %v3630_v39 = vpop.permute.xlu1 %619  ;;  %v3632_v0 = vpop.permute.xlu0 %617  ;;  %v3697_v34 = vadd.f32 %v1581_v51, %v1573_v54  ;;  %v3720_v54 = vstv %s3657_s27  ;;  %v1804_v51 = vmul.f32 %v1802_v40, %v3234_v18  ;;  %v1834_v40 = vmul.f32 %v1833_v31, %v3232_v17  ;;  %s2429_s27 = sld [smem:[#allocation8 + $0x300]] }
 0x192   : > { %1793 = vrot.lane.b32.xlu0 %v1789_v63, %s4378_s3  ;;  %1795 = vrot.lane.b32.xlu1 %v1790_v56, %s4378_s3  ;;  %v1606_v63 = vmul.f32 %v1604_v25, %v3228_v16  ;;  %v1771_v56 = vadd.f32 %v1768_v35, %v1760_v52  ;;  %v1958_v25 = vadd.f32 %v1955_v27, %v1947_v38  ;;  %v3714_v35 = vstv %s3650_s4  ;;  %s3922_s4 = sld [smem:[#allocation8 + $0x103]] }
 0x193   : > { %v3731_v38 = vstv %s3659_s14  ;;  %v1637_v27 = vmul.f32 %v1635_v61, %v3228_v16  ;;  %s3947_s14 = sld [smem:[#allocation8 + $0x106]] }
 0x194   : > { %v3661_v8 = vpop.permute.xlu1 %805  ;;  %v3663_v30 = vpop.permute.xlu0 %803  ;;  %v3702_v14 = vstv %s3638_s18 }
 0x195   : > { %4379 = vst [vmem:[#allocation30_spill] sm:$0xff] %v3663_v30  ;;  %v1643_v59 = vrot.slane %v1637_v27, 1  ;;  %v3787_v27 = vmul.f32 %v4394_v1, %v3267_v45 }
 0x196   : > { %1991 = vrot.lane.b32.xlu0 %v1987_v37, %s4378_s3  ;;  %1993 = vrot.lane.b32.xlu1 %v1988_v26, %s4378_s3  ;;  %v4387_v37 = vld [vmem:[#allocation22_spill] sm:$0xff] }
 0x197   : > { %v1779_v26 = vmul.f32 %v4387_v37, %v1774_v24  ;;  %v3744_v37 = vstv %s3678_s25  ;;  %s2323_s25 = sshll.u32 %s2945_s9, 7 }
 0x198   : > { %v3690_v33 = vpop.permute.xlu1 %819  ;;  %v3692_v55 = vpop.permute.xlu0 %817  ;;  %s3953_s18 = scalar_lea.vmem [#allocation11], %s2323_s25  ;;  %s4213_s25 = sld [smem:[#allocation10 + $0x6]] }
 0x199   : > { %4383 = vst [vmem:[#allocation21_spill] sm:$0xff] %v3690_v33  ;;  %4384 = vst [vmem:[#allocation18_spill] sm:$0xff] %v3692_v55  ;;  %v3728_v24 = vadd.f32 %v1779_v26, %v1771_v56  ;;  %v1835_v56 = vmul.f32 %v1833_v31, %v3234_v18  ;;  %v3749_v26 = vmul.f32 %v594_v2, %v3204_v58 }
 0x19a   : > { %1609 = vrot.lane.b32.xlu0 %v1605_v48, %s4386_s30  ;;  %1611 = vrot.lane.b32.xlu1 %v1606_v63, %s4386_s30  ;;  %v1638_v48 = vmul.f32 %v1635_v61, %v3697_v34  ;;  %v1969_v63 = vadd.f32 %v1966_v43, %v1958_v25  ;;  %v3753_v61 = vstv %s3686_s29  ;;  %v3756_v43 = vstv %s3688_s0  ;;  %s4110_s29 = sld [smem:[#allocation8 + $0x380]]  ;;  %s2448_s0 = sld [smem:[#allocation8 + $0x383]] }
 0x19b   : > { %4391 = vst [vmem:[#allocation22_spill] sm:$0xff] %v3753_v61  ;;  %v3761_v25 = vmul.f32 %v594_v2, %v3202_v57  ;;  %v1836_v50 = vmul.f32 %v1833_v31, %v3728_v24  ;;  %v1840_v2 = vrot.slane %v1834_v40, 1  ;;  %v1657_v31 = vmul.f32 %v1656_v29, %v3226_v15 }
 0x19c   : > { %v3722_v52 = vpop.permute.xlu1 %1003  ;;  %v3724_v3 = vpop.permute.xlu0 %1001  ;;  %v1645_v11 = vrot.slane %v1638_v48, 1  ;;  %v2039_v61 = vrot.slane %v2033_v36, 1  ;;  %v1857_v36 = vmul.f32 %v3702_v14, %v3728_v24 }
 0x19d   : > { %4388 = vst [vmem:[#allocation19_spill] sm:$0xff] %v3722_v52  ;;  %4389 = vst [vmem:[#allocation20_spill] sm:$0xff] %v3724_v3  ;;  %v3770_v3 = vadd.f32 %v1977_v5, %v1969_v63  ;;  %v1658_v5 = vmul.f32 %v1656_v29, %v3228_v16  ;;  %v1843_v40 = vrot.slane %v1836_v50, 1  ;;  %v627_v52 = vmul.f32 %v626_v49, %v3202_v57 }
 0x19e   : > { %1807 = vrot.lane.b32.xlu0 %v1803_v6, %s4386_s30  ;;  %1809 = vrot.lane.b32.xlu1 %v1804_v51, %s4386_s30  ;;  %v1646_v46 = vsel %vm633_vm6, %v1643_v59, %v1645_v11  ;;  %v1663_v42 = vrot.slane %v1657_v31, 1  ;;  %v2053_v31 = vmul.f32 %v3708_v12, %v3236_v19 }
 0x19f   : > { %v2034_v1 = vmul.f32 %v3682_v53, %v3770_v3  ;;  %v1664_v55 = vrot.slane %v1658_v5, 1  ;;  %v2054_v5 = vmul.f32 %v3708_v12, %v3238_v20 }
 0x1a0   : > { %v3763_v6 = vpop.permute.xlu1 %1017  ;;  %v3765_v51 = vpop.permute.xlu0 %1015  ;;  %v2059_v62 = vrot.slane %v2053_v31, 1  ;;  %v687_v31 = vmul.f32 %v3711_v41, %v3202_v57  ;;  %v1697_v57 = vmul.f32 %v3714_v35, %v3697_v34 }
 0x1a1   : > { %4392 = vst [vmem:[#allocation23_spill] sm:$0xff] %v3763_v6  ;;  %4393 = vst [vmem:[#allocation31_spill] sm:$0xff] %v3765_v51  ;;  %v1841_v6 = vrot.slane %v1835_v56, 1  ;;  %v2032_v51 = vmul.f32 %v3682_v53, %v3236_v19  ;;  %v628_v56 = vmul.f32 %v626_v49, %v3204_v58 }
 0x1a2   : > { %2005 = vrot.lane.b32.xlu0 %v2001_v9, %s4386_s30  ;;  %2007 = vrot.lane.b32.xlu1 %v2002_v10, %s4386_s30  ;;  %v1659_v9 = vmul.f32 %v1656_v29, %v3697_v34  ;;  %v629_v10 = vmul.f32 %v626_v49, %v3411_v13  ;;  %v1644_v29 = vsel %vm633_vm6, %v1642_v47, %v1643_v59 }
 0x1a3   : > { %v1842_v50 = vsel %vm633_vm6, %v1840_v2, %v1841_v6  ;;  %v1844_v59 = vsel %vm633_vm6, %v1841_v6, %v1843_v40  ;;  %v1855_v2 = vmul.f32 %v3702_v14, %v3232_v17  ;;  %v4402_v6 = vstv %s3622_s11 }
 0x1a4   : > { %v3789_v48 = vpop.permute.xlu1 %1201  ;;  %v3791_v63 = vpop.permute.xlu0 %1199  ;;  %v1666_v47 = vrot.slane %v1659_v9, 1  ;;  %v637_v33 = vrot.slane %v629_v10, 1  ;;  %v3833_v9 = vstv %s3778_s1  ;;  %v1665_v40 = vsel %vm633_vm6, %v1663_v42, %v1664_v55  ;;  %s4121_s1 = sld [smem:[#allocation8 + $0x306]] }
 0x1a5   : > { %4395 = vst [vmem:[#allocation32_spill] sm:$0xff] %v3789_v48  ;;  %4396 = vst [vmem:[#allocation33_spill] sm:$0xff] %v3791_v63  ;;  %v4399_v63 = vstv %s3622_s11  ;;  %v2038_v48 = vrot.slane %v2032_v51, 1  ;;  %v1856_v51 = vmul.f32 %v3702_v14, %v3234_v18  ;;  %v1423_v14 = vmul.f32 %v3756_v43, %v3477_v23  ;;  %s2403_s11 = sld [smem:[#allocation8 + $0x206]] }
 0x1a6   : > { %1647 = vrot.lane.b32.xlu0 %v1644_v29, %s4378_s3  ;;  %1649 = vrot.lane.b32.xlu1 %v1646_v46, %s4378_s3  ;;  %v1390_v49 = vmul.f32 %v4399_v63, %v3406_v22  ;;  %v635_v46 = vrot.slane %v628_v56, 1  ;;  %v634_v29 = vrot.slane %v627_v52, 1  ;;  %v2041_v63 = vrot.slane %v2034_v1, 1  ;;  %4403 = vst [vmem:[#allocation37_spill] sm:$0xff] %v3833_v9 }
 0x1a7   : > { %v1389_v52 = vmul.f32 %v4402_v6, %v3404_v21  ;;  %v2040_v10 = vsel %vm633_vm6, %v2038_v48, %v2039_v61  ;;  %v1667_v56 = vsel %vm633_vm6, %v1664_v55, %v1666_v47  ;;  %v3846_v9 = vmul.f32 %v3756_v43, %v3406_v22 }
 0x1a8   : > { %v3810_v11 = vpop.permute.xlu1 %1215  ;;  %v3812_v53 = vpop.permute.xlu0 %1213  ;;  %v638_v1 = vsel %vm633_vm6, %v635_v46, %v637_v33  ;;  %v636_v6 = vsel %vm633_vm6, %v634_v29, %v635_v46  ;;  %v2042_v48 = vsel %vm633_vm6, %v2039_v61, %v2041_v63  ;;  %v1862_v30 = vrot.slane %v1856_v51, 1 }
 0x1a9   : > { %4400 = vst [vmem:[#allocation35_spill] sm:$0xff] %v3810_v11  ;;  %4401 = vst [vmem:[#allocation36_spill] sm:$0xff] %v3812_v53  ;;  %v1861_v53 = vrot.slane %v1855_v2, 1  ;;  %v2055_v11 = vmul.f32 %v3708_v12, %v3770_v3  ;;  %v1864_v42 = vrot.slane %v1857_v36, 1  ;;  %v2060_v33 = vrot.slane %v2054_v5, 1 }
 0x1aa   : > { %1845 = vrot.lane.b32.xlu0 %v1842_v50, %s4378_s3  ;;  %1847 = vrot.lane.b32.xlu1 %v1844_v59, %s4378_s3  ;;  %v688_v55 = vmul.f32 %v3711_v41, %v3204_v58  ;;  %v689_v12 = vmul.f32 %v3711_v41, %v3411_v13  ;;  %v1430_v47 = vrot.slane %v1423_v14, 1  ;;  %v610_v46 = vadd.f32 %v3607_v4, %v3749_v26 }
 0x1ab   : > { %v609_v61 = vadd.f32 %v3609_v32, %v3761_v25  ;;  %v2062_v36 = vrot.slane %v2055_v11, 1  ;;  %v1695_v58 = vmul.f32 %v3714_v35, %v3226_v15  ;;  %v1428_v13 = vrot.slane %v3846_v9, 1 }
 0x1ac   : > { %v1400_v50 = vpop.permute.xlu1 %1399  ;;  %v1398_v59 = vpop.permute.xlu0 %1397  ;;  %v624_v5 = vadd.f32 %v3630_v39, %v610_v46  ;;  %v1696_v25 = vmul.f32 %v3714_v35, %v3228_v16  ;;  %v746_v41 = vstv %s3830_s2  ;;  %v1894_v11 = vmul.f32 %v3717_v7, %v3234_v18  ;;  %s4140_s2 = sld [smem:[#allocation8 + $0x386]] }
 0x1ad   : > { %v1404_v29 = vadd.f32 %v1400_v50, %v1390_v49  ;;  %v1403_v2 = vadd.f32 %v1398_v59, %v1389_v52  ;;  %v623_v4 = vadd.f32 %v3632_v0, %v609_v61  ;;  %v1431_v39 = vsel %vm633_vm6, %v1428_v13, %v1430_v47 }
 0x1ae   : > { %2043 = vrot.lane.b32.xlu0 %v2040_v10, %s4378_s3  ;;  %2045 = vrot.lane.b32.xlu1 %v2042_v48, %s4378_s3  ;;  %v1863_v0 = vsel %vm633_vm6, %v1861_v53, %v1862_v30  ;;  %v1893_v49 = vmul.f32 %v3717_v7, %v3232_v17  ;;  %v2061_v35 = vsel %vm633_vm6, %v2059_v62, %v2060_v33  ;;  %v697_v47 = vrot.slane %v689_v12, 2 }
 0x1af   : > { %v1895_v50 = vmul.f32 %v3717_v7, %v3728_v24  ;;  %v642_v59 = vadd.f32 %v638_v1, %v624_v5  ;;  %v641_v53 = vadd.f32 %v636_v6, %v623_v4  ;;  %v2063_v48 = vsel %vm633_vm6, %v2060_v33, %v2062_v36 }
 0x1b0   : > { %v1414_v63 = vpop.permute.xlu1 %1413  ;;  %v1412_v51 = vpop.permute.xlu0 %1411  ;;  %v694_v46 = vrot.slane %v687_v31, 2  ;;  %v1701_v61 = vrot.slane %v1695_v58, 2  ;;  %v1899_v62 = vrot.slane %v1893_v49, 2  ;;  %v828_v1 = vmul.f32 %v3720_v54, %v3267_v45 }
 0x1b1   : > { %v1418_v26 = vadd.f32 %v1414_v63, %v1404_v29  ;;  %v3866_v32 = vadd.f32 %v1412_v51, %v1403_v2  ;;  %v1702_v29 = vrot.slane %v1696_v25, 2  ;;  %v1704_v2 = vrot.slane %v1697_v57, 2 }
 0x1b2   : > { %1668 = vrot.lane.b32.xlu0 %v1665_v40, %s4386_s30  ;;  %1670 = vrot.lane.b32.xlu1 %v1667_v56, %s4386_s30  ;;  %v1865_v40 = vsel %vm633_vm6, %v1862_v30, %v1864_v42  ;;  %v695_v56 = vrot.slane %v688_v55, 2  ;;  %v1900_v55 = vrot.slane %v1894_v11, 2  ;;  %v1902_v7 = vrot.slane %v1895_v50, 2 }
 0x1b3   : > { %v3883_v52 = vadd.f32 %v1431_v39, %v1418_v26  ;;  %v829_v6 = vmul.f32 %v3720_v54, %v3453_v28  ;;  %v827_v33 = vmul.f32 %v3720_v54, %v3265_v44  ;;  %v2091_v31 = vmul.f32 %v3731_v38, %v3236_v19 }
 0x1b4   : > { %v659_v14 = vpop.permute.xlu1 %658  ;;  %v657_v10 = vpop.permute.xlu0 %656  ;;  %v2092_v58 = vmul.f32 %v3731_v38, %v3238_v20  ;;  %v698_v5 = vsel %vm693_vm7, %v695_v56, %v697_v47  ;;  %v696_v4 = vsel %vm693_vm7, %v694_v46, %v695_v56  ;;  %v2093_v54 = vmul.f32 %v3731_v38, %v3770_v3 }
 0x1b5   : > { %v663_v30 = vadd.f32 %v659_v14, %v642_v59  ;;  %v662_v42 = vadd.f32 %v657_v10, %v641_v53  ;;  %v1703_v57 = vsel %vm693_vm7, %v1701_v61, %v1702_v29  ;;  %v1705_v39 = vsel %vm693_vm7, %v1702_v29, %v1704_v2  ;;  %v4404_v61 = vld [vmem:[#allocation34_spill] sm:$0xff] }
 0x1b6   : > { %1866 = vrot.lane.b32.xlu0 %v1863_v0, %s4386_s30  ;;  %1868 = vrot.lane.b32.xlu1 %v1865_v40, %s4386_s30  ;;  %v1901_v11 = vsel %vm693_vm7, %v1899_v62, %v1900_v55  ;;  %v834_v14 = vrot.slane %v828_v1, 1  ;;  %v836_v10 = vrot.slane %v829_v6, 1  ;;  %v833_v40 = vrot.slane %v827_v33, 1  ;;  %v4405_v29 = vld [vmem:[#allocation30_spill] sm:$0xff] }
 0x1b7   : > { %v2097_v56 = vrot.slane %v2091_v31, 2  ;;  %v2098_v50 = vrot.slane %v2092_v58, 2  ;;  %v1518_v38 = vmul.f32 %v3741_v60, %v3404_v21  ;;  %v2100_v59 = vrot.slane %v2093_v54, 2 }
 0x1b8   : > { %v680_v63 = vpop.permute.xlu1 %679  ;;  %v678_v51 = vpop.permute.xlu0 %677  ;;  %v1519_v53 = vmul.f32 %v3741_v60, %v3406_v22  ;;  %v887_v47 = vmul.f32 %v3744_v37, %v3267_v45  ;;  %v810_v46 = vadd.f32 %v3661_v8, %v3787_v27  ;;  %v809_v2 = vadd.f32 %v4405_v29, %v4404_v61  ;;  %v4406_v27 = vld [vmem:[#allocation21_spill] sm:$0xff] }
 0x1b9   : > { %v684_v12 = vadd.f32 %v680_v63, %v663_v30  ;;  %v683_v36 = vadd.f32 %v678_v51, %v662_v42  ;;  %v835_v45 = vsel %vm633_vm6, %v833_v40, %v834_v14  ;;  %v888_v63 = vmul.f32 %v3744_v37, %v3453_v28 }
 0x1ba   : > { %2064 = vrot.lane.b32.xlu0 %v2061_v35, %s4386_s30  ;;  %2066 = vrot.lane.b32.xlu1 %v2063_v48, %s4386_s30  ;;  %v1903_v35 = vsel %vm693_vm7, %v1900_v55, %v1902_v7  ;;  %v1520_v48 = vmul.f32 %v3741_v60, %v3477_v23  ;;  %v837_v60 = vsel %vm633_vm6, %v834_v14, %v836_v10  ;;  %v4407_v7 = vld [vmem:[#allocation18_spill] sm:$0xff]  ;;  %v1524_v31 = vrot.slane %v1518_v38, 2  ;;  %v4409_v14 = vld [vmem:[#allocation37_spill] sm:$0xff] }
 0x1bb   : > { %v702_v26 = vadd.f32 %v698_v5, %v684_v12  ;;  %v701_v25 = vadd.f32 %v696_v4, %v683_v36  ;;  %v886_v8 = vmul.f32 %v3744_v37, %v3265_v44  ;;  %v824_v51 = vadd.f32 %v4406_v27, %v810_v46 }
 0x1bc   : > { %v719_v0 = vpop.permute.xlu1 %718  ;;  %v717_v49 = vpop.permute.xlu0 %716  ;;  %v823_v1 = vadd.f32 %v4407_v7, %v809_v2  ;;  %v2099_v12 = vsel %vm693_vm7, %v2097_v56, %v2098_v50  ;;  %v2101_v36 = vsel %vm693_vm7, %v2098_v50, %v2100_v59  ;;  %v1525_v58 = vrot.slane %v1519_v53, 2 }
 0x1bd   : > { %v723_v30 = vadd.f32 %v719_v0, %v702_v26  ;;  %v722_v42 = vadd.f32 %v717_v49, %v701_v25  ;;  %v1527_v37 = vrot.slane %v1520_v48, 2  ;;  %v893_v5 = vrot.slane %v887_v47, 2 }
 0x1be   : > { %1706 = vrot.lane.b32.xlu0 %v1703_v57, %s4378_s3  ;;  %1708 = vrot.lane.b32.xlu1 %v1705_v39, %s4378_s3  ;;  %v895_v26 = vrot.slane %v888_v63, 2  ;;  %v892_v25 = vrot.slane %v886_v8, 2  ;;  %v4408_v57 = vld [vmem:[#allocation22_spill] sm:$0xff]  ;;  %v840_v49 = vadd.f32 %v835_v45, %v823_v1  ;;  %v1914_v10 = vmul.f32 %v4409_v14, %v3232_v17  ;;  %v4410_v8 = vld [vmem:[#allocation25_spill] sm:$0xff] }
 0x1bf   : > { %v1716_v39 = vmul.f32 %v4408_v57, %v3226_v15  ;;  %v1717_v0 = vmul.f32 %v4408_v57, %v3228_v16  ;;  %v1915_v40 = vmul.f32 %v4409_v14, %v3234_v18  ;;  %v1024_v56 = vstv %s3922_s4  ;;  %s4178_s4 = sld [smem:[#allocation10 + $0x4]] }
 0x1c0   : > { %v740_v62 = vpop.permute.xlu1 %739  ;;  %v738_v55 = vpop.permute.xlu0 %737  ;;  %v2111_v50 = vstv %s3924_s5  ;;  %v1526_v53 = vsel %vm693_vm7, %v1524_v31, %v1525_v58  ;;  %v1528_v48 = vsel %vm693_vm7, %v1525_v58, %v1527_v37  ;;  %v896_v61 = vsel %vm693_vm7, %v893_v5, %v895_v26  ;;  %s4198_s5 = sld [smem:[#allocation10 + $0x5]] }
 0x1c1   : > { %v744_v6 = vadd.f32 %v740_v62, %v723_v30  ;;  %v743_v33 = vadd.f32 %v738_v55, %v722_v42  ;;  %v894_v29 = vsel %vm693_vm7, %v892_v25, %v893_v5  ;;  %v1722_v2 = vrot.slane %v1716_v39, 2 }
 0x1c2   : > { %1904 = vrot.lane.b32.xlu0 %v1901_v11, %s4378_s3  ;;  %1906 = vrot.lane.b32.xlu1 %v1903_v35, %s4378_s3  ;;  %v1718_v11 = vmul.f32 %v4408_v57, %v3697_v34  ;;  %v1916_v35 = vmul.f32 %v4409_v14, %v3728_v24  ;;  %v1723_v30 = vrot.slane %v1717_v0, 2  ;;  %v1921_v45 = vrot.slane %v1915_v40, 2  ;;  %v4415_v14 = vld [vmem:[#allocation19_spill] sm:$0xff]  ;;  %v4416_v40 = vld [vmem:[#allocation20_spill] sm:$0xff] }
 0x1c3   : > { %v748_v28 = vadd.f32 %v746_v41, %v744_v6  ;;  %v747_v44 = vadd.f32 %v746_v41, %v743_v33  ;;  %v841_v41 = vadd.f32 %v837_v60, %v824_v51  ;;  %v1920_v60 = vrot.slane %v1914_v10, 2  ;;  %v4411_v51 = vld [vmem:[#allocation28_spill] sm:$0xff] }
 0x1c4   : > { %v858_v4 = vpop.permute.xlu1 %857  ;;  %v856_v54 = vpop.permute.xlu0 %855  ;;  %v1725_v55 = vrot.slane %v1718_v11, 2  ;;  %v1923_v63 = vrot.slane %v1916_v35, 2  ;;  %v1026_v27 = vmul.f32 %v1024_v56, %v4410_v8  ;;  %v1027_v7 = vmul.f32 %v1024_v56, %v4411_v51 }
 0x1c5   : > { %751 = vst.msk [vmem:[%s3953_s18 + $0x8] sm:$0xff] %vm749_vm8, %v748_v28  ;;  %750 = vst.msk [vmem:[%s3953_s18] sm:$0xff] %vm749_vm8, %v747_v44  ;;  %v862_v38 = vadd.f32 %v858_v4, %v841_v41  ;;  %v861_v59 = vadd.f32 %v856_v54, %v840_v49  ;;  %v4412_v1 = vstv %s3603_s7  ;;  %v4413_v28 = vld [vmem:[#allocation24_spill] sm:$0xff]  ;;  %v2112_v37 = vmul.f32 %v2111_v50, %v3236_v19  ;;  %s4022_s7 = sld [smem:[#allocation10 + $0x2]] }
 0x1c6   : > { %2102 = vrot.lane.b32.xlu0 %v2099_v12, %s4378_s3  ;;  %2104 = vrot.lane.b32.xlu1 %v2101_v36, %s4378_s3  ;;  %v994_v6 = vmul.f32 %v4412_v1, %v4410_v8  ;;  %v1083_v36 = vstv %s3947_s14  ;;  %v1025_v44 = vmul.f32 %v1024_v56, %v4413_v28  ;;  %v2113_v5 = vmul.f32 %v2111_v50, %v3238_v20  ;;  %s4003_s3 = sld [smem:[#allocation8 + $0x183]]  ;;  %s4221_s14 = sld [smem:[#allocation10 + $0x7]] }
 0x1c7   : > { %v2114_v4 = vmul.f32 %v2111_v50, %v3770_v3  ;;  %v4414_v54 = vmov %v4412_v1  ;;  %v1724_v25 = vsel %vm693_vm7, %v1722_v2, %v1723_v30  ;;  %v1726_v57 = vsel %vm693_vm7, %v1723_v30, %v1725_v55  ;;  %v4418_v2 = vld [vmem:[#allocation31_spill] sm:$0xff] }
 0x1c8   : > { %v879_v47 = vpop.permute.xlu1 %878  ;;  %v877_v46 = vpop.permute.xlu0 %876  ;;  %v993_v26 = vmul.f32 %v4414_v54, %v4413_v28  ;;  %v944_v39 = vstv %s3961_s12  ;;  %v1922_v0 = vsel %vm693_vm7, %v1920_v60, %v1921_v45  ;;  %v1924_v41 = vsel %vm693_vm7, %v1921_v45, %v1923_v63  ;;  %s2463_s12 = sshll.u32 %s2722_s24, 11  ;;  %s2139_s24 = scalar_lea.sflag [#allocation5], %s2945_s9 }
 0x1c9   : > { %v883_v42 = vadd.f32 %v879_v47, %v862_v38  ;;  %v882_v62 = vadd.f32 %v877_v46, %v861_v59  ;;  %v1032_v49 = vrot.slane %v1026_v27, 1  ;;  %v1034_v11 = vrot.slane %v1027_v7, 1 }
 0x1ca   : > { %1529 = vrot.lane.b32.xlu0 %v1526_v53, %s4386_s30  ;;  %1531 = vrot.lane.b32.xlu1 %v1528_v48, %s4386_s30  ;;  %v1008_v10 = vadd.f32 %v4415_v14, %v994_v6  ;;  %v1007_v35 = vadd.f32 %v4416_v40, %v993_v26  ;;  %v1031_v53 = vrot.slane %v1025_v44, 1  ;;  %v2118_v48 = vrot.slane %v2112_v37, 2 }
 0x1cb   : > { %v900_v33 = vadd.f32 %v896_v61, %v883_v42  ;;  %v899_v12 = vadd.f32 %v894_v29, %v882_v62  ;;  %v2119_v47 = vrot.slane %v2113_v5, 2  ;;  %v2121_v46 = vrot.slane %v2114_v4, 2  ;;  %v4417_v61 = vld [vmem:[#allocation23_spill] sm:$0xff] }
 0x1cc   : > { %v917_v31 = vpop.permute.xlu1 %916  ;;  %v915_v58 = vpop.permute.xlu0 %914  ;;  %v1022_v29 = vadd.f32 %v4417_v61, %v1008_v10  ;;  %v1021_v30 = vadd.f32 %v4418_v2, %v1007_v35  ;;  %v1085_v55 = vmul.f32 %v1083_v36, %v4410_v8  ;;  %v1086_v60 = vmul.f32 %v1083_v36, %v4411_v51  ;;  %v4419_v10 = vld [vmem:[#allocation27_spill] sm:$0xff]  ;;  %v4420_v35 = vld [vmem:[#allocation29_spill] sm:$0xff] }
 0x1cd   : > { %v921_v56 = vadd.f32 %v917_v31, %v900_v33  ;;  %v920_v50 = vadd.f32 %v915_v58, %v899_v12  ;;  %v1084_v45 = vmul.f32 %v1083_v36, %v4413_v28  ;;  %v1035_v7 = vsel %vm633_vm6, %v1032_v49, %v1034_v11  ;;  %v4423_v61 = vld [vmem:[#allocation33_spill] sm:$0xff] }
 0x1ce   : > { %1727 = vrot.lane.b32.xlu0 %v1724_v25, %s4386_s30  ;;  %1729 = vrot.lane.b32.xlu1 %v1726_v57, %s4386_s30  ;;  %v1033_v6 = vsel %vm633_vm6, %v1031_v53, %v1032_v49  ;;  %v1039_v12 = vadd.f32 %v1035_v7, %v1022_v29  ;;  %v2120_v8 = vsel %vm693_vm7, %v2118_v48, %v2119_v47  ;;  %v1091_v36 = vrot.slane %v1085_v55, 2 }
 0x1cf   : > { %v1038_v31 = vadd.f32 %v1033_v6, %v1021_v30  ;;  %v2122_v51 = vsel %vm693_vm7, %v2119_v47, %v2121_v46  ;;  %v1093_v58 = vrot.slane %v1086_v60, 2  ;;  %v1090_v28 = vrot.slane %v1084_v45, 2  ;;  %v4422_v47 = vld [vmem:[#allocation32_spill] sm:$0xff] }
 0x1d0   : > { %v938_v38 = vpop.permute.xlu1 %937  ;;  %v936_v59 = vpop.permute.xlu0 %935  ;;  %v1222_v25 = vstv %s4003_s3  ;;  %v1190_v57 = vstv %s4005_s17  ;;  %v1281_v48 = vstv %s2387_s16  ;;  %s2154_s3 = sshll.u32 %s3953_s18, 4  ;;  %s4250_s3 = int_to_ptr.vmem [resolvable:$true] %s2154_s3 }
 0x1d1   : > { %v942_v42 = vadd.f32 %v938_v38, %v921_v56  ;;  %v941_v62 = vadd.f32 %v936_v59, %v920_v50  ;;  %v1224_v40 = vmul.f32 %v1222_v25, %v4419_v10  ;;  %v1225_v56 = vmul.f32 %v1222_v25, %v4420_v35  ;;  %v4421_v50 = vld [vmem:[#allocation26_spill] sm:$0xff] }
 0x1d2   : > { %1925 = vrot.lane.b32.xlu0 %v1922_v0, %s4386_s30  ;;  %1927 = vrot.lane.b32.xlu1 %v1924_v41, %s4386_s30  ;;  %v1092_v0 = vsel %vm693_vm7, %v1090_v28, %v1091_v36  ;;  %v1223_v38 = vmul.f32 %v1222_v25, %v4421_v50  ;;  %v1192_v59 = vmul.f32 %v1190_v57, %v4419_v10 }
 0x1d3   : > { %v946_v63 = vadd.f32 %v944_v39, %v942_v42  ;;  %v945_v27 = vadd.f32 %v944_v39, %v941_v62  ;;  %v1094_v39 = vsel %vm693_vm7, %v1091_v36, %v1093_v58  ;;  %v1191_v53 = vmul.f32 %v1190_v57, %v4421_v50 }
 0x1d4   : > { %v1056_v1 = vpop.permute.xlu1 %1055  ;;  %v1054_v33 = vpop.permute.xlu0 %1053  ;;  %v1206_v46 = vadd.f32 %v4422_v47, %v1192_v59  ;;  %v1142_v42 = vstv %s4022_s7  ;;  %v1230_v60 = vrot.slane %v1224_v40, 1  ;;  %v1232_v45 = vrot.slane %v1225_v56, 1  ;;  %s4248_s7 = scalar_lea.hbm %s4309_s6, %s2463_s12 }
 0x1d5   : > { %2360 = vst.msk [vmem:[%s3953_s18 + $0x18] sm:$0xff] %vm749_vm8, %v946_v63  ;;  %2359 = vst.msk [vmem:[%s3953_s18 + $0x10] sm:$0xff] %vm749_vm8, %v945_v27  ;;  %v1060_v44 = vadd.f32 %v1056_v1, %v1039_v12  ;;  %v1059_v37 = vadd.f32 %v1054_v33, %v1038_v31  ;;  %v1205_v29 = vadd.f32 %v4423_v61, %v1191_v53  ;;  %v1229_v63 = vrot.slane %v1223_v38, 1  ;;  %v4424_v27 = vld [vmem:[#allocation35_spill] sm:$0xff]  ;;  %v4425_v1 = vld [vmem:[#allocation36_spill] sm:$0xff] }
 0x1d6   : > { %2123 = vrot.lane.b32.xlu0 %v2120_v8, %s4386_s30  ;;  %2125 = vrot.lane.b32.xlu1 %v2122_v51, %s4386_s30  ;;  %v1220_v7 = vadd.f32 %v4424_v27, %v1206_v46  ;;  %v1283_v31 = vmul.f32 %v1281_v48, %v4419_v10  ;;  %v1284_v8 = vmul.f32 %v1281_v48, %v4420_v35  ;;  %v1340_v46 = vstv %s2390_s10  ;;  %s2419_s30 = sld [smem:[#allocation8 + $0x286]]  ;;  %s2640_s10 = scalar_lea.vmem %s4250_s3, 2048 }
 0x1d7   : > { %v1219_v6 = vadd.f32 %v4425_v1, %v1205_v29  ;;  %v1282_v51 = vmul.f32 %v1281_v48, %v4421_v50  ;;  %v1233_v28 = vsel %vm633_vm6, %v1230_v60, %v1232_v45  ;;  %v1421_v35 = vmul.f32 %v3756_v43, %v3404_v21  ;;  %p2641_p10 = scmp.ne.s32.totalorder %s4250_s3, %s2640_s10 }
 0x1d8   : > { %v1077_v5 = vpop.permute.xlu1 %1076  ;;  %v1075_v4 = vpop.permute.xlu0 %1074  ;;  %v1291_v25 = vrot.slane %v1284_v8, 2 }
 0x1d9   : > { %v1081_v54 = vadd.f32 %v1077_v5, %v1060_v44  ;;  %v1080_v26 = vadd.f32 %v1075_v4, %v1059_v37  ;;  %v1231_v37 = vsel %vm633_vm6, %v1229_v63, %v1230_v60  ;;  %v1237_v4 = vadd.f32 %v1233_v28, %v1220_v7  ;;  %p2642_p0 = pnand %p2641_p10, %p2887_p12 }
 0x1da   : > { %v1288_v57 = vrot.slane %v1282_v51, 2  ;;  %v1427_v53 = vrot.slane %v1421_v35, 1 }
 0x1db   : > { %v1098_v41 = vadd.f32 %v1094_v39, %v1081_v54  ;;  %v1097_v49 = vadd.f32 %v1092_v0, %v1080_v26  ;;  %v1236_v54 = vadd.f32 %v1231_v37, %v1219_v6  ;;  %v1289_v26 = vrot.slane %v1283_v31, 2  ;;  %p2643_p9 = pneg %p2642_p0 }
 0x1dc   : > { %v1115_v11 = vpop.permute.xlu1 %1114  ;;  %v1113_v14 = vpop.permute.xlu0 %1112 }
 0x1dd   : > { %v1119_v2 = vadd.f32 %v1115_v11, %v1098_v41  ;;  %v1118_v30 = vadd.f32 %v1113_v14, %v1097_v49  ;;  %v1292_v10 = vsel %vm693_vm7, %v1289_v26, %v1291_v25  ;;  %v1290_v40 = vsel %vm693_vm7, %v1288_v57, %v1289_v26 }
 0x1e0   : > { %v1136_v62 = vpop.permute.xlu1 %1135  ;;  %v1134_v55 = vpop.permute.xlu0 %1133 }
 0x1e1   : > { %v1140_v33 = vadd.f32 %v1136_v62, %v1119_v2  ;;  %v1139_v12 = vadd.f32 %v1134_v55, %v1118_v30  ;;  %v1429_v62 = vsel %vm633_vm6, %v1427_v53, %v1428_v13  ;;  %v1982_v53 = vstv %s4110_s29 }
 0x1e2   : > { %v1434_v45 = vadd.f32 %v1429_v62, %v3866_v32 }
 0x1e3   : > { %v1144_v36 = vadd.f32 %v1142_v42, %v1140_v33  ;;  %v1143_v58 = vadd.f32 %v1142_v42, %v1139_v12  ;;  %v1479_v42 = vstv %s2403_s11  ;;  %s2742_s11 = smov [#allocation11]  }
 0x1e4   : > { %v1254_v44 = vpop.permute.xlu1 %1253  ;;  %v1252_v5 = vpop.permute.xlu0 %1251  ;;  %v1482_v43 = vmul.f32 %v1479_v42, %v3477_v23  ;;  %v4057_v7 = vmul.f32 %v1479_v42, %v3406_v22  ;;  %v1480_v35 = vmul.f32 %v1479_v42, %v3404_v21 }
 0x1e5   : > { %2376 = vst.msk [vmem:[%s3953_s18 + $0x28] sm:$0xff] %vm749_vm8, %v1144_v36  ;;  %2375 = vst.msk [vmem:[%s3953_s18 + $0x20] sm:$0xff] %vm749_vm8, %v1143_v58  ;;  %v1258_v39 = vadd.f32 %v1254_v44, %v1237_v4  ;;  %v1257_v0 = vadd.f32 %v1252_v5, %v1236_v54 }
 0x1e6   : > { %v1489_v13 = vrot.slane %v1482_v43, 2  ;;  %v1487_v33 = vrot.slane %v4057_v7, 2  ;;  %v2014_v43 = vstv %s2448_s0 }
 0x1e8   : > { %v1275_v41 = vpop.permute.xlu1 %1274  ;;  %v1273_v49 = vpop.permute.xlu0 %1272  ;;  %v1490_v22 = vsel %vm693_vm7, %v1487_v33, %v1489_v13  ;;  %v2017_v13 = vmul.f32 %v2014_v43, %v3770_v3 }
 0x1e9   : > { %v1279_v11 = vadd.f32 %v1275_v41, %v1258_v39  ;;  %v1278_v14 = vadd.f32 %v1273_v49, %v1257_v0 }
 0x1ea   : > { %v2024_v7 = vrot.slane %v2017_v13, 1 }
 0x1eb   : > { %v1296_v56 = vadd.f32 %v1292_v10, %v1279_v11  ;;  %v1295_v50 = vadd.f32 %v1290_v40, %v1278_v14  ;;  %v1618_v14 = vstv %s2416_s13  ;;  %s2644_s13 = sshll.u32 %s2742_s11, 4  ;;  %s2645_s13 = int_to_ptr.vmem [resolvable:$false] %s2644_s13 }
 0x1ec   : > { %v1313_v38 = vpop.permute.xlu1 %1312  ;;  %v1311_v59 = vpop.permute.xlu0 %1310  ;;  %p2647_p3 = scmp.lt.s32.totalorder %s4250_s3, %s2645_s13 }
 0x1ed   : > { %v1317_v48 = vadd.f32 %v1313_v38, %v1296_v56  ;;  %v1316_v47 = vadd.f32 %v1311_v59, %v1295_v50  ;;  %v1586_v56 = vstv %s2413_s28  ;;  %v1784_v50 = vstv %s2429_s27  ;;  %s2646_s28 = scalar_lea.vmem %s2645_s13, 4096 }
 0x1ee   : > { %v1621_v38 = vmul.f32 %v1618_v14, %v3697_v34  ;;  %v1816_v59 = vstv %s2432_s19  ;;  %v1786_v42 = vmul.f32 %v1784_v50, %v3234_v18  ;;  %p2648_p6 = scmp.lt.s32.totalorder %s2646_s28, %s2640_s10 }
 0x1ef   : > { %v1818_v62 = vmul.f32 %v1816_v59, %v3234_v18 }
 0x1f0   : > { %v1334_v61 = vpop.permute.xlu1 %1333  ;;  %v1332_v29 = vpop.permute.xlu0 %1331  ;;  %p2649_p5 = por %p2648_p6, %p2647_p3 }
 0x1f1   : > { %v1338_v2 = vadd.f32 %v1334_v61, %v1317_v48  ;;  %v1337_v30 = vadd.f32 %v1332_v29, %v1316_v47  ;;  %v1620_v48 = vmul.f32 %v1618_v14, %v3228_v16  ;;  %v1619_v47 = vmul.f32 %v1618_v14, %v3226_v15 }
 0x1f2   : > { %v1587_v61 = vmul.f32 %v1586_v56, %v3226_v15  ;;  %v1819_v29 = vmul.f32 %v1816_v59, %v3728_v24  ;;  %v2016_v14 = vmul.f32 %v2014_v43, %v3238_v20  ;;  %p2650_p4 = pnand %p2649_p5, %p2643_p9 }
 0x1f3   : > { %v1342_v55 = vadd.f32 %v1340_v46, %v1338_v2  ;;  %v1341_v60 = vadd.f32 %v1340_v46, %v1337_v30  ;;  %v1588_v46 = vmul.f32 %v1586_v56, %v3228_v16  ;;  %v1486_v30 = vrot.slane %v1480_v35, 2 }
 0x1f4   : > { %v1452_v63 = vpop.permute.xlu1 %1451  ;;  %v1450_v27 = vpop.permute.xlu0 %1449  ;;  %v2015_v35 = vmul.f32 %v2014_v43, %v3236_v19 }
 0x1f5   : > { %2392 = vst.msk [vmem:[%s3953_s18 + $0x38] sm:$0xff] %vm749_vm8, %v1342_v55  ;;  %2391 = vst.msk [vmem:[%s3953_s18 + $0x30] sm:$0xff] %vm749_vm8, %v1341_v60  ;;  %v1456_v1 = vadd.f32 %v1452_v63, %v3883_v52  ;;  %v4064_v9 = vadd.f32 %v1450_v27, %v1434_v45  ;;  %v1785_v55 = vmul.f32 %v1784_v50, %v3232_v17  ;;  %v1628_v45 = vrot.slane %v1621_v38, 1 }
 0x1f6   : > { %v1984_v60 = vmul.f32 %v1982_v53, %v3238_v20  ;;  %v1817_v63 = vmul.f32 %v1816_v59, %v3232_v17  ;;  %v1626_v27 = vrot.slane %v1620_v48, 1  ;;  %v1488_v38 = vsel %vm693_vm7, %v1486_v30, %v1487_v33 }
 0x1f7   : > { %v1824_v59 = vrot.slane %v1818_v62, 1  ;;  %v2022_v30 = vrot.slane %v2016_v14, 1 }
 0x1f8   : > { %v1473_v6 = vpop.permute.xlu1 %1472  ;;  %v4066_v23 = vpop.permute.xlu0 %1470 }
 0x1f9   : > { %v1477_v32 = vadd.f32 %v1473_v6, %v1456_v1  ;;  %v1625_v1 = vrot.slane %v1619_v47, 1  ;;  %v1677_v6 = vstv %s2419_s30  ;;  %v1875_v47 = vstv %s4121_s1 }
 0x1fa   : > { %v1680_v48 = vmul.f32 %v1677_v6, %v3697_v34  ;;  %v2021_v34 = vrot.slane %v2015_v35, 1  ;;  %v1476_v13 = vadd.f32 %v4066_v23, %v4064_v9 }
 0x1fb   : > { %v4072_v12 = vadd.f32 %v1490_v22, %v1477_v32  ;;  %v1983_v32 = vmul.f32 %v1982_v53, %v3236_v19  ;;  %v1826_v22 = vrot.slane %v1819_v29, 1  ;;  %v1823_v53 = vrot.slane %v1817_v63, 1 }
 0x1fc   : > { %v4074_v31 = vpop.permute.xlu1 %1510  ;;  %v4076_v8 = vpop.permute.xlu0 %1508  ;;  %v1679_v29 = vmul.f32 %v1677_v6, %v3228_v16  ;;  %v4166_v16 = vmul.f32 %v1875_v47, %v3234_v18  ;;  %v2025_v18 = vsel %vm633_vm6, %v2022_v30, %v2024_v7 }
 0x1fd   : > { %v1827_v33 = vsel %vm633_vm6, %v1824_v59, %v1826_v22  ;;  %v2073_v22 = vstv %s4140_s2 }
 0x200   : > { %v4078_v52 = vpop.permute.xlu1 %1597  ;;  %v4080_v51 = vpop.permute.xlu0 %1595 }
 0x201   : > { %v1602_v43 = vadd.f32 %v4078_v52, %v1588_v46  ;;  %v1878_v46 = vmul.f32 %v1875_v47, %v3728_v24 }
 0x204   : > { %v4082_v36 = vpop.permute.xlu1 %1795  ;;  %v4084_v58 = vpop.permute.xlu0 %1793 }
 0x205   : > { %v1799_v63 = vadd.f32 %v4084_v58, %v1785_v55  ;;  %v1883_v58 = vrot.slane %v4166_v16, 2  ;;  %v1885_v55 = vrot.slane %v1878_v46, 2 }
 0x208   : > { %v4086_v28 = vpop.permute.xlu1 %1993  ;;  %v4088_v44 = vpop.permute.xlu0 %1991 }
 0x209   : > { %v1998_v14 = vadd.f32 %v4086_v28, %v1984_v60  ;;  %v1997_v35 = vadd.f32 %v4088_v44, %v1983_v32 }
 0x20c   : > { %v4090_v37 = vpop.permute.xlu1 %1611  ;;  %v4092_v5 = vpop.permute.xlu0 %1609 }
 0x210   : > { %v4094_v4 = vpop.permute.xlu1 %1809  ;;  %v4096_v54 = vpop.permute.xlu0 %1807 }
 0x211   : > { %v1813_v24 = vadd.f32 %v4096_v54, %v1799_v63  ;;  %v1876_v54 = vmul.f32 %v1875_v47, %v3232_v17  ;;  %v1515_v47 = vadd.f32 %v4074_v31, %v4072_v12 }
 0x214   : > { %v4098_v26 = vpop.permute.xlu1 %2007  ;;  %v4100_v25 = vpop.permute.xlu0 %2005 }
 0x218   : > { %v4102_v57 = vpop.permute.xlu1 %1649  ;;  %v4104_v39 = vpop.permute.xlu0 %1647 }
 0x21c   : > { %v4106_v0 = vpop.permute.xlu1 %1847  ;;  %v4108_v41 = vpop.permute.xlu0 %1845 }
 0x220   : > { %v4112_v49 = vpop.permute.xlu1 %2045  ;;  %v4114_v11 = vpop.permute.xlu0 %2043 }
 0x221   : > { %4426 = vst [vmem:[#allocation34_spill] sm:$0xff] %v4112_v49  ;;  %4427 = vst [vmem:[#allocation30_spill] sm:$0xff] %v4114_v11  ;;  %v1629_v11 = vsel %vm633_vm6, %v1626_v27, %v1628_v45  ;;  %v1678_v49 = vmul.f32 %v1677_v6, %v3226_v15  ;;  %v1616_v15 = vadd.f32 %v4090_v37, %v1602_v43 }
 0x222   : > { %v1825_v6 = vsel %vm633_vm6, %v1823_v53, %v1824_v59  ;;  %v2075_v53 = vmul.f32 %v2073_v22, %v3238_v20 }
 0x223   : > { %v1633_v9 = vadd.f32 %v1629_v11, %v1616_v15  ;;  %v2012_v11 = vadd.f32 %v4098_v26, %v1998_v14  ;;  %v1830_v28 = vadd.f32 %v1825_v6, %v1813_v24  ;;  %v1736_v6 = vstv %s4198_s5 }
 0x224   : > { %v4116_v10 = vpop.permute.xlu1 %1670  ;;  %v4118_v40 = vpop.permute.xlu0 %1668  ;;  %v2081_v7 = vrot.slane %v2075_v53, 2 }
 0x225   : > { %v1654_v59 = vadd.f32 %v4102_v57, %v1633_v9  ;;  %v1886_v57 = vsel %vm693_vm7, %v1883_v58, %v1885_v55  ;;  %v1851_v26 = vadd.f32 %v4108_v41, %v1830_v28  ;;  %v2132_v28 = vstv %s4221_s14 }
 0x227   : > { %v1675_v17 = vadd.f32 %v4116_v10, %v1654_v59  ;;  %v1538_v10 = vstv %s4178_s4 }
 0x228   : > { %v4130_v2 = vpop.permute.xlu1 %1868  ;;  %v4132_v21 = vpop.permute.xlu0 %1866  ;;  %v4430_v12 = vld [vmem:[#allocation34_spill] sm:$0xff] }
 0x22c   : > { %v4145_v56 = vpop.permute.xlu1 %2066  ;;  %v4147_v50 = vpop.permute.xlu0 %2064 }
 0x22d   : > { %4428 = vst [vmem:[#allocation21_spill] sm:$0xff] %v4145_v56  ;;  %4429 = vst [vmem:[#allocation18_spill] sm:$0xff] %v4147_v50  ;;  %v1601_v56 = vadd.f32 %v4080_v51, %v1587_v61  ;;  %v1627_v50 = vsel %vm633_vm6, %v1625_v1, %v1626_v27  ;;  %v1687_v51 = vrot.slane %v1680_v48, 2  ;;  %v1800_v61 = vadd.f32 %v4082_v36, %v1786_v42 }
 0x22e   : > { %v1685_v27 = vrot.slane %v1679_v29, 2  ;;  %v1684_v1 = vrot.slane %v1678_v49, 2  ;;  %v2023_v36 = vsel %vm633_vm6, %v2021_v34, %v2022_v30 }
 0x22f   : > { %v1615_v52 = vadd.f32 %v4092_v5, %v1601_v56  ;;  %v1814_v37 = vadd.f32 %v4094_v4, %v1800_v61  ;;  %v1493_v56 = vadd.f32 %v1488_v38, %v1476_v13  ;;  %v2074_v38 = vmul.f32 %v2073_v22, %v3236_v19 }
 0x230   : > { %v4161_v62 = vpop.permute.xlu1 %1708  ;;  %v4163_v45 = vpop.permute.xlu0 %1706  ;;  %v1688_v42 = vsel %vm693_vm7, %v1685_v27, %v1687_v51  ;;  %v1686_v4 = vsel %vm693_vm7, %v1684_v1, %v1685_v27 }
 0x231   : > { %v1632_v23 = vadd.f32 %v1627_v50, %v1615_v52  ;;  %v2011_v50 = vadd.f32 %v4100_v25, %v1997_v35  ;;  %v1831_v29 = vadd.f32 %v1827_v33, %v1814_v37  ;;  %v1882_v25 = vrot.slane %v1876_v54, 2 }
 0x232   : > { %v1514_v43 = vadd.f32 %v4076_v8, %v1493_v56  ;;  %v2029_v33 = vadd.f32 %v2025_v18, %v2012_v11  ;;  %v1692_v41 = vadd.f32 %v1688_v42, %v1675_v17  ;;  %v4431_v8 = vld [vmem:[#allocation30_spill] sm:$0xff]  ;;  %v2080_v13 = vrot.slane %v2074_v38, 2 }
 0x233   : > { %v1653_v48 = vadd.f32 %v4104_v39, %v1632_v23  ;;  %v2076_v39 = vmul.f32 %v2073_v22, %v3770_v3  ;;  %v1852_v20 = vadd.f32 %v4106_v0, %v1831_v29  ;;  %v1872_v3 = vadd.f32 %v4132_v21, %v1851_v26 }
 0x234   : > { %v4184_v5 = vpop.permute.xlu1 %1906  ;;  %v4186_v49 = vpop.permute.xlu0 %1904  ;;  %v2050_v31 = vadd.f32 %v4430_v12, %v2029_v33  ;;  %v1884_v51 = vsel %vm693_vm7, %v1882_v25, %v1883_v58  ;;  %v1713_v21 = vadd.f32 %v4161_v62, %v1692_v41  ;;  %v4432_v37 = vld [vmem:[#allocation21_spill] sm:$0xff]  ;;  %v2082_v35 = vsel %vm693_vm7, %v2080_v13, %v2081_v7 }
 0x235   : > { %v1674_v32 = vadd.f32 %v4118_v40, %v1653_v48  ;;  %v2028_v40 = vadd.f32 %v2023_v36, %v2011_v50  ;;  %v1873_v30 = vadd.f32 %v4130_v2, %v1852_v20  ;;  %v2083_v2 = vrot.slane %v2076_v39, 2  ;;  %v4433_v36 = vld [vmem:[#allocation18_spill] sm:$0xff] }
 0x236   : > { %v1889_v1 = vadd.f32 %v1884_v51, %v1872_v3  ;;  %v2071_v24 = vadd.f32 %v4432_v37, %v2050_v31 }
 0x237   : > { %v1691_v19 = vadd.f32 %v1686_v4, %v1674_v32  ;;  %v2049_v52 = vadd.f32 %v4431_v8, %v2028_v40  ;;  %v1890_v27 = vadd.f32 %v1886_v57, %v1873_v30  ;;  %v2084_v14 = vsel %vm693_vm7, %v2081_v7, %v2083_v2 }
 0x238   : > { %v2105_v60 = vpop.permute.xlu1 %2104  ;;  %v2103_v44 = vpop.permute.xlu0 %2102  ;;  %v1910_v23 = vadd.f32 %v4186_v49, %v1889_v1  ;;  %v1934_v4 = vstv %s4213_s25  ;;  %v2088_v59 = vadd.f32 %v2084_v14, %v2071_v24 }
 0x239   : > { %v1712_v46 = vadd.f32 %v4163_v45, %v1691_v19  ;;  %v2070_v58 = vadd.f32 %v4433_v36, %v2049_v52  ;;  %v1911_v9 = vadd.f32 %v4184_v5, %v1890_v27 }
 0x23a   : > { %v2109_v53 = vadd.f32 %v2105_v60, %v2088_v59 }
 0x23b   : > { %v2087_v48 = vadd.f32 %v2082_v35, %v2070_v58 }
 0x23c   : > { %v1532_v34 = vpop.permute.xlu1 %1531  ;;  %v1530_v0 = vpop.permute.xlu0 %1529 }
 0x23d   : > { %v1536_v16 = vadd.f32 %v1532_v34, %v1515_v47  ;;  %v1535_v15 = vadd.f32 %v1530_v0, %v1514_v43  ;;  %v2108_v11 = vadd.f32 %v2103_v44, %v2087_v48 }
 0x23f   : > { %v1540_v61 = vadd.f32 %v1538_v10, %v1536_v16  ;;  %v1539_v63 = vadd.f32 %v1538_v10, %v1535_v15 }
 0x240   : > { %v1730_v18 = vpop.permute.xlu1 %1729  ;;  %v1728_v22 = vpop.permute.xlu0 %1727 }
 0x241   : > { %2408 = vst.msk [vmem:[%s3953_s18 + $0x48] sm:$0xff] %vm749_vm8, %v1540_v61  ;;  %2407 = vst.msk [vmem:[%s3953_s18 + $0x40] sm:$0xff] %vm749_vm8, %v1539_v63  ;;  %v1734_v62 = vadd.f32 %v1730_v18, %v1713_v21  ;;  %v1733_v45 = vadd.f32 %v1728_v22, %v1712_v46 }
 0x243   : > { %v1738_v42 = vadd.f32 %v1736_v6, %v1734_v62  ;;  %v1737_v55 = vadd.f32 %v1736_v6, %v1733_v45 }
 0x244   : > { %v1928_v54 = vpop.permute.xlu1 %1927  ;;  %v1926_v56 = vpop.permute.xlu0 %1925 }
 0x245   : > { %2424 = vst.msk [vmem:[%s3953_s18 + $0x58] sm:$0xff] %vm749_vm8, %v1738_v42  ;;  %2423 = vst.msk [vmem:[%s3953_s18 + $0x50] sm:$0xff] %vm749_vm8, %v1737_v55  ;;  %v1932_v5 = vadd.f32 %v1928_v54, %v1911_v9  ;;  %v1931_v49 = vadd.f32 %v1926_v56, %v1910_v23 }
 0x247   : > { %v1936_v50 = vadd.f32 %v1934_v4, %v1932_v5  ;;  %v1935_v29 = vadd.f32 %v1934_v4, %v1931_v49 }
 0x248   : > { %v2126_v17 = vpop.permute.xlu1 %2125  ;;  %v2124_v32 = vpop.permute.xlu0 %2123 }
 0x249   : > { %2440 = vst.msk [vmem:[%s3953_s18 + $0x68] sm:$0xff] %vm749_vm8, %v1936_v50  ;;  %2439 = vst.msk [vmem:[%s3953_s18 + $0x60] sm:$0xff] %vm749_vm8, %v1935_v29  ;;  %v2130_v57 = vadd.f32 %v2126_v17, %v2109_v53  ;;  %v2129_v39 = vadd.f32 %v2124_v32, %v2108_v11 }
 0x24b   : > { %v2134_v60 = vadd.f32 %v2132_v28, %v2130_v57  ;;  %v2133_v44 = vadd.f32 %v2132_v28, %v2129_v39 }
 0x24d   : > { %2456 = vst.msk [vmem:[%s3953_s18 + $0x78] sm:$0xff] %vm749_vm8, %v2134_v60  ;;  %2455 = vst.msk [vmem:[%s3953_s18 + $0x70] sm:$0xff] %vm749_vm8, %v2133_v44 }
 0x24e   : > { %2653 = shalt.err (!%p2650_p4)
}
 0x24f   : > { %s2654_s18 = scalar_lea.hbm %s4248_s7, 2048  ;;  %s2658_s29 = scalar_lea.hbm %s4309_s6, 4096 }
 0x250   : > { %p2655_p8 = scmp.ne.s32.totalorder %s4248_s7, %s2654_s18  ;;  %p2659_p2 = scmp.lt.u32.totalorder %s4248_s7, %s4309_s6 }
 0x251   : > { %p2660_p11 = scmp.lt.u32.totalorder %s2658_s29, %s2654_s18  ;;  %p2662_p10 = scmp.lt.u32.totalorder %s2654_s18, %s4248_s7 }
 0x252   : > { %p2656_p13 = pnand %p2655_p8, %p2887_p12 }
 0x253   : > { %p2661_p7 = por %p2660_p11, %p2659_p2 }
 0x254   : > { %p2657_p1 = pneg %p2656_p13 }
 0x255   : > { %p2663_p0 = por %p2662_p10, %p2661_p7 }
 0x257   : > { %p2664_p9 = pnand %p2663_p0, %p2657_p1 }
 0x259   : > { %2667 = shalt.err (!%p2664_p9)
}
 0x25a   : > { %s2743_s1 = smov 128   ;;  %s2744_s2 = smov 8  }
 0x25b   : > { %2478 = dma.vmem_to_hbm [thread:$0]  (%p2887_p12), %s4250_s3, 2048, %s4248_s7, %s2139_s24, %s2743_s1, %s2743_s1, %s2744_s2  }
 0x25c PF: > { %s2169_s4 = sand.u32 1, %s2710_s21   ;;  %p4434_p3 = scmp.ne.s32.totalorder %s4350_s8, 0 }
 0x25d   : > { %p4435_p6 = scmp.ge.s32.totalorder %s2730_s26, 2  ;;  %s2170_s5 = scalar_lea.sflag [#allocation5], %s2169_s4 }
 0x25f   : > { %p2495_p5 = pnand %p4435_p6, %p4434_p3 }
 0x261   : > { %2705 = dma.done.wait (!%p2495_p5), %s2170_s5, 2048  }
 0x262   : > { %2707 = vsyncadd (!%p2495_p5), %s2170_s5, 4294965248  ;;  %s24_s26 = sadd.s32 1, %s2730_s26   ;;  %s4436_s24 = sld [smem:[#allocation16_spill]] }
 0x263   : > { %p21_p4 = scmp.ge.s32.totalorder %s24_s26, 4   ;;  %s4437_s25 = sld [smem:[#allocation17_spill]] }
 0x264   : > { %s4438_s21 = smov %s2714_s22  ;;  %s4439_s22 = smov %s2718_s23 }
 0x265   : > { %s4440_s23 = smov %s2899_s20  ;;  %23 = sbr.rel (!%p21_p4) target bundleno = 15 (0xf), region = 118 }
 0x26c   :  { %2175 = vsyncpa [#allocation4], 1 }
 0x26d   :  { %2177 = vsyncpa [#allocation4 + $0x1], 1 }
 0x26e   :  { %2178 = vsyncpa [#allocation5], 1 }
 0x26f   :  { %2180 = vsyncpa [#allocation5 + $0x1], 1 }
 0x270   :  { %2181 = vsyncpa [#allocation6], 1 }
 0x271   :  { %2183 = vsyncpa [#allocation6 + $0x1], 1 }
 0x272   :  { %2184 = vsyncpa [#allocation9], 1 }

</bundles_post_ra>
